<compile_context>
chip_gen: v6e
topology: v6e:2x2x1
jax: 0.10.0
libtpu: 0.0.40
codegen_flags: <defaults>
</compile_context>

<pallas_src>
import functools

import numpy as np

import jax
import jax.numpy as jnp
from jax import lax
from jax.experimental import pallas as pl
from jax.experimental.pallas import tpu as pltpu

EPS = 1e-5
SUBLANE = 8
LANE = 128

# MXU operand dtype.  jnp.bfloat16 cuts MXU passes ~3x on v6e/v7x and halves
# weight traffic, but relaxes parity vs the f32 reference to ~1e-2; f32 keeps
# the strict 1e-3 check below.
MATMUL_DTYPE = jnp.float32


def _round_up(v, m):
    return ((v + m - 1) // m) * m


def _const_map(ndim):
    def index_map(g):
        return (0,) * ndim
    return index_map


@functools.lru_cache(maxsize=None)
def _taps_for(H, W, NG, Lg):
    """Static roll shifts + out-of-image masks for the nine 3x3 taps over a
    lane-folded group of NG images (per-image stride H*W, padded to Lg)."""
    HW = H * W
    l = np.arange(Lg)
    in_img = l < NG * HW
    local = np.where(in_img, l % HW, 0)
    row, col = local // W, local % W
    shifts, masks = [], []
    for dy in (-1, 0, 1):
        for dx in (-1, 0, 1):
            shifts.append(int((-(dy * W + dx)) % Lg))
            valid = (in_img & (row + dy >= 0) & (row + dy < H)
                     & (col + dx >= 0) & (col + dx < W))
            masks.append(valid.astype(np.float32))
    return tuple(shifts), np.stack(masks, 0)[:, None, :]      # (9, 1, Lg)


# ------------------------------ Pallas kernel ------------------------------ #
def residual_chain_kernel(x_ref, mask_ref,
                          s1_ref, b1_ref,    # BN1 affine            (nblk, Cp, 1)
                          w1_ref, b2_ref,    # conv1 (BN2 folded)    (nblk, Pp, Cp), (nblk, Pp, 1)
                          w2_ref, b3_ref,    # conv2 im2col (BN3)    (nblk, Pp, 9*Pp), (nblk, Pp, 1)
                          w3_ref, cb3_ref,   # conv3                 (nblk, Cp, Pp), (nblk, Cp, 1)
                          out_ref, mid_ref=None,
                          *, nblk, shifts, mid_at=None):
    """Runs `nblk` Bottleneck blocks on a (Cp, Lg) lane-folded activation tile.

    The 3x3 conv is a single im2col MXU matmul per block: nine lane-rolled,
    mask-zeroed copies of the (Pp, Lg) activation are concatenated on the
    contraction (sublane) axis and hit the MXU once (one push/pop instead of
    nine matmuls + an 8-deep VPU add chain)."""
    x = x_ref[...]                                             # (Cp, Lg) f32
    for blk in range(nblk):
        # BN1 (folded affine) + ReLU
        t = jnp.maximum(x * s1_ref[blk] + b1_ref[blk], 0.0)
        # conv1 1x1 (BN2 scale folded into w1, conv1 bias folded into b2) + ReLU
        t2 = jnp.maximum(
            jnp.dot(w1_ref[blk], t.astype(MATMUL_DTYPE),
                    preferred_element_type=jnp.float32) + b2_ref[blk], 0.0)
        # conv2 3x3 (stride 1, pad 1) as ONE im2col matmul; precomputed masks
        # zero out-of-image (and cross-image / wrap) sources.
        cols = []
        for tap in range(9):
            s = shifts[tap]
            if s == 0:
                cols.append(t2)
            else:
                cols.append(pltpu.roll(t2, s, 1) * mask_ref[tap])
        patches = jnp.concatenate(cols, axis=0)                # (9*Pp, Lg)
        # BN3 (folded) + ReLU
        t3 = jnp.maximum(
            jnp.dot(w2_ref[blk], patches.astype(MATMUL_DTYPE),
                    preferred_element_type=jnp.float32) + b3_ref[blk], 0.0)
        # conv3 1x1 + residual add
        x = x + jnp.dot(w3_ref[blk], t3.astype(MATMUL_DTYPE),
                        preferred_element_type=jnp.float32) + cb3_ref[blk]
        if mid_ref is not None and blk + 1 == mid_at:
            mid_ref[...] = x                                   # intermediate branch
    out_ref[...] = x                                           # single lane-dense store


def residual_chain_pallas(x, chain, *, mid_at=None):
    """Applies a fused chain of Bottleneck blocks to a channel-major activation.

    x: (C, N, H, W) f32.  chain: kernel-format params from prepare_chain().
    If mid_at is not None, also returns the activation after the first
    `mid_at` blocks (used to fuse two consecutive residual sequences whose
    intermediate is needed elsewhere)."""
    C, N, H, W = x.shape
    HW = H * W
    nblk, Pp, Cp = chain["w1"].shape

    # Batch folded into the lane axis (per-image stride H*W).  Two lane-groups
    # when the split stays 128-aligned so a length-2 "parallel" grid axis can
    # use both v7x TensorCores; otherwise a single grid step.
    G = 2 if (N % 2 == 0 and ((N // 2) * HW) % LANE == 0) else 1
    NG = N // G
    Lg = _round_up(NG * HW, LANE)
    shifts, masks_np = _taps_for(H, W, NG, Lg)
    masks = jnp.asarray(masks_np)                              # (9, 1, Lg) constant

    xf = x.reshape(C, G, NG * HW)
    xf = jnp.pad(xf, ((0, Cp - C), (0, 0), (0, Lg - NG * HW)))
    xf = xf.reshape(Cp, G * Lg)

    weights = (chain["s1"], chain["b1"], chain["w1"], chain["b2"],
               chain["w2"], chain["b3"], chain["w3"], chain["cb3"])

    act_spec = pl.BlockSpec((Cp, Lg), lambda g: (0, g))
    mask_spec = pl.BlockSpec(masks.shape, _const_map(masks.ndim))
    w_specs = [pl.BlockSpec(w.shape, _const_map(w.ndim)) for w in weights]

    out_struct = jax.ShapeDtypeStruct((Cp, G * Lg), jnp.float32)
    if mid_at is None:
        out_shape, out_specs = out_struct, act_spec
    else:
        out_shape, out_specs = (out_struct, out_struct), (act_spec, act_spec)

    kernel = functools.partial(residual_chain_kernel, nblk=nblk,
                               shifts=shifts, mid_at=mid_at)
    res = pl.pallas_call(
        kernel,
        out_shape=out_shape,
        grid=(G,),
        in_specs=[act_spec, mask_spec] + w_specs,
        out_specs=out_specs,
        compiler_params=pltpu.CompilerParams(
            dimension_semantics=("parallel",),
            vmem_limit_bytes=32 * 1024 * 1024),
    )(xf, masks, *weights)

    def unfold(y):
        y = y.reshape(Cp, G, Lg)[:C, :, :NG * HW]
        return y.reshape(C, N, H, W)

    if mid_at is None:
        return unfold(res)
    return unfold(res[0]), unfold(res[1])                      # (final, mid)


# ----------------------- kernel-format parameter prep ----------------------- #
def prepare_chain(seq_list):
    """Concatenates the stacked per-block params of residual sequences that run
    back-to-back and converts them to kernel format: eval-mode BN folded to
    affine, BN2/BN3 scales and conv1/conv2 biases folded into the adjacent
    convs, 3x3 weights laid out (nblk, Pp, 9*Pp) for the im2col matmul, and
    channel dims zero-padded to full 8-sublane tiles.  Runs once at setup."""
    raw = {k: jnp.concatenate([s[k] for s in seq_list], axis=0)
           for k in seq_list[0]}
    nblk, P, C = raw["w1"].shape
    Cp, Pp = _round_up(C, SUBLANE), _round_up(P, SUBLANE)
    dc, dp = Cp - C, Pp - P

    s1 = jnp.pad(raw["s1"], ((0, 0), (0, dc)))[:, :, None]
    b1 = jnp.pad(raw["b1"], ((0, 0), (0, dc)))[:, :, None]
    w1 = jnp.pad(raw["w1"] * raw["s2"][:, :, None], ((0, 0), (0, dp), (0, dc)))
    b2 = jnp.pad(raw["s2"] * raw["cb1"] + raw["b2"], ((0, 0), (0, dp)))[:, :, None]
    w2 = raw["w2"] * raw["s3"][:, :, None, None, None]              # (nblk,P,P,3,3)
    w2 = jnp.pad(w2, ((0, 0), (0, dp), (0, dp), (0, 0), (0, 0)))
    # (blk, o, ky, kx, i) -> (nblk, Pp, 9*Pp); contraction index = tap*Pp + i
    w2 = jnp.transpose(w2, (0, 1, 3, 4, 2)).reshape(nblk, Pp, 9 * Pp)
    b3 = jnp.pad(raw["s3"] * raw["cb2"] + raw["b3"], ((0, 0), (0, dp)))[:, :, None]
    w3 = jnp.pad(raw["w3"], ((0, 0), (0, dc), (0, dp)))
    cb3 = jnp.pad(raw["cb3"], ((0, 0), (0, dc)))[:, :, None]
    return dict(s1=s1, b1=b1, w1=w1.astype(MATMUL_DTYPE), b2=b2,
                w2=w2.astype(MATMUL_DTYPE), b3=b3,
                w3=w3.astype(MATMUL_DTYPE), cb3=cb3)


def prepare_hourglass_kernel_params(hg):
    """Per-level kernel-format params with launch-count-reducing fusions:
      - deepest level: hg[0][1] -> hg[0][3] -> hg[0][2] fused in one chain;
      - level i>0: hg[i][1] fused with the child's up-branch hg[i-1][0]
        (the chain's mid output is the activation fed to the next pooling)."""
    depth = len(hg)
    prep = []
    for i in range(depth):
        lvl = {}
        if i == depth - 1:
            lvl["up"] = prepare_chain([hg[i][0]])
        if i == 0:
            lvl["low_chain"] = prepare_chain([hg[0][1], hg[0][3], hg[0][2]])
        else:
            lvl["low_pair"] = prepare_chain([hg[i][1], hg[i - 1][0]])
            lvl["low3"] = prepare_chain([hg[i][2]])
        prep.append(lvl)
    return prep


# ----------------------------- hourglass wiring ----------------------------- #
def max_pool2(x):      # 2x2 / stride-2 max pool over the last two (spatial) dims
    a, b, H, W = x.shape
    return x.reshape(a, b, H // 2, 2, W // 2, 2).max(axis=(3, 5))


def upsample2(x):      # nearest-neighbour 2x upsample over the last two dims
    return jnp.repeat(jnp.repeat(x, 2, axis=2), 2, axis=3)


def hourglass_forward_pallas(prep, n, x, *, num_blks, up1=None):
    """Hourglass recursion in channel-major (C, N, H, W) layout.  `up1` is
    hg[n-1][0](x) when the parent already computed it inside a fused low-path
    kernel; only the top level computes it here."""
    lvl = prep[n - 1]
    if up1 is None:
        up1 = residual_chain_pallas(x, lvl["up"])
    low1 = max_pool2(x)
    if n > 1:
        # One kernel runs hg[n-1][1] then hg[n-2][0] (same resolution): the mid
        # output feeds the deeper pooling, the final output is the child's up.
        child_up1, low1 = residual_chain_pallas(low1, lvl["low_pair"],
                                                mid_at=num_blks)
        low2 = hourglass_forward_pallas(prep, n - 1, low1,
                                        num_blks=num_blks, up1=child_up1)
        low3 = residual_chain_pallas(low2, lvl["low3"])
    else:
        # Deepest level: hg[0][1] -> hg[0][3] -> hg[0][2] fused into one call.
        low3 = residual_chain_pallas(low1, lvl["low_chain"])
    up2 = upsample2(low3)
    return up1 + up2


# ---------------------------- pure-JAX reference ---------------------------- #
def bottleneck_ref(x, w):
    hi = lax.Precision.HIGHEST
    def pc(v):  # per-channel vector -> NCHW broadcast
        return v[None, :, None, None]
    t = jnp.maximum(x * pc(w["s1"]) + pc(w["b1"]), 0.0)
    y1 = jnp.einsum("nchw,pc->nphw", t, w["w1"], precision=hi) + pc(w["cb1"])
    t2 = jnp.maximum(y1 * pc(w["s2"]) + pc(w["b2"]), 0.0)
    y2 = lax.conv_general_dilated(
        t2, w["w2"], window_strides=(1, 1), padding="SAME",
        dimension_numbers=("NCHW", "OIHW", "NCHW"), precision=hi) + pc(w["cb2"])
    t3 = jnp.maximum(y2 * pc(w["s3"]) + pc(w["b3"]), 0.0)
    y3 = jnp.einsum("nphw,cp->nchw", t3, w["w3"], precision=hi) + pc(w["cb3"])
    return x + y3


def residual_seq_ref(x, seq):
    nblk = seq["w1"].shape[0]
    for i in range(nblk):
        x = bottleneck_ref(x, {k: v[i] for k, v in seq.items()})
    return x


def hourglass_forward_ref(hg, n, x):
    up1 = residual_seq_ref(x, hg[n - 1][0])
    low1 = max_pool2(x)
    low1 = residual_seq_ref(low1, hg[n - 1][1])
    if n > 1:
        low2 = hourglass_forward_ref(hg, n - 1, low1)
    else:
        low2 = residual_seq_ref(low1, hg[n - 1][3])
    low3 = residual_seq_ref(low2, hg[n - 1][2])
    return up1 + upsample2(low3)


# --------------------------- parameter construction ------------------------- #
def init_bn_affine(key, c):
    k1, k2, k3, k4 = jax.random.split(key, 4)
    gamma = 1.0 + 0.1 * jax.random.normal(k1, (c,))
    beta = 0.1 * jax.random.normal(k2, (c,))
    mean = 0.1 * jax.random.normal(k3, (c,))
    var = 1.0 + 0.1 * jax.random.uniform(k4, (c,))
    scale = gamma / jnp.sqrt(var + EPS)
    bias = beta - mean * scale
    return scale.astype(jnp.float32), bias.astype(jnp.float32)


def init_bottleneck(key, inplanes, planes):
    C, P = inplanes, planes
    ks = jax.random.split(key, 9)
    s1, b1 = init_bn_affine(ks[0], C)
    s2, b2 = init_bn_affine(ks[1], P)
    s3, b3 = init_bn_affine(ks[2], P)
    w1 = (jax.random.normal(ks[3], (P, C)) / jnp.sqrt(C)).astype(jnp.float32)
    cb1 = (0.05 * jax.random.normal(ks[4], (P,))).astype(jnp.float32)
    w2 = (jax.random.normal(ks[5], (P, P, 3, 3)) /
          jnp.sqrt(9.0 * P)).astype(jnp.float32)
    cb2 = (0.05 * jax.random.normal(ks[6], (P,))).astype(jnp.float32)
    w3 = (jax.random.normal(ks[7], (C, P)) / jnp.sqrt(P)).astype(jnp.float32)
    cb3 = (0.05 * jax.random.normal(ks[8], (C,))).astype(jnp.float32)
    return dict(s1=s1, b1=b1, w1=w1, cb1=cb1,
                s2=s2, b2=b2, w2=w2, cb2=cb2,
                s3=s3, b3=b3, w3=w3, cb3=cb3)


def init_residual_seq(key, num_blks, inplanes, planes):
    blocks = []
    for _ in range(num_blks):
        key, k = jax.random.split(key)
        blocks.append(init_bottleneck(k, inplanes, planes))
    return {name: jnp.stack([b[name] for b in blocks], axis=0)
            for name in blocks[0]}


def make_hourglass_params(key, num_blks, planes, depth):
    C = planes * 2                       # Bottleneck.expansion * planes
    hg = []
    for i in range(depth):
        n_res = 4 if i == 0 else 3
        level = []
        for _ in range(n_res):
            key, k = jax.random.split(key)
            level.append(init_residual_seq(k, num_blks, C, planes))
        hg.append(level)
    return hg


# ----------------------------------- main ----------------------------------- #
if __name__ == "__main__":
    NUM_BLKS, PLANES, DEPTH = 2, 4, 2
    C = PLANES * 2
    N, H, W = 2, 16, 16

    key = jax.random.PRNGKey(0)
    kx, kp = jax.random.split(key)
    x_nchw = jax.random.normal(kx, (N, C, H, W), jnp.float32)
    hg_params = make_hourglass_params(kp, NUM_BLKS, PLANES, DEPTH)

    # BN folding / sublane padding / sequence fusion done ONCE, outside the
    # per-forward jit path (perf review: hoist kernel-format param prep).
    hg_prep = prepare_hourglass_kernel_params(hg_params)

    @jax.jit
    def fwd_pallas(x, prep):
        x_cm = jnp.transpose(x, (1, 0, 2, 3))          # channel-major (C,N,H,W)
        y_cm = hourglass_forward_pallas(prep, DEPTH, x_cm, num_blks=NUM_BLKS)
        return jnp.transpose(y_cm, (1, 0, 2, 3))

    @jax.jit
    def fwd_ref(x, params):
        return hourglass_forward_ref(params, DEPTH, x)

    out = jax.block_until_ready(fwd_pallas(x_nchw, hg_prep))
    ref = jax.block_until_ready(fwd_ref(x_nchw, hg_params))

    assert out.shape == (N, C, H, W), out.shape
    max_err = float(jnp.max(jnp.abs(out - ref)))
    assert jnp.allclose(out, ref, rtol=1e-3, atol=1e-3), max_err
    print("KERNEL_OK")
</pallas_src>

<mosaic_0001>
module attributes {stable_mosaic.version = 11 : i64} {
  func.func @residual_chain_kernel(%arg0: i32, %arg1: memref<8x128xf32, #tpu.memory_space<vmem>>, %arg2: memref<9x1x128xf32, #tpu.memory_space<vmem>>, %arg3: memref<4x8x1xf32, #tpu.memory_space<vmem>>, %arg4: memref<4x8x1xf32, #tpu.memory_space<vmem>>, %arg5: memref<4x8x8xf32, #tpu.memory_space<vmem>>, %arg6: memref<4x8x1xf32, #tpu.memory_space<vmem>>, %arg7: memref<4x8x72xf32, #tpu.memory_space<vmem>>, %arg8: memref<4x8x1xf32, #tpu.memory_space<vmem>>, %arg9: memref<4x8x8xf32, #tpu.memory_space<vmem>>, %arg10: memref<4x8x1xf32, #tpu.memory_space<vmem>>, %arg11: memref<8x128xf32, #tpu.memory_space<vmem>>, %arg12: memref<8x128xf32, #tpu.memory_space<vmem>>) attributes {dimension_semantics = [#tpu.dimension_semantics<parallel>], iteration_bounds = array<i64: 1>, scalar_prefetch = 0 : i64, scratch_operands = 0 : i64, tpu.core_type = #tpu.core_type<tc>, window_params = [{transform_indices = @transform_0, window_bounds = array<i64: 8, 128>}, {pipeline_mode = #tpu.pipeline_mode<synchronous>, transform_indices = @transform_1, window_bounds = array<i64: 9, 1, 128>}, {pipeline_mode = #tpu.pipeline_mode<synchronous>, transform_indices = @transform_2, window_bounds = array<i64: 4, 8, 1>}, {pipeline_mode = #tpu.pipeline_mode<synchronous>, transform_indices = @transform_3, window_bounds = array<i64: 4, 8, 1>}, {pipeline_mode = #tpu.pipeline_mode<synchronous>, transform_indices = @transform_4, window_bounds = array<i64: 4, 8, 8>}, {pipeline_mode = #tpu.pipeline_mode<synchronous>, transform_indices = @transform_5, window_bounds = array<i64: 4, 8, 1>}, {pipeline_mode = #tpu.pipeline_mode<synchronous>, transform_indices = @transform_6, window_bounds = array<i64: 4, 8, 72>}, {pipeline_mode = #tpu.pipeline_mode<synchronous>, transform_indices = @transform_7, window_bounds = array<i64: 4, 8, 1>}, {pipeline_mode = #tpu.pipeline_mode<synchronous>, transform_indices = @transform_8, window_bounds = array<i64: 4, 8, 8>}, {pipeline_mode = #tpu.pipeline_mode<synchronous>, transform_indices = @transform_9, window_bounds = array<i64: 4, 8, 1>}, {transform_indices = @transform_10, window_bounds = array<i64: 8, 128>}, {transform_indices = @transform_11, window_bounds = array<i64: 8, 128>}]} {
    %c0 = arith.constant 0 : index
    %c0_0 = arith.constant 0 : index
    %0 = vector.load %arg1[%c0, %c0_0] : memref<8x128xf32, #tpu.memory_space<vmem>>, vector<8x128xf32>
    %c0_1 = arith.constant 0 : index
    %c0_2 = arith.constant 0 : index
    %c0_3 = arith.constant 0 : index
    %1 = vector.load %arg3[%c0_1, %c0_2, %c0_3] : memref<4x8x1xf32, #tpu.memory_space<vmem>>, vector<1x8x1xf32>
    %2 = vector.shape_cast %1 : vector<1x8x1xf32> to vector<8x1xf32>
    %3 = vector.broadcast %2 : vector<8x1xf32> to vector<8x128xf32>
    %4 = arith.mulf %0, %3 : vector<8x128xf32>
    %c0_4 = arith.constant 0 : index
    %c0_5 = arith.constant 0 : index
    %c0_6 = arith.constant 0 : index
    %5 = vector.load %arg4[%c0_4, %c0_5, %c0_6] : memref<4x8x1xf32, #tpu.memory_space<vmem>>, vector<1x8x1xf32>
    %6 = vector.shape_cast %5 : vector<1x8x1xf32> to vector<8x1xf32>
    %7 = vector.broadcast %6 : vector<8x1xf32> to vector<8x128xf32>
    %8 = arith.addf %4, %7 : vector<8x128xf32>
    %cst = arith.constant 0.000000e+00 : f32
    %9 = vector.broadcast %cst : f32 to vector<8x128xf32>
    %10 = arith.maximumf %8, %9 : vector<8x128xf32>
    %c0_7 = arith.constant 0 : index
    %c0_8 = arith.constant 0 : index
    %c0_9 = arith.constant 0 : index
    %11 = vector.load %arg5[%c0_7, %c0_8, %c0_9] : memref<4x8x8xf32, #tpu.memory_space<vmem>>, vector<1x8x8xf32>
    %12 = vector.shape_cast %11 : vector<1x8x8xf32> to vector<8x8xf32>
    %cst_10 = arith.constant dense<0.000000e+00> : vector<8x128xf32>
    %13 = tpu.matmul %12, %10, %cst_10 {dimension_numbers = #tpu.dot_dimension_numbers<[1], [0], [0], [1], [0, 0, 1, 1], [], []>} : vector<8x8xf32>, vector<8x128xf32>, vector<8x128xf32> -> vector<8x128xf32>
    %c0_11 = arith.constant 0 : index
    %c0_12 = arith.constant 0 : index
    %c0_13 = arith.constant 0 : index
    %14 = vector.load %arg6[%c0_11, %c0_12, %c0_13] : memref<4x8x1xf32, #tpu.memory_space<vmem>>, vector<1x8x1xf32>
    %15 = vector.shape_cast %14 : vector<1x8x1xf32> to vector<8x1xf32>
    %16 = vector.broadcast %15 : vector<8x1xf32> to vector<8x128xf32>
    %17 = arith.addf %13, %16 : vector<8x128xf32>
    %cst_14 = arith.constant 0.000000e+00 : f32
    %18 = vector.broadcast %cst_14 : f32 to vector<8x128xf32>
    %19 = arith.maximumf %17, %18 : vector<8x128xf32>
    %c9_i32 = arith.constant 9 : i32
    %20 = tpu.dynamic_rotate %19 by %c9_i32 dim 1 : vector<8x128xf32>, i32 -> vector<8x128xf32>
    %c0_15 = arith.constant 0 : index
    %c0_16 = arith.constant 0 : index
    %c0_17 = arith.constant 0 : index
    %21 = vector.load %arg2[%c0_15, %c0_16, %c0_17] : memref<9x1x128xf32, #tpu.memory_space<vmem>>, vector<1x1x128xf32>
    %22 = vector.shape_cast %21 : vector<1x1x128xf32> to vector<1x128xf32>
    %23 = vector.broadcast %22 : vector<1x128xf32> to vector<8x128xf32>
    %24 = arith.mulf %20, %23 : vector<8x128xf32>
    %c8_i32 = arith.constant 8 : i32
    %25 = tpu.dynamic_rotate %19 by %c8_i32 dim 1 : vector<8x128xf32>, i32 -> vector<8x128xf32>
    %c1 = arith.constant 1 : index
    %c0_18 = arith.constant 0 : index
    %c0_19 = arith.constant 0 : index
    %26 = vector.load %arg2[%c1, %c0_18, %c0_19] : memref<9x1x128xf32, #tpu.memory_space<vmem>>, vector<1x1x128xf32>
    %27 = vector.shape_cast %26 : vector<1x1x128xf32> to vector<1x128xf32>
    %28 = vector.broadcast %27 : vector<1x128xf32> to vector<8x128xf32>
    %29 = arith.mulf %25, %28 : vector<8x128xf32>
    %c7_i32 = arith.constant 7 : i32
    %30 = tpu.dynamic_rotate %19 by %c7_i32 dim 1 : vector<8x128xf32>, i32 -> vector<8x128xf32>
    %c2 = arith.constant 2 : index
    %c0_20 = arith.constant 0 : index
    %c0_21 = arith.constant 0 : index
    %31 = vector.load %arg2[%c2, %c0_20, %c0_21] : memref<9x1x128xf32, #tpu.memory_space<vmem>>, vector<1x1x128xf32>
    %32 = vector.shape_cast %31 : vector<1x1x128xf32> to vector<1x128xf32>
    %33 = vector.broadcast %32 : vector<1x128xf32> to vector<8x128xf32>
    %34 = arith.mulf %30, %33 : vector<8x128xf32>
    %c1_i32 = arith.constant 1 : i32
    %35 = tpu.dynamic_rotate %19 by %c1_i32 dim 1 : vector<8x128xf32>, i32 -> vector<8x128xf32>
    %c3 = arith.constant 3 : index
    %c0_22 = arith.constant 0 : index
    %c0_23 = arith.constant 0 : index
    %36 = vector.load %arg2[%c3, %c0_22, %c0_23] : memref<9x1x128xf32, #tpu.memory_space<vmem>>, vector<1x1x128xf32>
    %37 = vector.shape_cast %36 : vector<1x1x128xf32> to vector<1x128xf32>
    %38 = vector.broadcast %37 : vector<1x128xf32> to vector<8x128xf32>
    %39 = arith.mulf %35, %38 : vector<8x128xf32>
    %c127_i32 = arith.constant 127 : i32
    %40 = tpu.dynamic_rotate %19 by %c127_i32 dim 1 : vector<8x128xf32>, i32 -> vector<8x128xf32>
    %c5 = arith.constant 5 : index
    %c0_24 = arith.constant 0 : index
    %c0_25 = arith.constant 0 : index
    %41 = vector.load %arg2[%c5, %c0_24, %c0_25] : memref<9x1x128xf32, #tpu.memory_space<vmem>>, vector<1x1x128xf32>
    %42 = vector.shape_cast %41 : vector<1x1x128xf32> to vector<1x128xf32>
    %43 = vector.broadcast %42 : vector<1x128xf32> to vector<8x128xf32>
    %44 = arith.mulf %40, %43 : vector<8x128xf32>
    %c121_i32 = arith.constant 121 : i32
    %45 = tpu.dynamic_rotate %19 by %c121_i32 dim 1 : vector<8x128xf32>, i32 -> vector<8x128xf32>
    %c6 = arith.constant 6 : index
    %c0_26 = arith.constant 0 : index
    %c0_27 = arith.constant 0 : index
    %46 = vector.load %arg2[%c6, %c0_26, %c0_27] : memref<9x1x128xf32, #tpu.memory_space<vmem>>, vector<1x1x128xf32>
    %47 = vector.shape_cast %46 : vector<1x1x128xf32> to vector<1x128xf32>
    %48 = vector.broadcast %47 : vector<1x128xf32> to vector<8x128xf32>
    %49 = arith.mulf %45, %48 : vector<8x128xf32>
    %c120_i32 = arith.constant 120 : i32
    %50 = tpu.dynamic_rotate %19 by %c120_i32 dim 1 : vector<8x128xf32>, i32 -> vector<8x128xf32>
    %c7 = arith.constant 7 : index
    %c0_28 = arith.constant 0 : index
    %c0_29 = arith.constant 0 : index
    %51 = vector.load %arg2[%c7, %c0_28, %c0_29] : memref<9x1x128xf32, #tpu.memory_space<vmem>>, vector<1x1x128xf32>
    %52 = vector.shape_cast %51 : vector<1x1x128xf32> to vector<1x128xf32>
    %53 = vector.broadcast %52 : vector<1x128xf32> to vector<8x128xf32>
    %54 = arith.mulf %50, %53 : vector<8x128xf32>
    %c119_i32 = arith.constant 119 : i32
    %55 = tpu.dynamic_rotate %19 by %c119_i32 dim 1 : vector<8x128xf32>, i32 -> vector<8x128xf32>
    %c8 = arith.constant 8 : index
    %c0_30 = arith.constant 0 : index
    %c0_31 = arith.constant 0 : index
    %56 = vector.load %arg2[%c8, %c0_30, %c0_31] : memref<9x1x128xf32, #tpu.memory_space<vmem>>, vector<1x1x128xf32>
    %57 = vector.shape_cast %56 : vector<1x1x128xf32> to vector<1x128xf32>
    %58 = vector.broadcast %57 : vector<1x128xf32> to vector<8x128xf32>
    %59 = arith.mulf %55, %58 : vector<8x128xf32>
    %60 = tpu.concatenate %24, %29, %34, %39, %19, %44, %49, %54, %59 in 0 : vector<8x128xf32>, vector<8x128xf32>, vector<8x128xf32>, vector<8x128xf32>, vector<8x128xf32>, vector<8x128xf32>, vector<8x128xf32>, vector<8x128xf32>, vector<8x128xf32> -> vector<72x128xf32>
    %c0_32 = arith.constant 0 : index
    %c0_33 = arith.constant 0 : index
    %c0_34 = arith.constant 0 : index
    %61 = vector.load %arg7[%c0_32, %c0_33, %c0_34] : memref<4x8x72xf32, #tpu.memory_space<vmem>>, vector<1x8x72xf32>
    %62 = vector.shape_cast %61 : vector<1x8x72xf32> to vector<8x72xf32>
    %cst_35 = arith.constant dense<0.000000e+00> : vector<8x128xf32>
    %63 = tpu.matmul %62, %60, %cst_35 {dimension_numbers = #tpu.dot_dimension_numbers<[1], [0], [0], [1], [0, 0, 1, 1], [], []>} : vector<8x72xf32>, vector<72x128xf32>, vector<8x128xf32> -> vector<8x128xf32>
    %c0_36 = arith.constant 0 : index
    %c0_37 = arith.constant 0 : index
    %c0_38 = arith.constant 0 : index
    %64 = vector.load %arg8[%c0_36, %c0_37, %c0_38] : memref<4x8x1xf32, #tpu.memory_space<vmem>>, vector<1x8x1xf32>
    %65 = vector.shape_cast %64 : vector<1x8x1xf32> to vector<8x1xf32>
    %66 = vector.broadcast %65 : vector<8x1xf32> to vector<8x128xf32>
    %67 = arith.addf %63, %66 : vector<8x128xf32>
    %cst_39 = arith.constant 0.000000e+00 : f32
    %68 = vector.broadcast %cst_39 : f32 to vector<8x128xf32>
    %69 = arith.maximumf %67, %68 : vector<8x128xf32>
    %c0_40 = arith.constant 0 : index
    %c0_41 = arith.constant 0 : index
    %c0_42 = arith.constant 0 : index
    %70 = vector.load %arg9[%c0_40, %c0_41, %c0_42] : memref<4x8x8xf32, #tpu.memory_space<vmem>>, vector<1x8x8xf32>
    %71 = vector.shape_cast %70 : vector<1x8x8xf32> to vector<8x8xf32>
    %cst_43 = arith.constant dense<0.000000e+00> : vector<8x128xf32>
    %72 = tpu.matmul %71, %69, %cst_43 {dimension_numbers = #tpu.dot_dimension_numbers<[1], [0], [0], [1], [0, 0, 1, 1], [], []>} : vector<8x8xf32>, vector<8x128xf32>, vector<8x128xf32> -> vector<8x128xf32>
    %73 = arith.addf %0, %72 : vector<8x128xf32>
    %c0_44 = arith.constant 0 : index
    %c0_45 = arith.constant 0 : index
    %c0_46 = arith.constant 0 : index
    %74 = vector.load %arg10[%c0_44, %c0_45, %c0_46] : memref<4x8x1xf32, #tpu.memory_space<vmem>>, vector<1x8x1xf32>
    %75 = vector.shape_cast %74 : vector<1x8x1xf32> to vector<8x1xf32>
    %76 = vector.broadcast %75 : vector<8x1xf32> to vector<8x128xf32>
    %77 = arith.addf %73, %76 : vector<8x128xf32>
    %c1_47 = arith.constant 1 : index
    %c0_48 = arith.constant 0 : index
    %c0_49 = arith.constant 0 : index
    %78 = vector.load %arg3[%c1_47, %c0_48, %c0_49] : memref<4x8x1xf32, #tpu.memory_space<vmem>>, vector<1x8x1xf32>
    %79 = vector.shape_cast %78 : vector<1x8x1xf32> to vector<8x1xf32>
    %80 = vector.broadcast %79 : vector<8x1xf32> to vector<8x128xf32>
    %81 = arith.mulf %77, %80 : vector<8x128xf32>
    %c1_50 = arith.constant 1 : index
    %c0_51 = arith.constant 0 : index
    %c0_52 = arith.constant 0 : index
    %82 = vector.load %arg4[%c1_50, %c0_51, %c0_52] : memref<4x8x1xf32, #tpu.memory_space<vmem>>, vector<1x8x1xf32>
    %83 = vector.shape_cast %82 : vector<1x8x1xf32> to vector<8x1xf32>
    %84 = vector.broadcast %83 : vector<8x1xf32> to vector<8x128xf32>
    %85 = arith.addf %81, %84 : vector<8x128xf32>
    %cst_53 = arith.constant 0.000000e+00 : f32
    %86 = vector.broadcast %cst_53 : f32 to vector<8x128xf32>
    %87 = arith.maximumf %85, %86 : vector<8x128xf32>
    %c1_54 = arith.constant 1 : index
    %c0_55 = arith.constant 0 : index
    %c0_56 = arith.constant 0 : index
    %88 = vector.load %arg5[%c1_54, %c0_55, %c0_56] : memref<4x8x8xf32, #tpu.memory_space<vmem>>, vector<1x8x8xf32>
    %89 = vector.shape_cast %88 : vector<1x8x8xf32> to vector<8x8xf32>
    %cst_57 = arith.constant dense<0.000000e+00> : vector<8x128xf32>
    %90 = tpu.matmul %89, %87, %cst_57 {dimension_numbers = #tpu.dot_dimension_numbers<[1], [0], [0], [1], [0, 0, 1, 1], [], []>} : vector<8x8xf32>, vector<8x128xf32>, vector<8x128xf32> -> vector<8x128xf32>
    %c1_58 = arith.constant 1 : index
    %c0_59 = arith.constant 0 : index
    %c0_60 = arith.constant 0 : index
    %91 = vector.load %arg6[%c1_58, %c0_59, %c0_60] : memref<4x8x1xf32, #tpu.memory_space<vmem>>, vector<1x8x1xf32>
    %92 = vector.shape_cast %91 : vector<1x8x1xf32> to vector<8x1xf32>
    %93 = vector.broadcast %92 : vector<8x1xf32> to vector<8x128xf32>
    %94 = arith.addf %90, %93 : vector<8x128xf32>
    %cst_61 = arith.constant 0.000000e+00 : f32
    %95 = vector.broadcast %cst_61 : f32 to vector<8x128xf32>
    %96 = arith.maximumf %94, %95 : vector<8x128xf32>
    %c9_i32_62 = arith.constant 9 : i32
    %97 = tpu.dynamic_rotate %96 by %c9_i32_62 dim 1 : vector<8x128xf32>, i32 -> vector<8x128xf32>
    %c0_63 = arith.constant 0 : index
    %c0_64 = arith.constant 0 : index
    %c0_65 = arith.constant 0 : index
    %98 = vector.load %arg2[%c0_63, %c0_64, %c0_65] : memref<9x1x128xf32, #tpu.memory_space<vmem>>, vector<1x1x128xf32>
    %99 = vector.shape_cast %98 : vector<1x1x128xf32> to vector<1x128xf32>
    %100 = vector.broadcast %99 : vector<1x128xf32> to vector<8x128xf32>
    %101 = arith.mulf %97, %100 : vector<8x128xf32>
    %c8_i32_66 = arith.constant 8 : i32
    %102 = tpu.dynamic_rotate %96 by %c8_i32_66 dim 1 : vector<8x128xf32>, i32 -> vector<8x128xf32>
    %c1_67 = arith.constant 1 : index
    %c0_68 = arith.constant 0 : index
    %c0_69 = arith.constant 0 : index
    %103 = vector.load %arg2[%c1_67, %c0_68, %c0_69] : memref<9x1x128xf32, #tpu.memory_space<vmem>>, vector<1x1x128xf32>
    %104 = vector.shape_cast %103 : vector<1x1x128xf32> to vector<1x128xf32>
    %105 = vector.broadcast %104 : vector<1x128xf32> to vector<8x128xf32>
    %106 = arith.mulf %102, %105 : vector<8x128xf32>
    %c7_i32_70 = arith.constant 7 : i32
    %107 = tpu.dynamic_rotate %96 by %c7_i32_70 dim 1 : vector<8x128xf32>, i32 -> vector<8x128xf32>
    %c2_71 = arith.constant 2 : index
    %c0_72 = arith.constant 0 : index
    %c0_73 = arith.constant 0 : index
    %108 = vector.load %arg2[%c2_71, %c0_72, %c0_73] : memref<9x1x128xf32, #tpu.memory_space<vmem>>, vector<1x1x128xf32>
    %109 = vector.shape_cast %108 : vector<1x1x128xf32> to vector<1x128xf32>
    %110 = vector.broadcast %109 : vector<1x128xf32> to vector<8x128xf32>
    %111 = arith.mulf %107, %110 : vector<8x128xf32>
    %c1_i32_74 = arith.constant 1 : i32
    %112 = tpu.dynamic_rotate %96 by %c1_i32_74 dim 1 : vector<8x128xf32>, i32 -> vector<8x128xf32>
    %c3_75 = arith.constant 3 : index
    %c0_76 = arith.constant 0 : index
    %c0_77 = arith.constant 0 : index
    %113 = vector.load %arg2[%c3_75, %c0_76, %c0_77] : memref<9x1x128xf32, #tpu.memory_space<vmem>>, vector<1x1x128xf32>
    %114 = vector.shape_cast %113 : vector<1x1x128xf32> to vector<1x128xf32>
    %115 = vector.broadcast %114 : vector<1x128xf32> to vector<8x128xf32>
    %116 = arith.mulf %112, %115 : vector<8x128xf32>
    %c127_i32_78 = arith.constant 127 : i32
    %117 = tpu.dynamic_rotate %96 by %c127_i32_78 dim 1 : vector<8x128xf32>, i32 -> vector<8x128xf32>
    %c5_79 = arith.constant 5 : index
    %c0_80 = arith.constant 0 : index
    %c0_81 = arith.constant 0 : index
    %118 = vector.load %arg2[%c5_79, %c0_80, %c0_81] : memref<9x1x128xf32, #tpu.memory_space<vmem>>, vector<1x1x128xf32>
    %119 = vector.shape_cast %118 : vector<1x1x128xf32> to vector<1x128xf32>
    %120 = vector.broadcast %119 : vector<1x128xf32> to vector<8x128xf32>
    %121 = arith.mulf %117, %120 : vector<8x128xf32>
    %c121_i32_82 = arith.constant 121 : i32
    %122 = tpu.dynamic_rotate %96 by %c121_i32_82 dim 1 : vector<8x128xf32>, i32 -> vector<8x128xf32>
    %c6_83 = arith.constant 6 : index
    %c0_84 = arith.constant 0 : index
    %c0_85 = arith.constant 0 : index
    %123 = vector.load %arg2[%c6_83, %c0_84, %c0_85] : memref<9x1x128xf32, #tpu.memory_space<vmem>>, vector<1x1x128xf32>
    %124 = vector.shape_cast %123 : vector<1x1x128xf32> to vector<1x128xf32>
    %125 = vector.broadcast %124 : vector<1x128xf32> to vector<8x128xf32>
    %126 = arith.mulf %122, %125 : vector<8x128xf32>
    %c120_i32_86 = arith.constant 120 : i32
    %127 = tpu.dynamic_rotate %96 by %c120_i32_86 dim 1 : vector<8x128xf32>, i32 -> vector<8x128xf32>
    %c7_87 = arith.constant 7 : index
    %c0_88 = arith.constant 0 : index
    %c0_89 = arith.constant 0 : index
    %128 = vector.load %arg2[%c7_87, %c0_88, %c0_89] : memref<9x1x128xf32, #tpu.memory_space<vmem>>, vector<1x1x128xf32>
    %129 = vector.shape_cast %128 : vector<1x1x128xf32> to vector<1x128xf32>
    %130 = vector.broadcast %129 : vector<1x128xf32> to vector<8x128xf32>
    %131 = arith.mulf %127, %130 : vector<8x128xf32>
    %c119_i32_90 = arith.constant 119 : i32
    %132 = tpu.dynamic_rotate %96 by %c119_i32_90 dim 1 : vector<8x128xf32>, i32 -> vector<8x128xf32>
    %c8_91 = arith.constant 8 : index
    %c0_92 = arith.constant 0 : index
    %c0_93 = arith.constant 0 : index
    %133 = vector.load %arg2[%c8_91, %c0_92, %c0_93] : memref<9x1x128xf32, #tpu.memory_space<vmem>>, vector<1x1x128xf32>
    %134 = vector.shape_cast %133 : vector<1x1x128xf32> to vector<1x128xf32>
    %135 = vector.broadcast %134 : vector<1x128xf32> to vector<8x128xf32>
    %136 = arith.mulf %132, %135 : vector<8x128xf32>
    %137 = tpu.concatenate %101, %106, %111, %116, %96, %121, %126, %131, %136 in 0 : vector<8x128xf32>, vector<8x128xf32>, vector<8x128xf32>, vector<8x128xf32>, vector<8x128xf32>, vector<8x128xf32>, vector<8x128xf32>, vector<8x128xf32>, vector<8x128xf32> -> vector<72x128xf32>
    %c1_94 = arith.constant 1 : index
    %c0_95 = arith.constant 0 : index
    %c0_96 = arith.constant 0 : index
    %138 = vector.load %arg7[%c1_94, %c0_95, %c0_96] : memref<4x8x72xf32, #tpu.memory_space<vmem>>, vector<1x8x72xf32>
    %139 = vector.shape_cast %138 : vector<1x8x72xf32> to vector<8x72xf32>
    %cst_97 = arith.constant dense<0.000000e+00> : vector<8x128xf32>
    %140 = tpu.matmul %139, %137, %cst_97 {dimension_numbers = #tpu.dot_dimension_numbers<[1], [0], [0], [1], [0, 0, 1, 1], [], []>} : vector<8x72xf32>, vector<72x128xf32>, vector<8x128xf32> -> vector<8x128xf32>
    %c1_98 = arith.constant 1 : index
    %c0_99 = arith.constant 0 : index
    %c0_100 = arith.constant 0 : index
    %141 = vector.load %arg8[%c1_98, %c0_99, %c0_100] : memref<4x8x1xf32, #tpu.memory_space<vmem>>, vector<1x8x1xf32>
    %142 = vector.shape_cast %141 : vector<1x8x1xf32> to vector<8x1xf32>
    %143 = vector.broadcast %142 : vector<8x1xf32> to vector<8x128xf32>
    %144 = arith.addf %140, %143 : vector<8x128xf32>
    %cst_101 = arith.constant 0.000000e+00 : f32
    %145 = vector.broadcast %cst_101 : f32 to vector<8x128xf32>
    %146 = arith.maximumf %144, %145 : vector<8x128xf32>
    %c1_102 = arith.constant 1 : index
    %c0_103 = arith.constant 0 : index
    %c0_104 = arith.constant 0 : index
    %147 = vector.load %arg9[%c1_102, %c0_103, %c0_104] : memref<4x8x8xf32, #tpu.memory_space<vmem>>, vector<1x8x8xf32>
    %148 = vector.shape_cast %147 : vector<1x8x8xf32> to vector<8x8xf32>
    %cst_105 = arith.constant dense<0.000000e+00> : vector<8x128xf32>
    %149 = tpu.matmul %148, %146, %cst_105 {dimension_numbers = #tpu.dot_dimension_numbers<[1], [0], [0], [1], [0, 0, 1, 1], [], []>} : vector<8x8xf32>, vector<8x128xf32>, vector<8x128xf32> -> vector<8x128xf32>
    %150 = arith.addf %77, %149 : vector<8x128xf32>
    %c1_106 = arith.constant 1 : index
    %c0_107 = arith.constant 0 : index
    %c0_108 = arith.constant 0 : index
    %151 = vector.load %arg10[%c1_106, %c0_107, %c0_108] : memref<4x8x1xf32, #tpu.memory_space<vmem>>, vector<1x8x1xf32>
    %152 = vector.shape_cast %151 : vector<1x8x1xf32> to vector<8x1xf32>
    %153 = vector.broadcast %152 : vector<8x1xf32> to vector<8x128xf32>
    %154 = arith.addf %150, %153 : vector<8x128xf32>
    %c0_109 = arith.constant 0 : index
    %c0_110 = arith.constant 0 : index
    %155 = vector.load %arg12[%c0_109, %c0_110] : memref<8x128xf32, #tpu.memory_space<vmem>>, vector<8x128xf32>
    tpu.vector_store %arg12[%c0_109, %c0_110], %154 {strides = array<i32>} : memref<8x128xf32, #tpu.memory_space<vmem>>, vector<8x128xf32>,
    %c2_111 = arith.constant 2 : index
    %c0_112 = arith.constant 0 : index
    %c0_113 = arith.constant 0 : index
    %156 = vector.load %arg3[%c2_111, %c0_112, %c0_113] : memref<4x8x1xf32, #tpu.memory_space<vmem>>, vector<1x8x1xf32>
    %157 = vector.shape_cast %156 : vector<1x8x1xf32> to vector<8x1xf32>
    %158 = vector.broadcast %157 : vector<8x1xf32> to vector<8x128xf32>
    %159 = arith.mulf %154, %158 : vector<8x128xf32>
    %c2_114 = arith.constant 2 : index
    %c0_115 = arith.constant 0 : index
    %c0_116 = arith.constant 0 : index
    %160 = vector.load %arg4[%c2_114, %c0_115, %c0_116] : memref<4x8x1xf32, #tpu.memory_space<vmem>>, vector<1x8x1xf32>
    %161 = vector.shape_cast %160 : vector<1x8x1xf32> to vector<8x1xf32>
    %162 = vector.broadcast %161 : vector<8x1xf32> to vector<8x128xf32>
    %163 = arith.addf %159, %162 : vector<8x128xf32>
    %cst_117 = arith.constant 0.000000e+00 : f32
    %164 = vector.broadcast %cst_117 : f32 to vector<8x128xf32>
    %165 = arith.maximumf %163, %164 : vector<8x128xf32>
    %c2_118 = arith.constant 2 : index
    %c0_119 = arith.constant 0 : index
    %c0_120 = arith.constant 0 : index
    %166 = vector.load %arg5[%c2_118, %c0_119, %c0_120] : memref<4x8x8xf32, #tpu.memory_space<vmem>>, vector<1x8x8xf32>
    %167 = vector.shape_cast %166 : vector<1x8x8xf32> to vector<8x8xf32>
    %cst_121 = arith.constant dense<0.000000e+00> : vector<8x128xf32>
    %168 = tpu.matmul %167, %165, %cst_121 {dimension_numbers = #tpu.dot_dimension_numbers<[1], [0], [0], [1], [0, 0, 1, 1], [], []>} : vector<8x8xf32>, vector<8x128xf32>, vector<8x128xf32> -> vector<8x128xf32>
    %c2_122 = arith.constant 2 : index
    %c0_123 = arith.constant 0 : index
    %c0_124 = arith.constant 0 : index
    %169 = vector.load %arg6[%c2_122, %c0_123, %c0_124] : memref<4x8x1xf32, #tpu.memory_space<vmem>>, vector<1x8x1xf32>
    %170 = vector.shape_cast %169 : vector<1x8x1xf32> to vector<8x1xf32>
    %171 = vector.broadcast %170 : vector<8x1xf32> to vector<8x128xf32>
    %172 = arith.addf %168, %171 : vector<8x128xf32>
    %cst_125 = arith.constant 0.000000e+00 : f32
    %173 = vector.broadcast %cst_125 : f32 to vector<8x128xf32>
    %174 = arith.maximumf %172, %173 : vector<8x128xf32>
    %c9_i32_126 = arith.constant 9 : i32
    %175 = tpu.dynamic_rotate %174 by %c9_i32_126 dim 1 : vector<8x128xf32>, i32 -> vector<8x128xf32>
    %c0_127 = arith.constant 0 : index
    %c0_128 = arith.constant 0 : index
    %c0_129 = arith.constant 0 : index
    %176 = vector.load %arg2[%c0_127, %c0_128, %c0_129] : memref<9x1x128xf32, #tpu.memory_space<vmem>>, vector<1x1x128xf32>
    %177 = vector.shape_cast %176 : vector<1x1x128xf32> to vector<1x128xf32>
    %178 = vector.broadcast %177 : vector<1x128xf32> to vector<8x128xf32>
    %179 = arith.mulf %175, %178 : vector<8x128xf32>
    %c8_i32_130 = arith.constant 8 : i32
    %180 = tpu.dynamic_rotate %174 by %c8_i32_130 dim 1 : vector<8x128xf32>, i32 -> vector<8x128xf32>
    %c1_131 = arith.constant 1 : index
    %c0_132 = arith.constant 0 : index
    %c0_133 = arith.constant 0 : index
    %181 = vector.load %arg2[%c1_131, %c0_132, %c0_133] : memref<9x1x128xf32, #tpu.memory_space<vmem>>, vector<1x1x128xf32>
    %182 = vector.shape_cast %181 : vector<1x1x128xf32> to vector<1x128xf32>
    %183 = vector.broadcast %182 : vector<1x128xf32> to vector<8x128xf32>
    %184 = arith.mulf %180, %183 : vector<8x128xf32>
    %c7_i32_134 = arith.constant 7 : i32
    %185 = tpu.dynamic_rotate %174 by %c7_i32_134 dim 1 : vector<8x128xf32>, i32 -> vector<8x128xf32>
    %c2_135 = arith.constant 2 : index
    %c0_136 = arith.constant 0 : index
    %c0_137 = arith.constant 0 : index
    %186 = vector.load %arg2[%c2_135, %c0_136, %c0_137] : memref<9x1x128xf32, #tpu.memory_space<vmem>>, vector<1x1x128xf32>
    %187 = vector.shape_cast %186 : vector<1x1x128xf32> to vector<1x128xf32>
    %188 = vector.broadcast %187 : vector<1x128xf32> to vector<8x128xf32>
    %189 = arith.mulf %185, %188 : vector<8x128xf32>
    %c1_i32_138 = arith.constant 1 : i32
    %190 = tpu.dynamic_rotate %174 by %c1_i32_138 dim 1 : vector<8x128xf32>, i32 -> vector<8x128xf32>
    %c3_139 = arith.constant 3 : index
    %c0_140 = arith.constant 0 : index
    %c0_141 = arith.constant 0 : index
    %191 = vector.load %arg2[%c3_139, %c0_140, %c0_141] : memref<9x1x128xf32, #tpu.memory_space<vmem>>, vector<1x1x128xf32>
    %192 = vector.shape_cast %191 : vector<1x1x128xf32> to vector<1x128xf32>
    %193 = vector.broadcast %192 : vector<1x128xf32> to vector<8x128xf32>
    %194 = arith.mulf %190, %193 : vector<8x128xf32>
    %c127_i32_142 = arith.constant 127 : i32
    %195 = tpu.dynamic_rotate %174 by %c127_i32_142 dim 1 : vector<8x128xf32>, i32 -> vector<8x128xf32>
    %c5_143 = arith.constant 5 : index
    %c0_144 = arith.constant 0 : index
    %c0_145 = arith.constant 0 : index
    %196 = vector.load %arg2[%c5_143, %c0_144, %c0_145] : memref<9x1x128xf32, #tpu.memory_space<vmem>>, vector<1x1x128xf32>
    %197 = vector.shape_cast %196 : vector<1x1x128xf32> to vector<1x128xf32>
    %198 = vector.broadcast %197 : vector<1x128xf32> to vector<8x128xf32>
    %199 = arith.mulf %195, %198 : vector<8x128xf32>
    %c121_i32_146 = arith.constant 121 : i32
    %200 = tpu.dynamic_rotate %174 by %c121_i32_146 dim 1 : vector<8x128xf32>, i32 -> vector<8x128xf32>
    %c6_147 = arith.constant 6 : index
    %c0_148 = arith.constant 0 : index
    %c0_149 = arith.constant 0 : index
    %201 = vector.load %arg2[%c6_147, %c0_148, %c0_149] : memref<9x1x128xf32, #tpu.memory_space<vmem>>, vector<1x1x128xf32>
    %202 = vector.shape_cast %201 : vector<1x1x128xf32> to vector<1x128xf32>
    %203 = vector.broadcast %202 : vector<1x128xf32> to vector<8x128xf32>
    %204 = arith.mulf %200, %203 : vector<8x128xf32>
    %c120_i32_150 = arith.constant 120 : i32
    %205 = tpu.dynamic_rotate %174 by %c120_i32_150 dim 1 : vector<8x128xf32>, i32 -> vector<8x128xf32>
    %c7_151 = arith.constant 7 : index
    %c0_152 = arith.constant 0 : index
    %c0_153 = arith.constant 0 : index
    %206 = vector.load %arg2[%c7_151, %c0_152, %c0_153] : memref<9x1x128xf32, #tpu.memory_space<vmem>>, vector<1x1x128xf32>
    %207 = vector.shape_cast %206 : vector<1x1x128xf32> to vector<1x128xf32>
    %208 = vector.broadcast %207 : vector<1x128xf32> to vector<8x128xf32>
    %209 = arith.mulf %205, %208 : vector<8x128xf32>
    %c119_i32_154 = arith.constant 119 : i32
    %210 = tpu.dynamic_rotate %174 by %c119_i32_154 dim 1 : vector<8x128xf32>, i32 -> vector<8x128xf32>
    %c8_155 = arith.constant 8 : index
    %c0_156 = arith.constant 0 : index
    %c0_157 = arith.constant 0 : index
    %211 = vector.load %arg2[%c8_155, %c0_156, %c0_157] : memref<9x1x128xf32, #tpu.memory_space<vmem>>, vector<1x1x128xf32>
    %212 = vector.shape_cast %211 : vector<1x1x128xf32> to vector<1x128xf32>
    %213 = vector.broadcast %212 : vector<1x128xf32> to vector<8x128xf32>
    %214 = arith.mulf %210, %213 : vector<8x128xf32>
    %215 = tpu.concatenate %179, %184, %189, %194, %174, %199, %204, %209, %214 in 0 : vector<8x128xf32>, vector<8x128xf32>, vector<8x128xf32>, vector<8x128xf32>, vector<8x128xf32>, vector<8x128xf32>, vector<8x128xf32>, vector<8x128xf32>, vector<8x128xf32> -> vector<72x128xf32>
    %c2_158 = arith.constant 2 : index
    %c0_159 = arith.constant 0 : index
    %c0_160 = arith.constant 0 : index
    %216 = vector.load %arg7[%c2_158, %c0_159, %c0_160] : memref<4x8x72xf32, #tpu.memory_space<vmem>>, vector<1x8x72xf32>
    %217 = vector.shape_cast %216 : vector<1x8x72xf32> to vector<8x72xf32>
    %cst_161 = arith.constant dense<0.000000e+00> : vector<8x128xf32>
    %218 = tpu.matmul %217, %215, %cst_161 {dimension_numbers = #tpu.dot_dimension_numbers<[1], [0], [0], [1], [0, 0, 1, 1], [], []>} : vector<8x72xf32>, vector<72x128xf32>, vector<8x128xf32> -> vector<8x128xf32>
    %c2_162 = arith.constant 2 : index
    %c0_163 = arith.constant 0 : index
    %c0_164 = arith.constant 0 : index
    %219 = vector.load %arg8[%c2_162, %c0_163, %c0_164] : memref<4x8x1xf32, #tpu.memory_space<vmem>>, vector<1x8x1xf32>
    %220 = vector.shape_cast %219 : vector<1x8x1xf32> to vector<8x1xf32>
    %221 = vector.broadcast %220 : vector<8x1xf32> to vector<8x128xf32>
    %222 = arith.addf %218, %221 : vector<8x128xf32>
    %cst_165 = arith.constant 0.000000e+00 : f32
    %223 = vector.broadcast %cst_165 : f32 to vector<8x128xf32>
    %224 = arith.maximumf %222, %223 : vector<8x128xf32>
    %c2_166 = arith.constant 2 : index
    %c0_167 = arith.constant 0 : index
    %c0_168 = arith.constant 0 : index
    %225 = vector.load %arg9[%c2_166, %c0_167, %c0_168] : memref<4x8x8xf32, #tpu.memory_space<vmem>>, vector<1x8x8xf32>
    %226 = vector.shape_cast %225 : vector<1x8x8xf32> to vector<8x8xf32>
    %cst_169 = arith.constant dense<0.000000e+00> : vector<8x128xf32>
    %227 = tpu.matmul %226, %224, %cst_169 {dimension_numbers = #tpu.dot_dimension_numbers<[1], [0], [0], [1], [0, 0, 1, 1], [], []>} : vector<8x8xf32>, vector<8x128xf32>, vector<8x128xf32> -> vector<8x128xf32>
    %228 = arith.addf %154, %227 : vector<8x128xf32>
    %c2_170 = arith.constant 2 : index
    %c0_171 = arith.constant 0 : index
    %c0_172 = arith.constant 0 : index
    %229 = vector.load %arg10[%c2_170, %c0_171, %c0_172] : memref<4x8x1xf32, #tpu.memory_space<vmem>>, vector<1x8x1xf32>
    %230 = vector.shape_cast %229 : vector<1x8x1xf32> to vector<8x1xf32>
    %231 = vector.broadcast %230 : vector<8x1xf32> to vector<8x128xf32>
    %232 = arith.addf %228, %231 : vector<8x128xf32>
    %c3_173 = arith.constant 3 : index
    %c0_174 = arith.constant 0 : index
    %c0_175 = arith.constant 0 : index
    %233 = vector.load %arg3[%c3_173, %c0_174, %c0_175] : memref<4x8x1xf32, #tpu.memory_space<vmem>>, vector<1x8x1xf32>
    %234 = vector.shape_cast %233 : vector<1x8x1xf32> to vector<8x1xf32>
    %235 = vector.broadcast %234 : vector<8x1xf32> to vector<8x128xf32>
    %236 = arith.mulf %232, %235 : vector<8x128xf32>
    %c3_176 = arith.constant 3 : index
    %c0_177 = arith.constant 0 : index
    %c0_178 = arith.constant 0 : index
    %237 = vector.load %arg4[%c3_176, %c0_177, %c0_178] : memref<4x8x1xf32, #tpu.memory_space<vmem>>, vector<1x8x1xf32>
    %238 = vector.shape_cast %237 : vector<1x8x1xf32> to vector<8x1xf32>
    %239 = vector.broadcast %238 : vector<8x1xf32> to vector<8x128xf32>
    %240 = arith.addf %236, %239 : vector<8x128xf32>
    %cst_179 = arith.constant 0.000000e+00 : f32
    %241 = vector.broadcast %cst_179 : f32 to vector<8x128xf32>
    %242 = arith.maximumf %240, %241 : vector<8x128xf32>
    %c3_180 = arith.constant 3 : index
    %c0_181 = arith.constant 0 : index
    %c0_182 = arith.constant 0 : index
    %243 = vector.load %arg5[%c3_180, %c0_181, %c0_182] : memref<4x8x8xf32, #tpu.memory_space<vmem>>, vector<1x8x8xf32>
    %244 = vector.shape_cast %243 : vector<1x8x8xf32> to vector<8x8xf32>
    %cst_183 = arith.constant dense<0.000000e+00> : vector<8x128xf32>
    %245 = tpu.matmul %244, %242, %cst_183 {dimension_numbers = #tpu.dot_dimension_numbers<[1], [0], [0], [1], [0, 0, 1, 1], [], []>} : vector<8x8xf32>, vector<8x128xf32>, vector<8x128xf32> -> vector<8x128xf32>
    %c3_184 = arith.constant 3 : index
    %c0_185 = arith.constant 0 : index
    %c0_186 = arith.constant 0 : index
    %246 = vector.load %arg6[%c3_184, %c0_185, %c0_186] : memref<4x8x1xf32, #tpu.memory_space<vmem>>, vector<1x8x1xf32>
    %247 = vector.shape_cast %246 : vector<1x8x1xf32> to vector<8x1xf32>
    %248 = vector.broadcast %247 : vector<8x1xf32> to vector<8x128xf32>
    %249 = arith.addf %245, %248 : vector<8x128xf32>
    %cst_187 = arith.constant 0.000000e+00 : f32
    %250 = vector.broadcast %cst_187 : f32 to vector<8x128xf32>
    %251 = arith.maximumf %249, %250 : vector<8x128xf32>
    %c9_i32_188 = arith.constant 9 : i32
    %252 = tpu.dynamic_rotate %251 by %c9_i32_188 dim 1 : vector<8x128xf32>, i32 -> vector<8x128xf32>
    %c0_189 = arith.constant 0 : index
    %c0_190 = arith.constant 0 : index
    %c0_191 = arith.constant 0 : index
    %253 = vector.load %arg2[%c0_189, %c0_190, %c0_191] : memref<9x1x128xf32, #tpu.memory_space<vmem>>, vector<1x1x128xf32>
    %254 = vector.shape_cast %253 : vector<1x1x128xf32> to vector<1x128xf32>
    %255 = vector.broadcast %254 : vector<1x128xf32> to vector<8x128xf32>
    %256 = arith.mulf %252, %255 : vector<8x128xf32>
    %c8_i32_192 = arith.constant 8 : i32
    %257 = tpu.dynamic_rotate %251 by %c8_i32_192 dim 1 : vector<8x128xf32>, i32 -> vector<8x128xf32>
    %c1_193 = arith.constant 1 : index
    %c0_194 = arith.constant 0 : index
    %c0_195 = arith.constant 0 : index
    %258 = vector.load %arg2[%c1_193, %c0_194, %c0_195] : memref<9x1x128xf32, #tpu.memory_space<vmem>>, vector<1x1x128xf32>
    %259 = vector.shape_cast %258 : vector<1x1x128xf32> to vector<1x128xf32>
    %260 = vector.broadcast %259 : vector<1x128xf32> to vector<8x128xf32>
    %261 = arith.mulf %257, %260 : vector<8x128xf32>
    %c7_i32_196 = arith.constant 7 : i32
    %262 = tpu.dynamic_rotate %251 by %c7_i32_196 dim 1 : vector<8x128xf32>, i32 -> vector<8x128xf32>
    %c2_197 = arith.constant 2 : index
    %c0_198 = arith.constant 0 : index
    %c0_199 = arith.constant 0 : index
    %263 = vector.load %arg2[%c2_197, %c0_198, %c0_199] : memref<9x1x128xf32, #tpu.memory_space<vmem>>, vector<1x1x128xf32>
    %264 = vector.shape_cast %263 : vector<1x1x128xf32> to vector<1x128xf32>
    %265 = vector.broadcast %264 : vector<1x128xf32> to vector<8x128xf32>
    %266 = arith.mulf %262, %265 : vector<8x128xf32>
    %c1_i32_200 = arith.constant 1 : i32
    %267 = tpu.dynamic_rotate %251 by %c1_i32_200 dim 1 : vector<8x128xf32>, i32 -> vector<8x128xf32>
    %c3_201 = arith.constant 3 : index
    %c0_202 = arith.constant 0 : index
    %c0_203 = arith.constant 0 : index
    %268 = vector.load %arg2[%c3_201, %c0_202, %c0_203] : memref<9x1x128xf32, #tpu.memory_space<vmem>>, vector<1x1x128xf32>
    %269 = vector.shape_cast %268 : vector<1x1x128xf32> to vector<1x128xf32>
    %270 = vector.broadcast %269 : vector<1x128xf32> to vector<8x128xf32>
    %271 = arith.mulf %267, %270 : vector<8x128xf32>
    %c127_i32_204 = arith.constant 127 : i32
    %272 = tpu.dynamic_rotate %251 by %c127_i32_204 dim 1 : vector<8x128xf32>, i32 -> vector<8x128xf32>
    %c5_205 = arith.constant 5 : index
    %c0_206 = arith.constant 0 : index
    %c0_207 = arith.constant 0 : index
    %273 = vector.load %arg2[%c5_205, %c0_206, %c0_207] : memref<9x1x128xf32, #tpu.memory_space<vmem>>, vector<1x1x128xf32>
    %274 = vector.shape_cast %273 : vector<1x1x128xf32> to vector<1x128xf32>
    %275 = vector.broadcast %274 : vector<1x128xf32> to vector<8x128xf32>
    %276 = arith.mulf %272, %275 : vector<8x128xf32>
    %c121_i32_208 = arith.constant 121 : i32
    %277 = tpu.dynamic_rotate %251 by %c121_i32_208 dim 1 : vector<8x128xf32>, i32 -> vector<8x128xf32>
    %c6_209 = arith.constant 6 : index
    %c0_210 = arith.constant 0 : index
    %c0_211 = arith.constant 0 : index
    %278 = vector.load %arg2[%c6_209, %c0_210, %c0_211] : memref<9x1x128xf32, #tpu.memory_space<vmem>>, vector<1x1x128xf32>
    %279 = vector.shape_cast %278 : vector<1x1x128xf32> to vector<1x128xf32>
    %280 = vector.broadcast %279 : vector<1x128xf32> to vector<8x128xf32>
    %281 = arith.mulf %277, %280 : vector<8x128xf32>
    %c120_i32_212 = arith.constant 120 : i32
    %282 = tpu.dynamic_rotate %251 by %c120_i32_212 dim 1 : vector<8x128xf32>, i32 -> vector<8x128xf32>
    %c7_213 = arith.constant 7 : index
    %c0_214 = arith.constant 0 : index
    %c0_215 = arith.constant 0 : index
    %283 = vector.load %arg2[%c7_213, %c0_214, %c0_215] : memref<9x1x128xf32, #tpu.memory_space<vmem>>, vector<1x1x128xf32>
    %284 = vector.shape_cast %283 : vector<1x1x128xf32> to vector<1x128xf32>
    %285 = vector.broadcast %284 : vector<1x128xf32> to vector<8x128xf32>
    %286 = arith.mulf %282, %285 : vector<8x128xf32>
    %c119_i32_216 = arith.constant 119 : i32
    %287 = tpu.dynamic_rotate %251 by %c119_i32_216 dim 1 : vector<8x128xf32>, i32 -> vector<8x128xf32>
    %c8_217 = arith.constant 8 : index
    %c0_218 = arith.constant 0 : index
    %c0_219 = arith.constant 0 : index
    %288 = vector.load %arg2[%c8_217, %c0_218, %c0_219] : memref<9x1x128xf32, #tpu.memory_space<vmem>>, vector<1x1x128xf32>
    %289 = vector.shape_cast %288 : vector<1x1x128xf32> to vector<1x128xf32>
    %290 = vector.broadcast %289 : vector<1x128xf32> to vector<8x128xf32>
    %291 = arith.mulf %287, %290 : vector<8x128xf32>
    %292 = tpu.concatenate %256, %261, %266, %271, %251, %276, %281, %286, %291 in 0 : vector<8x128xf32>, vector<8x128xf32>, vector<8x128xf32>, vector<8x128xf32>, vector<8x128xf32>, vector<8x128xf32>, vector<8x128xf32>, vector<8x128xf32>, vector<8x128xf32> -> vector<72x128xf32>
    %c3_220 = arith.constant 3 : index
    %c0_221 = arith.constant 0 : index
    %c0_222 = arith.constant 0 : index
    %293 = vector.load %arg7[%c3_220, %c0_221, %c0_222] : memref<4x8x72xf32, #tpu.memory_space<vmem>>, vector<1x8x72xf32>
    %294 = vector.shape_cast %293 : vector<1x8x72xf32> to vector<8x72xf32>
    %cst_223 = arith.constant dense<0.000000e+00> : vector<8x128xf32>
    %295 = tpu.matmul %294, %292, %cst_223 {dimension_numbers = #tpu.dot_dimension_numbers<[1], [0], [0], [1], [0, 0, 1, 1], [], []>} : vector<8x72xf32>, vector<72x128xf32>, vector<8x128xf32> -> vector<8x128xf32>
    %c3_224 = arith.constant 3 : index
    %c0_225 = arith.constant 0 : index
    %c0_226 = arith.constant 0 : index
    %296 = vector.load %arg8[%c3_224, %c0_225, %c0_226] : memref<4x8x1xf32, #tpu.memory_space<vmem>>, vector<1x8x1xf32>
    %297 = vector.shape_cast %296 : vector<1x8x1xf32> to vector<8x1xf32>
    %298 = vector.broadcast %297 : vector<8x1xf32> to vector<8x128xf32>
    %299 = arith.addf %295, %298 : vector<8x128xf32>
    %cst_227 = arith.constant 0.000000e+00 : f32
    %300 = vector.broadcast %cst_227 : f32 to vector<8x128xf32>
    %301 = arith.maximumf %299, %300 : vector<8x128xf32>
    %c3_228 = arith.constant 3 : index
    %c0_229 = arith.constant 0 : index
    %c0_230 = arith.constant 0 : index
    %302 = vector.load %arg9[%c3_228, %c0_229, %c0_230] : memref<4x8x8xf32, #tpu.memory_space<vmem>>, vector<1x8x8xf32>
    %303 = vector.shape_cast %302 : vector<1x8x8xf32> to vector<8x8xf32>
    %cst_231 = arith.constant dense<0.000000e+00> : vector<8x128xf32>
    %304 = tpu.matmul %303, %301, %cst_231 {dimension_numbers = #tpu.dot_dimension_numbers<[1], [0], [0], [1], [0, 0, 1, 1], [], []>} : vector<8x8xf32>, vector<8x128xf32>, vector<8x128xf32> -> vector<8x128xf32>
    %305 = arith.addf %232, %304 : vector<8x128xf32>
    %c3_232 = arith.constant 3 : index
    %c0_233 = arith.constant 0 : index
    %c0_234 = arith.constant 0 : index
    %306 = vector.load %arg10[%c3_232, %c0_233, %c0_234] : memref<4x8x1xf32, #tpu.memory_space<vmem>>, vector<1x8x1xf32>
    %307 = vector.shape_cast %306 : vector<1x8x1xf32> to vector<8x1xf32>
    %308 = vector.broadcast %307 : vector<8x1xf32> to vector<8x128xf32>
    %309 = arith.addf %305, %308 : vector<8x128xf32>
    %c0_235 = arith.constant 0 : index
    %c0_236 = arith.constant 0 : index
    %310 = vector.load %arg11[%c0_235, %c0_236] : memref<8x128xf32, #tpu.memory_space<vmem>>, vector<8x128xf32>
    tpu.vector_store %arg11[%c0_235, %c0_236], %309 {strides = array<i32>} : memref<8x128xf32, #tpu.memory_space<vmem>>, vector<8x128xf32>,
    return
  }
  func.func @transform_0(%arg0: i32) -> (i32, i32) {
    %c0_i32 = arith.constant 0 : i32
    %c0_i32_0 = arith.constant 0 : i32
    return %c0_i32, %arg0 : i32, i32
  }
  func.func @transform_1(%arg0: i32) -> (i32, i32, i32) {
    %c0_i32 = arith.constant 0 : i32
    %c0_i32_0 = arith.constant 0 : i32
    %c0_i32_1 = arith.constant 0 : i32
    %c0_i32_2 = arith.constant 0 : i32
    return %c0_i32, %c0_i32_0, %c0_i32_1 : i32, i32, i32
  }
  func.func @transform_2(%arg0: i32) -> (i32, i32, i32) {
    %c0_i32 = arith.constant 0 : i32
    %c0_i32_0 = arith.constant 0 : i32
    %c0_i32_1 = arith.constant 0 : i32
    %c0_i32_2 = arith.constant 0 : i32
    return %c0_i32, %c0_i32_0, %c0_i32_1 : i32, i32, i32
  }
  func.func @transform_3(%arg0: i32) -> (i32, i32, i32) {
    %c0_i32 = arith.constant 0 : i32
    %c0_i32_0 = arith.constant 0 : i32
    %c0_i32_1 = arith.constant 0 : i32
    %c0_i32_2 = arith.constant 0 : i32
    return %c0_i32, %c0_i32_0, %c0_i32_1 : i32, i32, i32
  }
  func.func @transform_4(%arg0: i32) -> (i32, i32, i32) {
    %c0_i32 = arith.constant 0 : i32
    %c0_i32_0 = arith.constant 0 : i32
    %c0_i32_1 = arith.constant 0 : i32
    %c0_i32_2 = arith.constant 0 : i32
    return %c0_i32, %c0_i32_0, %c0_i32_1 : i32, i32, i32
  }
  func.func @transform_5(%arg0: i32) -> (i32, i32, i32) {
    %c0_i32 = arith.constant 0 : i32
    %c0_i32_0 = arith.constant 0 : i32
    %c0_i32_1 = arith.constant 0 : i32
    %c0_i32_2 = arith.constant 0 : i32
    return %c0_i32, %c0_i32_0, %c0_i32_1 : i32, i32, i32
  }
  func.func @transform_6(%arg0: i32) -> (i32, i32, i32) {
    %c0_i32 = arith.constant 0 : i32
    %c0_i32_0 = arith.constant 0 : i32
    %c0_i32_1 = arith.constant 0 : i32
    %c0_i32_2 = arith.constant 0 : i32
    return %c0_i32, %c0_i32_0, %c0_i32_1 : i32, i32, i32
  }
  func.func @transform_7(%arg0: i32) -> (i32, i32, i32) {
    %c0_i32 = arith.constant 0 : i32
    %c0_i32_0 = arith.constant 0 : i32
    %c0_i32_1 = arith.constant 0 : i32
    %c0_i32_2 = arith.constant 0 : i32
    return %c0_i32, %c0_i32_0, %c0_i32_1 : i32, i32, i32
  }
  func.func @transform_8(%arg0: i32) -> (i32, i32, i32) {
    %c0_i32 = arith.constant 0 : i32
    %c0_i32_0 = arith.constant 0 : i32
    %c0_i32_1 = arith.constant 0 : i32
    %c0_i32_2 = arith.constant 0 : i32
    return %c0_i32, %c0_i32_0, %c0_i32_1 : i32, i32, i32
  }
  func.func @transform_9(%arg0: i32) -> (i32, i32, i32) {
    %c0_i32 = arith.constant 0 : i32
    %c0_i32_0 = arith.constant 0 : i32
    %c0_i32_1 = arith.constant 0 : i32
    %c0_i32_2 = arith.constant 0 : i32
    return %c0_i32, %c0_i32_0, %c0_i32_1 : i32, i32, i32
  }
  func.func @transform_10(%arg0: i32) -> (i32, i32) {
    %c0_i32 = arith.constant 0 : i32
    %c0_i32_0 = arith.constant 0 : i32
    return %c0_i32, %arg0 : i32, i32
  }
  func.func @transform_11(%arg0: i32) -> (i32, i32) {
    %c0_i32 = arith.constant 0 : i32
    %c0_i32_0 = arith.constant 0 : i32
    return %c0_i32, %arg0 : i32, i32
  }
}

module attributes {stable_mosaic.version = 11 : i64} {
  func.func @residual_chain_kernel(%arg0: i32, %arg1: memref<8x128xf32, #tpu.memory_space<vmem>>, %arg2: memref<9x1x128xf32, #tpu.memory_space<vmem>>, %arg3: memref<6x8x1xf32, #tpu.memory_space<vmem>>, %arg4: memref<6x8x1xf32, #tpu.memory_space<vmem>>, %arg5: memref<6x8x8xf32, #tpu.memory_space<vmem>>, %arg6: memref<6x8x1xf32, #tpu.memory_space<vmem>>, %arg7: memref<6x8x72xf32, #tpu.memory_space<vmem>>, %arg8: memref<6x8x1xf32, #tpu.memory_space<vmem>>, %arg9: memref<6x8x8xf32, #tpu.memory_space<vmem>>, %arg10: memref<6x8x1xf32, #tpu.memory_space<vmem>>, %arg11: memref<8x128xf32, #tpu.memory_space<vmem>>) attributes {dimension_semantics = [#tpu.dimension_semantics<parallel>], iteration_bounds = array<i64: 1>, scalar_prefetch = 0 : i64, scratch_operands = 0 : i64, tpu.core_type = #tpu.core_type<tc>, window_params = [{transform_indices = @transform_0, window_bounds = array<i64: 8, 128>}, {pipeline_mode = #tpu.pipeline_mode<synchronous>, transform_indices = @transform_1, window_bounds = array<i64: 9, 1, 128>}, {pipeline_mode = #tpu.pipeline_mode<synchronous>, transform_indices = @transform_2, window_bounds = array<i64: 6, 8, 1>}, {pipeline_mode = #tpu.pipeline_mode<synchronous>, transform_indices = @transform_3, window_bounds = array<i64: 6, 8, 1>}, {pipeline_mode = #tpu.pipeline_mode<synchronous>, transform_indices = @transform_4, window_bounds = array<i64: 6, 8, 8>}, {pipeline_mode = #tpu.pipeline_mode<synchronous>, transform_indices = @transform_5, window_bounds = array<i64: 6, 8, 1>}, {pipeline_mode = #tpu.pipeline_mode<synchronous>, transform_indices = @transform_6, window_bounds = array<i64: 6, 8, 72>}, {pipeline_mode = #tpu.pipeline_mode<synchronous>, transform_indices = @transform_7, window_bounds = array<i64: 6, 8, 1>}, {pipeline_mode = #tpu.pipeline_mode<synchronous>, transform_indices = @transform_8, window_bounds = array<i64: 6, 8, 8>}, {pipeline_mode = #tpu.pipeline_mode<synchronous>, transform_indices = @transform_9, window_bounds = array<i64: 6, 8, 1>}, {transform_indices = @transform_10, window_bounds = array<i64: 8, 128>}]} {
    %c0 = arith.constant 0 : index
    %c0_0 = arith.constant 0 : index
    %0 = vector.load %arg1[%c0, %c0_0] : memref<8x128xf32, #tpu.memory_space<vmem>>, vector<8x128xf32>
    %c0_1 = arith.constant 0 : index
    %c0_2 = arith.constant 0 : index
    %c0_3 = arith.constant 0 : index
    %1 = vector.load %arg3[%c0_1, %c0_2, %c0_3] : memref<6x8x1xf32, #tpu.memory_space<vmem>>, vector<1x8x1xf32>
    %2 = vector.shape_cast %1 : vector<1x8x1xf32> to vector<8x1xf32>
    %3 = vector.broadcast %2 : vector<8x1xf32> to vector<8x128xf32>
    %4 = arith.mulf %0, %3 : vector<8x128xf32>
    %c0_4 = arith.constant 0 : index
    %c0_5 = arith.constant 0 : index
    %c0_6 = arith.constant 0 : index
    %5 = vector.load %arg4[%c0_4, %c0_5, %c0_6] : memref<6x8x1xf32, #tpu.memory_space<vmem>>, vector<1x8x1xf32>
    %6 = vector.shape_cast %5 : vector<1x8x1xf32> to vector<8x1xf32>
    %7 = vector.broadcast %6 : vector<8x1xf32> to vector<8x128xf32>
    %8 = arith.addf %4, %7 : vector<8x128xf32>
    %cst = arith.constant 0.000000e+00 : f32
    %9 = vector.broadcast %cst : f32 to vector<8x128xf32>
    %10 = arith.maximumf %8, %9 : vector<8x128xf32>
    %c0_7 = arith.constant 0 : index
    %c0_8 = arith.constant 0 : index
    %c0_9 = arith.constant 0 : index
    %11 = vector.load %arg5[%c0_7, %c0_8, %c0_9] : memref<6x8x8xf32, #tpu.memory_space<vmem>>, vector<1x8x8xf32>
    %12 = vector.shape_cast %11 : vector<1x8x8xf32> to vector<8x8xf32>
    %cst_10 = arith.constant dense<0.000000e+00> : vector<8x128xf32>
    %13 = tpu.matmul %12, %10, %cst_10 {dimension_numbers = #tpu.dot_dimension_numbers<[1], [0], [0], [1], [0, 0, 1, 1], [], []>} : vector<8x8xf32>, vector<8x128xf32>, vector<8x128xf32> -> vector<8x128xf32>
    %c0_11 = arith.constant 0 : index
    %c0_12 = arith.constant 0 : index
    %c0_13 = arith.constant 0 : index
    %14 = vector.load %arg6[%c0_11, %c0_12, %c0_13] : memref<6x8x1xf32, #tpu.memory_space<vmem>>, vector<1x8x1xf32>
    %15 = vector.shape_cast %14 : vector<1x8x1xf32> to vector<8x1xf32>
    %16 = vector.broadcast %15 : vector<8x1xf32> to vector<8x128xf32>
    %17 = arith.addf %13, %16 : vector<8x128xf32>
    %cst_14 = arith.constant 0.000000e+00 : f32
    %18 = vector.broadcast %cst_14 : f32 to vector<8x128xf32>
    %19 = arith.maximumf %17, %18 : vector<8x128xf32>
    %c5_i32 = arith.constant 5 : i32
    %20 = tpu.dynamic_rotate %19 by %c5_i32 dim 1 : vector<8x128xf32>, i32 -> vector<8x128xf32>
    %c0_15 = arith.constant 0 : index
    %c0_16 = arith.constant 0 : index
    %c0_17 = arith.constant 0 : index
    %21 = vector.load %arg2[%c0_15, %c0_16, %c0_17] : memref<9x1x128xf32, #tpu.memory_space<vmem>>, vector<1x1x128xf32>
    %22 = vector.shape_cast %21 : vector<1x1x128xf32> to vector<1x128xf32>
    %23 = vector.broadcast %22 : vector<1x128xf32> to vector<8x128xf32>
    %24 = arith.mulf %20, %23 : vector<8x128xf32>
    %c4_i32 = arith.constant 4 : i32
    %25 = tpu.dynamic_rotate %19 by %c4_i32 dim 1 : vector<8x128xf32>, i32 -> vector<8x128xf32>
    %c1 = arith.constant 1 : index
    %c0_18 = arith.constant 0 : index
    %c0_19 = arith.constant 0 : index
    %26 = vector.load %arg2[%c1, %c0_18, %c0_19] : memref<9x1x128xf32, #tpu.memory_space<vmem>>, vector<1x1x128xf32>
    %27 = vector.shape_cast %26 : vector<1x1x128xf32> to vector<1x128xf32>
    %28 = vector.broadcast %27 : vector<1x128xf32> to vector<8x128xf32>
    %29 = arith.mulf %25, %28 : vector<8x128xf32>
    %c3_i32 = arith.constant 3 : i32
    %30 = tpu.dynamic_rotate %19 by %c3_i32 dim 1 : vector<8x128xf32>, i32 -> vector<8x128xf32>
    %c2 = arith.constant 2 : index
    %c0_20 = arith.constant 0 : index
    %c0_21 = arith.constant 0 : index
    %31 = vector.load %arg2[%c2, %c0_20, %c0_21] : memref<9x1x128xf32, #tpu.memory_space<vmem>>, vector<1x1x128xf32>
    %32 = vector.shape_cast %31 : vector<1x1x128xf32> to vector<1x128xf32>
    %33 = vector.broadcast %32 : vector<1x128xf32> to vector<8x128xf32>
    %34 = arith.mulf %30, %33 : vector<8x128xf32>
    %c1_i32 = arith.constant 1 : i32
    %35 = tpu.dynamic_rotate %19 by %c1_i32 dim 1 : vector<8x128xf32>, i32 -> vector<8x128xf32>
    %c3 = arith.constant 3 : index
    %c0_22 = arith.constant 0 : index
    %c0_23 = arith.constant 0 : index
    %36 = vector.load %arg2[%c3, %c0_22, %c0_23] : memref<9x1x128xf32, #tpu.memory_space<vmem>>, vector<1x1x128xf32>
    %37 = vector.shape_cast %36 : vector<1x1x128xf32> to vector<1x128xf32>
    %38 = vector.broadcast %37 : vector<1x128xf32> to vector<8x128xf32>
    %39 = arith.mulf %35, %38 : vector<8x128xf32>
    %c127_i32 = arith.constant 127 : i32
    %40 = tpu.dynamic_rotate %19 by %c127_i32 dim 1 : vector<8x128xf32>, i32 -> vector<8x128xf32>
    %c5 = arith.constant 5 : index
    %c0_24 = arith.constant 0 : index
    %c0_25 = arith.constant 0 : index
    %41 = vector.load %arg2[%c5, %c0_24, %c0_25] : memref<9x1x128xf32, #tpu.memory_space<vmem>>, vector<1x1x128xf32>
    %42 = vector.shape_cast %41 : vector<1x1x128xf32> to vector<1x128xf32>
    %43 = vector.broadcast %42 : vector<1x128xf32> to vector<8x128xf32>
    %44 = arith.mulf %40, %43 : vector<8x128xf32>
    %c125_i32 = arith.constant 125 : i32
    %45 = tpu.dynamic_rotate %19 by %c125_i32 dim 1 : vector<8x128xf32>, i32 -> vector<8x128xf32>
    %c6 = arith.constant 6 : index
    %c0_26 = arith.constant 0 : index
    %c0_27 = arith.constant 0 : index
    %46 = vector.load %arg2[%c6, %c0_26, %c0_27] : memref<9x1x128xf32, #tpu.memory_space<vmem>>, vector<1x1x128xf32>
    %47 = vector.shape_cast %46 : vector<1x1x128xf32> to vector<1x128xf32>
    %48 = vector.broadcast %47 : vector<1x128xf32> to vector<8x128xf32>
    %49 = arith.mulf %45, %48 : vector<8x128xf32>
    %c124_i32 = arith.constant 124 : i32
    %50 = tpu.dynamic_rotate %19 by %c124_i32 dim 1 : vector<8x128xf32>, i32 -> vector<8x128xf32>
    %c7 = arith.constant 7 : index
    %c0_28 = arith.constant 0 : index
    %c0_29 = arith.constant 0 : index
    %51 = vector.load %arg2[%c7, %c0_28, %c0_29] : memref<9x1x128xf32, #tpu.memory_space<vmem>>, vector<1x1x128xf32>
    %52 = vector.shape_cast %51 : vector<1x1x128xf32> to vector<1x128xf32>
    %53 = vector.broadcast %52 : vector<1x128xf32> to vector<8x128xf32>
    %54 = arith.mulf %50, %53 : vector<8x128xf32>
    %c123_i32 = arith.constant 123 : i32
    %55 = tpu.dynamic_rotate %19 by %c123_i32 dim 1 : vector<8x128xf32>, i32 -> vector<8x128xf32>
    %c8 = arith.constant 8 : index
    %c0_30 = arith.constant 0 : index
    %c0_31 = arith.constant 0 : index
    %56 = vector.load %arg2[%c8, %c0_30, %c0_31] : memref<9x1x128xf32, #tpu.memory_space<vmem>>, vector<1x1x128xf32>
    %57 = vector.shape_cast %56 : vector<1x1x128xf32> to vector<1x128xf32>
    %58 = vector.broadcast %57 : vector<1x128xf32> to vector<8x128xf32>
    %59 = arith.mulf %55, %58 : vector<8x128xf32>
    %60 = tpu.concatenate %24, %29, %34, %39, %19, %44, %49, %54, %59 in 0 : vector<8x128xf32>, vector<8x128xf32>, vector<8x128xf32>, vector<8x128xf32>, vector<8x128xf32>, vector<8x128xf32>, vector<8x128xf32>, vector<8x128xf32>, vector<8x128xf32> -> vector<72x128xf32>
    %c0_32 = arith.constant 0 : index
    %c0_33 = arith.constant 0 : index
    %c0_34 = arith.constant 0 : index
    %61 = vector.load %arg7[%c0_32, %c0_33, %c0_34] : memref<6x8x72xf32, #tpu.memory_space<vmem>>, vector<1x8x72xf32>
    %62 = vector.shape_cast %61 : vector<1x8x72xf32> to vector<8x72xf32>
    %cst_35 = arith.constant dense<0.000000e+00> : vector<8x128xf32>
    %63 = tpu.matmul %62, %60, %cst_35 {dimension_numbers = #tpu.dot_dimension_numbers<[1], [0], [0], [1], [0, 0, 1, 1], [], []>} : vector<8x72xf32>, vector<72x128xf32>, vector<8x128xf32> -> vector<8x128xf32>
    %c0_36 = arith.constant 0 : index
    %c0_37 = arith.constant 0 : index
    %c0_38 = arith.constant 0 : index
    %64 = vector.load %arg8[%c0_36, %c0_37, %c0_38] : memref<6x8x1xf32, #tpu.memory_space<vmem>>, vector<1x8x1xf32>
    %65 = vector.shape_cast %64 : vector<1x8x1xf32> to vector<8x1xf32>
    %66 = vector.broadcast %65 : vector<8x1xf32> to vector<8x128xf32>
    %67 = arith.addf %63, %66 : vector<8x128xf32>
    %cst_39 = arith.constant 0.000000e+00 : f32
    %68 = vector.broadcast %cst_39 : f32 to vector<8x128xf32>
    %69 = arith.maximumf %67, %68 : vector<8x128xf32>
    %c0_40 = arith.constant 0 : index
    %c0_41 = arith.constant 0 : index
    %c0_42 = arith.constant 0 : index
    %70 = vector.load %arg9[%c0_40, %c0_41, %c0_42] : memref<6x8x8xf32, #tpu.memory_space<vmem>>, vector<1x8x8xf32>
    %71 = vector.shape_cast %70 : vector<1x8x8xf32> to vector<8x8xf32>
    %cst_43 = arith.constant dense<0.000000e+00> : vector<8x128xf32>
    %72 = tpu.matmul %71, %69, %cst_43 {dimension_numbers = #tpu.dot_dimension_numbers<[1], [0], [0], [1], [0, 0, 1, 1], [], []>} : vector<8x8xf32>, vector<8x128xf32>, vector<8x128xf32> -> vector<8x128xf32>
    %73 = arith.addf %0, %72 : vector<8x128xf32>
    %c0_44 = arith.constant 0 : index
    %c0_45 = arith.constant 0 : index
    %c0_46 = arith.constant 0 : index
    %74 = vector.load %arg10[%c0_44, %c0_45, %c0_46] : memref<6x8x1xf32, #tpu.memory_space<vmem>>, vector<1x8x1xf32>
    %75 = vector.shape_cast %74 : vector<1x8x1xf32> to vector<8x1xf32>
    %76 = vector.broadcast %75 : vector<8x1xf32> to vector<8x128xf32>
    %77 = arith.addf %73, %76 : vector<8x128xf32>
    %c1_47 = arith.constant 1 : index
    %c0_48 = arith.constant 0 : index
    %c0_49 = arith.constant 0 : index
    %78 = vector.load %arg3[%c1_47, %c0_48, %c0_49] : memref<6x8x1xf32, #tpu.memory_space<vmem>>, vector<1x8x1xf32>
    %79 = vector.shape_cast %78 : vector<1x8x1xf32> to vector<8x1xf32>
    %80 = vector.broadcast %79 : vector<8x1xf32> to vector<8x128xf32>
    %81 = arith.mulf %77, %80 : vector<8x128xf32>
    %c1_50 = arith.constant 1 : index
    %c0_51 = arith.constant 0 : index
    %c0_52 = arith.constant 0 : index
    %82 = vector.load %arg4[%c1_50, %c0_51, %c0_52] : memref<6x8x1xf32, #tpu.memory_space<vmem>>, vector<1x8x1xf32>
    %83 = vector.shape_cast %82 : vector<1x8x1xf32> to vector<8x1xf32>
    %84 = vector.broadcast %83 : vector<8x1xf32> to vector<8x128xf32>
    %85 = arith.addf %81, %84 : vector<8x128xf32>
    %cst_53 = arith.constant 0.000000e+00 : f32
    %86 = vector.broadcast %cst_53 : f32 to vector<8x128xf32>
    %87 = arith.maximumf %85, %86 : vector<8x128xf32>
    %c1_54 = arith.constant 1 : index
    %c0_55 = arith.constant 0 : index
    %c0_56 = arith.constant 0 : index
    %88 = vector.load %arg5[%c1_54, %c0_55, %c0_56] : memref<6x8x8xf32, #tpu.memory_space<vmem>>, vector<1x8x8xf32>
    %89 = vector.shape_cast %88 : vector<1x8x8xf32> to vector<8x8xf32>
    %cst_57 = arith.constant dense<0.000000e+00> : vector<8x128xf32>
    %90 = tpu.matmul %89, %87, %cst_57 {dimension_numbers = #tpu.dot_dimension_numbers<[1], [0], [0], [1], [0, 0, 1, 1], [], []>} : vector<8x8xf32>, vector<8x128xf32>, vector<8x128xf32> -> vector<8x128xf32>
    %c1_58 = arith.constant 1 : index
    %c0_59 = arith.constant 0 : index
    %c0_60 = arith.constant 0 : index
    %91 = vector.load %arg6[%c1_58, %c0_59, %c0_60] : memref<6x8x1xf32, #tpu.memory_space<vmem>>, vector<1x8x1xf32>
    %92 = vector.shape_cast %91 : vector<1x8x1xf32> to vector<8x1xf32>
    %93 = vector.broadcast %92 : vector<8x1xf32> to vector<8x128xf32>
    %94 = arith.addf %90, %93 : vector<8x128xf32>
    %cst_61 = arith.constant 0.000000e+00 : f32
    %95 = vector.broadcast %cst_61 : f32 to vector<8x128xf32>
    %96 = arith.maximumf %94, %95 : vector<8x128xf32>
    %c5_i32_62 = arith.constant 5 : i32
    %97 = tpu.dynamic_rotate %96 by %c5_i32_62 dim 1 : vector<8x128xf32>, i32 -> vector<8x128xf32>
    %c0_63 = arith.constant 0 : index
    %c0_64 = arith.constant 0 : index
    %c0_65 = arith.constant 0 : index
    %98 = vector.load %arg2[%c0_63, %c0_64, %c0_65] : memref<9x1x128xf32, #tpu.memory_space<vmem>>, vector<1x1x128xf32>
    %99 = vector.shape_cast %98 : vector<1x1x128xf32> to vector<1x128xf32>
    %100 = vector.broadcast %99 : vector<1x128xf32> to vector<8x128xf32>
    %101 = arith.mulf %97, %100 : vector<8x128xf32>
    %c4_i32_66 = arith.constant 4 : i32
    %102 = tpu.dynamic_rotate %96 by %c4_i32_66 dim 1 : vector<8x128xf32>, i32 -> vector<8x128xf32>
    %c1_67 = arith.constant 1 : index
    %c0_68 = arith.constant 0 : index
    %c0_69 = arith.constant 0 : index
    %103 = vector.load %arg2[%c1_67, %c0_68, %c0_69] : memref<9x1x128xf32, #tpu.memory_space<vmem>>, vector<1x1x128xf32>
    %104 = vector.shape_cast %103 : vector<1x1x128xf32> to vector<1x128xf32>
    %105 = vector.broadcast %104 : vector<1x128xf32> to vector<8x128xf32>
    %106 = arith.mulf %102, %105 : vector<8x128xf32>
    %c3_i32_70 = arith.constant 3 : i32
    %107 = tpu.dynamic_rotate %96 by %c3_i32_70 dim 1 : vector<8x128xf32>, i32 -> vector<8x128xf32>
    %c2_71 = arith.constant 2 : index
    %c0_72 = arith.constant 0 : index
    %c0_73 = arith.constant 0 : index
    %108 = vector.load %arg2[%c2_71, %c0_72, %c0_73] : memref<9x1x128xf32, #tpu.memory_space<vmem>>, vector<1x1x128xf32>
    %109 = vector.shape_cast %108 : vector<1x1x128xf32> to vector<1x128xf32>
    %110 = vector.broadcast %109 : vector<1x128xf32> to vector<8x128xf32>
    %111 = arith.mulf %107, %110 : vector<8x128xf32>
    %c1_i32_74 = arith.constant 1 : i32
    %112 = tpu.dynamic_rotate %96 by %c1_i32_74 dim 1 : vector<8x128xf32>, i32 -> vector<8x128xf32>
    %c3_75 = arith.constant 3 : index
    %c0_76 = arith.constant 0 : index
    %c0_77 = arith.constant 0 : index
    %113 = vector.load %arg2[%c3_75, %c0_76, %c0_77] : memref<9x1x128xf32, #tpu.memory_space<vmem>>, vector<1x1x128xf32>
    %114 = vector.shape_cast %113 : vector<1x1x128xf32> to vector<1x128xf32>
    %115 = vector.broadcast %114 : vector<1x128xf32> to vector<8x128xf32>
    %116 = arith.mulf %112, %115 : vector<8x128xf32>
    %c127_i32_78 = arith.constant 127 : i32
    %117 = tpu.dynamic_rotate %96 by %c127_i32_78 dim 1 : vector<8x128xf32>, i32 -> vector<8x128xf32>
    %c5_79 = arith.constant 5 : index
    %c0_80 = arith.constant 0 : index
    %c0_81 = arith.constant 0 : index
    %118 = vector.load %arg2[%c5_79, %c0_80, %c0_81] : memref<9x1x128xf32, #tpu.memory_space<vmem>>, vector<1x1x128xf32>
    %119 = vector.shape_cast %118 : vector<1x1x128xf32> to vector<1x128xf32>
    %120 = vector.broadcast %119 : vector<1x128xf32> to vector<8x128xf32>
    %121 = arith.mulf %117, %120 : vector<8x128xf32>
    %c125_i32_82 = arith.constant 125 : i32
    %122 = tpu.dynamic_rotate %96 by %c125_i32_82 dim 1 : vector<8x128xf32>, i32 -> vector<8x128xf32>
    %c6_83 = arith.constant 6 : index
    %c0_84 = arith.constant 0 : index
    %c0_85 = arith.constant 0 : index
    %123 = vector.load %arg2[%c6_83, %c0_84, %c0_85] : memref<9x1x128xf32, #tpu.memory_space<vmem>>, vector<1x1x128xf32>
    %124 = vector.shape_cast %123 : vector<1x1x128xf32> to vector<1x128xf32>
    %125 = vector.broadcast %124 : vector<1x128xf32> to vector<8x128xf32>
    %126 = arith.mulf %122, %125 : vector<8x128xf32>
    %c124_i32_86 = arith.constant 124 : i32
    %127 = tpu.dynamic_rotate %96 by %c124_i32_86 dim 1 : vector<8x128xf32>, i32 -> vector<8x128xf32>
    %c7_87 = arith.constant 7 : index
    %c0_88 = arith.constant 0 : index
    %c0_89 = arith.constant 0 : index
    %128 = vector.load %arg2[%c7_87, %c0_88, %c0_89] : memref<9x1x128xf32, #tpu.memory_space<vmem>>, vector<1x1x128xf32>
    %129 = vector.shape_cast %128 : vector<1x1x128xf32> to vector<1x128xf32>
    %130 = vector.broadcast %129 : vector<1x128xf32> to vector<8x128xf32>
    %131 = arith.mulf %127, %130 : vector<8x128xf32>
    %c123_i32_90 = arith.constant 123 : i32
    %132 = tpu.dynamic_rotate %96 by %c123_i32_90 dim 1 : vector<8x128xf32>, i32 -> vector<8x128xf32>
    %c8_91 = arith.constant 8 : index
    %c0_92 = arith.constant 0 : index
    %c0_93 = arith.constant 0 : index
    %133 = vector.load %arg2[%c8_91, %c0_92, %c0_93] : memref<9x1x128xf32, #tpu.memory_space<vmem>>, vector<1x1x128xf32>
    %134 = vector.shape_cast %133 : vector<1x1x128xf32> to vector<1x128xf32>
    %135 = vector.broadcast %134 : vector<1x128xf32> to vector<8x128xf32>
    %136 = arith.mulf %132, %135 : vector<8x128xf32>
    %137 = tpu.concatenate %101, %106, %111, %116, %96, %121, %126, %131, %136 in 0 : vector<8x128xf32>, vector<8x128xf32>, vector<8x128xf32>, vector<8x128xf32>, vector<8x128xf32>, vector<8x128xf32>, vector<8x128xf32>, vector<8x128xf32>, vector<8x128xf32> -> vector<72x128xf32>
    %c1_94 = arith.constant 1 : index
    %c0_95 = arith.constant 0 : index
    %c0_96 = arith.constant 0 : index
    %138 = vector.load %arg7[%c1_94, %c0_95, %c0_96] : memref<6x8x72xf32, #tpu.memory_space<vmem>>, vector<1x8x72xf32>
    %139 = vector.shape_cast %138 : vector<1x8x72xf32> to vector<8x72xf32>
    %cst_97 = arith.constant dense<0.000000e+00> : vector<8x128xf32>
    %140 = tpu.matmul %139, %137, %cst_97 {dimension_numbers = #tpu.dot_dimension_numbers<[1], [0], [0], [1], [0, 0, 1, 1], [], []>} : vector<8x72xf32>, vector<72x128xf32>, vector<8x128xf32> -> vector<8x128xf32>
    %c1_98 = arith.constant 1 : index
    %c0_99 = arith.constant 0 : index
    %c0_100 = arith.constant 0 : index
    %141 = vector.load %arg8[%c1_98, %c0_99, %c0_100] : memref<6x8x1xf32, #tpu.memory_space<vmem>>, vector<1x8x1xf32>
    %142 = vector.shape_cast %141 : vector<1x8x1xf32> to vector<8x1xf32>
    %143 = vector.broadcast %142 : vector<8x1xf32> to vector<8x128xf32>
    %144 = arith.addf %140, %143 : vector<8x128xf32>
    %cst_101 = arith.constant 0.000000e+00 : f32
    %145 = vector.broadcast %cst_101 : f32 to vector<8x128xf32>
    %146 = arith.maximumf %144, %145 : vector<8x128xf32>
    %c1_102 = arith.constant 1 : index
    %c0_103 = arith.constant 0 : index
    %c0_104 = arith.constant 0 : index
    %147 = vector.load %arg9[%c1_102, %c0_103, %c0_104] : memref<6x8x8xf32, #tpu.memory_space<vmem>>, vector<1x8x8xf32>
    %148 = vector.shape_cast %147 : vector<1x8x8xf32> to vector<8x8xf32>
    %cst_105 = arith.constant dense<0.000000e+00> : vector<8x128xf32>
    %149 = tpu.matmul %148, %146, %cst_105 {dimension_numbers = #tpu.dot_dimension_numbers<[1], [0], [0], [1], [0, 0, 1, 1], [], []>} : vector<8x8xf32>, vector<8x128xf32>, vector<8x128xf32> -> vector<8x128xf32>
    %150 = arith.addf %77, %149 : vector<8x128xf32>
    %c1_106 = arith.constant 1 : index
    %c0_107 = arith.constant 0 : index
    %c0_108 = arith.constant 0 : index
    %151 = vector.load %arg10[%c1_106, %c0_107, %c0_108] : memref<6x8x1xf32, #tpu.memory_space<vmem>>, vector<1x8x1xf32>
    %152 = vector.shape_cast %151 : vector<1x8x1xf32> to vector<8x1xf32>
    %153 = vector.broadcast %152 : vector<8x1xf32> to vector<8x128xf32>
    %154 = arith.addf %150, %153 : vector<8x128xf32>
    %c2_109 = arith.constant 2 : index
    %c0_110 = arith.constant 0 : index
    %c0_111 = arith.constant 0 : index
    %155 = vector.load %arg3[%c2_109, %c0_110, %c0_111] : memref<6x8x1xf32, #tpu.memory_space<vmem>>, vector<1x8x1xf32>
    %156 = vector.shape_cast %155 : vector<1x8x1xf32> to vector<8x1xf32>
    %157 = vector.broadcast %156 : vector<8x1xf32> to vector<8x128xf32>
    %158 = arith.mulf %154, %157 : vector<8x128xf32>
    %c2_112 = arith.constant 2 : index
    %c0_113 = arith.constant 0 : index
    %c0_114 = arith.constant 0 : index
    %159 = vector.load %arg4[%c2_112, %c0_113, %c0_114] : memref<6x8x1xf32, #tpu.memory_space<vmem>>, vector<1x8x1xf32>
    %160 = vector.shape_cast %159 : vector<1x8x1xf32> to vector<8x1xf32>
    %161 = vector.broadcast %160 : vector<8x1xf32> to vector<8x128xf32>
    %162 = arith.addf %158, %161 : vector<8x128xf32>
    %cst_115 = arith.constant 0.000000e+00 : f32
    %163 = vector.broadcast %cst_115 : f32 to vector<8x128xf32>
    %164 = arith.maximumf %162, %163 : vector<8x128xf32>
    %c2_116 = arith.constant 2 : index
    %c0_117 = arith.constant 0 : index
    %c0_118 = arith.constant 0 : index
    %165 = vector.load %arg5[%c2_116, %c0_117, %c0_118] : memref<6x8x8xf32, #tpu.memory_space<vmem>>, vector<1x8x8xf32>
    %166 = vector.shape_cast %165 : vector<1x8x8xf32> to vector<8x8xf32>
    %cst_119 = arith.constant dense<0.000000e+00> : vector<8x128xf32>
    %167 = tpu.matmul %166, %164, %cst_119 {dimension_numbers = #tpu.dot_dimension_numbers<[1], [0], [0], [1], [0, 0, 1, 1], [], []>} : vector<8x8xf32>, vector<8x128xf32>, vector<8x128xf32> -> vector<8x128xf32>
    %c2_120 = arith.constant 2 : index
    %c0_121 = arith.constant 0 : index
    %c0_122 = arith.constant 0 : index
    %168 = vector.load %arg6[%c2_120, %c0_121, %c0_122] : memref<6x8x1xf32, #tpu.memory_space<vmem>>, vector<1x8x1xf32>
    %169 = vector.shape_cast %168 : vector<1x8x1xf32> to vector<8x1xf32>
    %170 = vector.broadcast %169 : vector<8x1xf32> to vector<8x128xf32>
    %171 = arith.addf %167, %170 : vector<8x128xf32>
    %cst_123 = arith.constant 0.000000e+00 : f32
    %172 = vector.broadcast %cst_123 : f32 to vector<8x128xf32>
    %173 = arith.maximumf %171, %172 : vector<8x128xf32>
    %c5_i32_124 = arith.constant 5 : i32
    %174 = tpu.dynamic_rotate %173 by %c5_i32_124 dim 1 : vector<8x128xf32>, i32 -> vector<8x128xf32>
    %c0_125 = arith.constant 0 : index
    %c0_126 = arith.constant 0 : index
    %c0_127 = arith.constant 0 : index
    %175 = vector.load %arg2[%c0_125, %c0_126, %c0_127] : memref<9x1x128xf32, #tpu.memory_space<vmem>>, vector<1x1x128xf32>
    %176 = vector.shape_cast %175 : vector<1x1x128xf32> to vector<1x128xf32>
    %177 = vector.broadcast %176 : vector<1x128xf32> to vector<8x128xf32>
    %178 = arith.mulf %174, %177 : vector<8x128xf32>
    %c4_i32_128 = arith.constant 4 : i32
    %179 = tpu.dynamic_rotate %173 by %c4_i32_128 dim 1 : vector<8x128xf32>, i32 -> vector<8x128xf32>
    %c1_129 = arith.constant 1 : index
    %c0_130 = arith.constant 0 : index
    %c0_131 = arith.constant 0 : index
    %180 = vector.load %arg2[%c1_129, %c0_130, %c0_131] : memref<9x1x128xf32, #tpu.memory_space<vmem>>, vector<1x1x128xf32>
    %181 = vector.shape_cast %180 : vector<1x1x128xf32> to vector<1x128xf32>
    %182 = vector.broadcast %181 : vector<1x128xf32> to vector<8x128xf32>
    %183 = arith.mulf %179, %182 : vector<8x128xf32>
    %c3_i32_132 = arith.constant 3 : i32
    %184 = tpu.dynamic_rotate %173 by %c3_i32_132 dim 1 : vector<8x128xf32>, i32 -> vector<8x128xf32>
    %c2_133 = arith.constant 2 : index
    %c0_134 = arith.constant 0 : index
    %c0_135 = arith.constant 0 : index
    %185 = vector.load %arg2[%c2_133, %c0_134, %c0_135] : memref<9x1x128xf32, #tpu.memory_space<vmem>>, vector<1x1x128xf32>
    %186 = vector.shape_cast %185 : vector<1x1x128xf32> to vector<1x128xf32>
    %187 = vector.broadcast %186 : vector<1x128xf32> to vector<8x128xf32>
    %188 = arith.mulf %184, %187 : vector<8x128xf32>
    %c1_i32_136 = arith.constant 1 : i32
    %189 = tpu.dynamic_rotate %173 by %c1_i32_136 dim 1 : vector<8x128xf32>, i32 -> vector<8x128xf32>
    %c3_137 = arith.constant 3 : index
    %c0_138 = arith.constant 0 : index
    %c0_139 = arith.constant 0 : index
    %190 = vector.load %arg2[%c3_137, %c0_138, %c0_139] : memref<9x1x128xf32, #tpu.memory_space<vmem>>, vector<1x1x128xf32>
    %191 = vector.shape_cast %190 : vector<1x1x128xf32> to vector<1x128xf32>
    %192 = vector.broadcast %191 : vector<1x128xf32> to vector<8x128xf32>
    %193 = arith.mulf %189, %192 : vector<8x128xf32>
    %c127_i32_140 = arith.constant 127 : i32
    %194 = tpu.dynamic_rotate %173 by %c127_i32_140 dim 1 : vector<8x128xf32>, i32 -> vector<8x128xf32>
    %c5_141 = arith.constant 5 : index
    %c0_142 = arith.constant 0 : index
    %c0_143 = arith.constant 0 : index
    %195 = vector.load %arg2[%c5_141, %c0_142, %c0_143] : memref<9x1x128xf32, #tpu.memory_space<vmem>>, vector<1x1x128xf32>
    %196 = vector.shape_cast %195 : vector<1x1x128xf32> to vector<1x128xf32>
    %197 = vector.broadcast %196 : vector<1x128xf32> to vector<8x128xf32>
    %198 = arith.mulf %194, %197 : vector<8x128xf32>
    %c125_i32_144 = arith.constant 125 : i32
    %199 = tpu.dynamic_rotate %173 by %c125_i32_144 dim 1 : vector<8x128xf32>, i32 -> vector<8x128xf32>
    %c6_145 = arith.constant 6 : index
    %c0_146 = arith.constant 0 : index
    %c0_147 = arith.constant 0 : index
    %200 = vector.load %arg2[%c6_145, %c0_146, %c0_147] : memref<9x1x128xf32, #tpu.memory_space<vmem>>, vector<1x1x128xf32>
    %201 = vector.shape_cast %200 : vector<1x1x128xf32> to vector<1x128xf32>
    %202 = vector.broadcast %201 : vector<1x128xf32> to vector<8x128xf32>
    %203 = arith.mulf %199, %202 : vector<8x128xf32>
    %c124_i32_148 = arith.constant 124 : i32
    %204 = tpu.dynamic_rotate %173 by %c124_i32_148 dim 1 : vector<8x128xf32>, i32 -> vector<8x128xf32>
    %c7_149 = arith.constant 7 : index
    %c0_150 = arith.constant 0 : index
    %c0_151 = arith.constant 0 : index
    %205 = vector.load %arg2[%c7_149, %c0_150, %c0_151] : memref<9x1x128xf32, #tpu.memory_space<vmem>>, vector<1x1x128xf32>
    %206 = vector.shape_cast %205 : vector<1x1x128xf32> to vector<1x128xf32>
    %207 = vector.broadcast %206 : vector<1x128xf32> to vector<8x128xf32>
    %208 = arith.mulf %204, %207 : vector<8x128xf32>
    %c123_i32_152 = arith.constant 123 : i32
    %209 = tpu.dynamic_rotate %173 by %c123_i32_152 dim 1 : vector<8x128xf32>, i32 -> vector<8x128xf32>
    %c8_153 = arith.constant 8 : index
    %c0_154 = arith.constant 0 : index
    %c0_155 = arith.constant 0 : index
    %210 = vector.load %arg2[%c8_153, %c0_154, %c0_155] : memref<9x1x128xf32, #tpu.memory_space<vmem>>, vector<1x1x128xf32>
    %211 = vector.shape_cast %210 : vector<1x1x128xf32> to vector<1x128xf32>
    %212 = vector.broadcast %211 : vector<1x128xf32> to vector<8x128xf32>
    %213 = arith.mulf %209, %212 : vector<8x128xf32>
    %214 = tpu.concatenate %178, %183, %188, %193, %173, %198, %203, %208, %213 in 0 : vector<8x128xf32>, vector<8x128xf32>, vector<8x128xf32>, vector<8x128xf32>, vector<8x128xf32>, vector<8x128xf32>, vector<8x128xf32>, vector<8x128xf32>, vector<8x128xf32> -> vector<72x128xf32>
    %c2_156 = arith.constant 2 : index
    %c0_157 = arith.constant 0 : index
    %c0_158 = arith.constant 0 : index
    %215 = vector.load %arg7[%c2_156, %c0_157, %c0_158] : memref<6x8x72xf32, #tpu.memory_space<vmem>>, vector<1x8x72xf32>
    %216 = vector.shape_cast %215 : vector<1x8x72xf32> to vector<8x72xf32>
    %cst_159 = arith.constant dense<0.000000e+00> : vector<8x128xf32>
    %217 = tpu.matmul %216, %214, %cst_159 {dimension_numbers = #tpu.dot_dimension_numbers<[1], [0], [0], [1], [0, 0, 1, 1], [], []>} : vector<8x72xf32>, vector<72x128xf32>, vector<8x128xf32> -> vector<8x128xf32>
    %c2_160 = arith.constant 2 : index
    %c0_161 = arith.constant 0 : index
    %c0_162 = arith.constant 0 : index
    %218 = vector.load %arg8[%c2_160, %c0_161, %c0_162] : memref<6x8x1xf32, #tpu.memory_space<vmem>>, vector<1x8x1xf32>
    %219 = vector.shape_cast %218 : vector<1x8x1xf32> to vector<8x1xf32>
    %220 = vector.broadcast %219 : vector<8x1xf32> to vector<8x128xf32>
    %221 = arith.addf %217, %220 : vector<8x128xf32>
    %cst_163 = arith.constant 0.000000e+00 : f32
    %222 = vector.broadcast %cst_163 : f32 to vector<8x128xf32>
    %223 = arith.maximumf %221, %222 : vector<8x128xf32>
    %c2_164 = arith.constant 2 : index
    %c0_165 = arith.constant 0 : index
    %c0_166 = arith.constant 0 : index
    %224 = vector.load %arg9[%c2_164, %c0_165, %c0_166] : memref<6x8x8xf32, #tpu.memory_space<vmem>>, vector<1x8x8xf32>
    %225 = vector.shape_cast %224 : vector<1x8x8xf32> to vector<8x8xf32>
    %cst_167 = arith.constant dense<0.000000e+00> : vector<8x128xf32>
    %226 = tpu.matmul %225, %223, %cst_167 {dimension_numbers = #tpu.dot_dimension_numbers<[1], [0], [0], [1], [0, 0, 1, 1], [], []>} : vector<8x8xf32>, vector<8x128xf32>, vector<8x128xf32> -> vector<8x128xf32>
    %227 = arith.addf %154, %226 : vector<8x128xf32>
    %c2_168 = arith.constant 2 : index
    %c0_169 = arith.constant 0 : index
    %c0_170 = arith.constant 0 : index
    %228 = vector.load %arg10[%c2_168, %c0_169, %c0_170] : memref<6x8x1xf32, #tpu.memory_space<vmem>>, vector<1x8x1xf32>
    %229 = vector.shape_cast %228 : vector<1x8x1xf32> to vector<8x1xf32>
    %230 = vector.broadcast %229 : vector<8x1xf32> to vector<8x128xf32>
    %231 = arith.addf %227, %230 : vector<8x128xf32>
    %c3_171 = arith.constant 3 : index
    %c0_172 = arith.constant 0 : index
    %c0_173 = arith.constant 0 : index
    %232 = vector.load %arg3[%c3_171, %c0_172, %c0_173] : memref<6x8x1xf32, #tpu.memory_space<vmem>>, vector<1x8x1xf32>
    %233 = vector.shape_cast %232 : vector<1x8x1xf32> to vector<8x1xf32>
    %234 = vector.broadcast %233 : vector<8x1xf32> to vector<8x128xf32>
    %235 = arith.mulf %231, %234 : vector<8x128xf32>
    %c3_174 = arith.constant 3 : index
    %c0_175 = arith.constant 0 : index
    %c0_176 = arith.constant 0 : index
    %236 = vector.load %arg4[%c3_174, %c0_175, %c0_176] : memref<6x8x1xf32, #tpu.memory_space<vmem>>, vector<1x8x1xf32>
    %237 = vector.shape_cast %236 : vector<1x8x1xf32> to vector<8x1xf32>
    %238 = vector.broadcast %237 : vector<8x1xf32> to vector<8x128xf32>
    %239 = arith.addf %235, %238 : vector<8x128xf32>
    %cst_177 = arith.constant 0.000000e+00 : f32
    %240 = vector.broadcast %cst_177 : f32 to vector<8x128xf32>
    %241 = arith.maximumf %239, %240 : vector<8x128xf32>
    %c3_178 = arith.constant 3 : index
    %c0_179 = arith.constant 0 : index
    %c0_180 = arith.constant 0 : index
    %242 = vector.load %arg5[%c3_178, %c0_179, %c0_180] : memref<6x8x8xf32, #tpu.memory_space<vmem>>, vector<1x8x8xf32>
    %243 = vector.shape_cast %242 : vector<1x8x8xf32> to vector<8x8xf32>
    %cst_181 = arith.constant dense<0.000000e+00> : vector<8x128xf32>
    %244 = tpu.matmul %243, %241, %cst_181 {dimension_numbers = #tpu.dot_dimension_numbers<[1], [0], [0], [1], [0, 0, 1, 1], [], []>} : vector<8x8xf32>, vector<8x128xf32>, vector<8x128xf32> -> vector<8x128xf32>
    %c3_182 = arith.constant 3 : index
    %c0_183 = arith.constant 0 : index
    %c0_184 = arith.constant 0 : index
    %245 = vector.load %arg6[%c3_182, %c0_183, %c0_184] : memref<6x8x1xf32, #tpu.memory_space<vmem>>, vector<1x8x1xf32>
    %246 = vector.shape_cast %245 : vector<1x8x1xf32> to vector<8x1xf32>
    %247 = vector.broadcast %246 : vector<8x1xf32> to vector<8x128xf32>
    %248 = arith.addf %244, %247 : vector<8x128xf32>
    %cst_185 = arith.constant 0.000000e+00 : f32
    %249 = vector.broadcast %cst_185 : f32 to vector<8x128xf32>
    %250 = arith.maximumf %248, %249 : vector<8x128xf32>
    %c5_i32_186 = arith.constant 5 : i32
    %251 = tpu.dynamic_rotate %250 by %c5_i32_186 dim 1 : vector<8x128xf32>, i32 -> vector<8x128xf32>
    %c0_187 = arith.constant 0 : index
    %c0_188 = arith.constant 0 : index
    %c0_189 = arith.constant 0 : index
    %252 = vector.load %arg2[%c0_187, %c0_188, %c0_189] : memref<9x1x128xf32, #tpu.memory_space<vmem>>, vector<1x1x128xf32>
    %253 = vector.shape_cast %252 : vector<1x1x128xf32> to vector<1x128xf32>
    %254 = vector.broadcast %253 : vector<1x128xf32> to vector<8x128xf32>
    %255 = arith.mulf %251, %254 : vector<8x128xf32>
    %c4_i32_190 = arith.constant 4 : i32
    %256 = tpu.dynamic_rotate %250 by %c4_i32_190 dim 1 : vector<8x128xf32>, i32 -> vector<8x128xf32>
    %c1_191 = arith.constant 1 : index
    %c0_192 = arith.constant 0 : index
    %c0_193 = arith.constant 0 : index
    %257 = vector.load %arg2[%c1_191, %c0_192, %c0_193] : memref<9x1x128xf32, #tpu.memory_space<vmem>>, vector<1x1x128xf32>
    %258 = vector.shape_cast %257 : vector<1x1x128xf32> to vector<1x128xf32>
    %259 = vector.broadcast %258 : vector<1x128xf32> to vector<8x128xf32>
    %260 = arith.mulf %256, %259 : vector<8x128xf32>
    %c3_i32_194 = arith.constant 3 : i32
    %261 = tpu.dynamic_rotate %250 by %c3_i32_194 dim 1 : vector<8x128xf32>, i32 -> vector<8x128xf32>
    %c2_195 = arith.constant 2 : index
    %c0_196 = arith.constant 0 : index
    %c0_197 = arith.constant 0 : index
    %262 = vector.load %arg2[%c2_195, %c0_196, %c0_197] : memref<9x1x128xf32, #tpu.memory_space<vmem>>, vector<1x1x128xf32>
    %263 = vector.shape_cast %262 : vector<1x1x128xf32> to vector<1x128xf32>
    %264 = vector.broadcast %263 : vector<1x128xf32> to vector<8x128xf32>
    %265 = arith.mulf %261, %264 : vector<8x128xf32>
    %c1_i32_198 = arith.constant 1 : i32
    %266 = tpu.dynamic_rotate %250 by %c1_i32_198 dim 1 : vector<8x128xf32>, i32 -> vector<8x128xf32>
    %c3_199 = arith.constant 3 : index
    %c0_200 = arith.constant 0 : index
    %c0_201 = arith.constant 0 : index
    %267 = vector.load %arg2[%c3_199, %c0_200, %c0_201] : memref<9x1x128xf32, #tpu.memory_space<vmem>>, vector<1x1x128xf32>
    %268 = vector.shape_cast %267 : vector<1x1x128xf32> to vector<1x128xf32>
    %269 = vector.broadcast %268 : vector<1x128xf32> to vector<8x128xf32>
    %270 = arith.mulf %266, %269 : vector<8x128xf32>
    %c127_i32_202 = arith.constant 127 : i32
    %271 = tpu.dynamic_rotate %250 by %c127_i32_202 dim 1 : vector<8x128xf32>, i32 -> vector<8x128xf32>
    %c5_203 = arith.constant 5 : index
    %c0_204 = arith.constant 0 : index
    %c0_205 = arith.constant 0 : index
    %272 = vector.load %arg2[%c5_203, %c0_204, %c0_205] : memref<9x1x128xf32, #tpu.memory_space<vmem>>, vector<1x1x128xf32>
    %273 = vector.shape_cast %272 : vector<1x1x128xf32> to vector<1x128xf32>
    %274 = vector.broadcast %273 : vector<1x128xf32> to vector<8x128xf32>
    %275 = arith.mulf %271, %274 : vector<8x128xf32>
    %c125_i32_206 = arith.constant 125 : i32
    %276 = tpu.dynamic_rotate %250 by %c125_i32_206 dim 1 : vector<8x128xf32>, i32 -> vector<8x128xf32>
    %c6_207 = arith.constant 6 : index
    %c0_208 = arith.constant 0 : index
    %c0_209 = arith.constant 0 : index
    %277 = vector.load %arg2[%c6_207, %c0_208, %c0_209] : memref<9x1x128xf32, #tpu.memory_space<vmem>>, vector<1x1x128xf32>
    %278 = vector.shape_cast %277 : vector<1x1x128xf32> to vector<1x128xf32>
    %279 = vector.broadcast %278 : vector<1x128xf32> to vector<8x128xf32>
    %280 = arith.mulf %276, %279 : vector<8x128xf32>
    %c124_i32_210 = arith.constant 124 : i32
    %281 = tpu.dynamic_rotate %250 by %c124_i32_210 dim 1 : vector<8x128xf32>, i32 -> vector<8x128xf32>
    %c7_211 = arith.constant 7 : index
    %c0_212 = arith.constant 0 : index
    %c0_213 = arith.constant 0 : index
    %282 = vector.load %arg2[%c7_211, %c0_212, %c0_213] : memref<9x1x128xf32, #tpu.memory_space<vmem>>, vector<1x1x128xf32>
    %283 = vector.shape_cast %282 : vector<1x1x128xf32> to vector<1x128xf32>
    %284 = vector.broadcast %283 : vector<1x128xf32> to vector<8x128xf32>
    %285 = arith.mulf %281, %284 : vector<8x128xf32>
    %c123_i32_214 = arith.constant 123 : i32
    %286 = tpu.dynamic_rotate %250 by %c123_i32_214 dim 1 : vector<8x128xf32>, i32 -> vector<8x128xf32>
    %c8_215 = arith.constant 8 : index
    %c0_216 = arith.constant 0 : index
    %c0_217 = arith.constant 0 : index
    %287 = vector.load %arg2[%c8_215, %c0_216, %c0_217] : memref<9x1x128xf32, #tpu.memory_space<vmem>>, vector<1x1x128xf32>
    %288 = vector.shape_cast %287 : vector<1x1x128xf32> to vector<1x128xf32>
    %289 = vector.broadcast %288 : vector<1x128xf32> to vector<8x128xf32>
    %290 = arith.mulf %286, %289 : vector<8x128xf32>
    %291 = tpu.concatenate %255, %260, %265, %270, %250, %275, %280, %285, %290 in 0 : vector<8x128xf32>, vector<8x128xf32>, vector<8x128xf32>, vector<8x128xf32>, vector<8x128xf32>, vector<8x128xf32>, vector<8x128xf32>, vector<8x128xf32>, vector<8x128xf32> -> vector<72x128xf32>
    %c3_218 = arith.constant 3 : index
    %c0_219 = arith.constant 0 : index
    %c0_220 = arith.constant 0 : index
    %292 = vector.load %arg7[%c3_218, %c0_219, %c0_220] : memref<6x8x72xf32, #tpu.memory_space<vmem>>, vector<1x8x72xf32>
    %293 = vector.shape_cast %292 : vector<1x8x72xf32> to vector<8x72xf32>
    %cst_221 = arith.constant dense<0.000000e+00> : vector<8x128xf32>
    %294 = tpu.matmul %293, %291, %cst_221 {dimension_numbers = #tpu.dot_dimension_numbers<[1], [0], [0], [1], [0, 0, 1, 1], [], []>} : vector<8x72xf32>, vector<72x128xf32>, vector<8x128xf32> -> vector<8x128xf32>
    %c3_222 = arith.constant 3 : index
    %c0_223 = arith.constant 0 : index
    %c0_224 = arith.constant 0 : index
    %295 = vector.load %arg8[%c3_222, %c0_223, %c0_224] : memref<6x8x1xf32, #tpu.memory_space<vmem>>, vector<1x8x1xf32>
    %296 = vector.shape_cast %295 : vector<1x8x1xf32> to vector<8x1xf32>
    %297 = vector.broadcast %296 : vector<8x1xf32> to vector<8x128xf32>
    %298 = arith.addf %294, %297 : vector<8x128xf32>
    %cst_225 = arith.constant 0.000000e+00 : f32
    %299 = vector.broadcast %cst_225 : f32 to vector<8x128xf32>
    %300 = arith.maximumf %298, %299 : vector<8x128xf32>
    %c3_226 = arith.constant 3 : index
    %c0_227 = arith.constant 0 : index
    %c0_228 = arith.constant 0 : index
    %301 = vector.load %arg9[%c3_226, %c0_227, %c0_228] : memref<6x8x8xf32, #tpu.memory_space<vmem>>, vector<1x8x8xf32>
    %302 = vector.shape_cast %301 : vector<1x8x8xf32> to vector<8x8xf32>
    %cst_229 = arith.constant dense<0.000000e+00> : vector<8x128xf32>
    %303 = tpu.matmul %302, %300, %cst_229 {dimension_numbers = #tpu.dot_dimension_numbers<[1], [0], [0], [1], [0, 0, 1, 1], [], []>} : vector<8x8xf32>, vector<8x128xf32>, vector<8x128xf32> -> vector<8x128xf32>
    %304 = arith.addf %231, %303 : vector<8x128xf32>
    %c3_230 = arith.constant 3 : index
    %c0_231 = arith.constant 0 : index
    %c0_232 = arith.constant 0 : index
    %305 = vector.load %arg10[%c3_230, %c0_231, %c0_232] : memref<6x8x1xf32, #tpu.memory_space<vmem>>, vector<1x8x1xf32>
    %306 = vector.shape_cast %305 : vector<1x8x1xf32> to vector<8x1xf32>
    %307 = vector.broadcast %306 : vector<8x1xf32> to vector<8x128xf32>
    %308 = arith.addf %304, %307 : vector<8x128xf32>
    %c4 = arith.constant 4 : index
    %c0_233 = arith.constant 0 : index
    %c0_234 = arith.constant 0 : index
    %309 = vector.load %arg3[%c4, %c0_233, %c0_234] : memref<6x8x1xf32, #tpu.memory_space<vmem>>, vector<1x8x1xf32>
    %310 = vector.shape_cast %309 : vector<1x8x1xf32> to vector<8x1xf32>
    %311 = vector.broadcast %310 : vector<8x1xf32> to vector<8x128xf32>
    %312 = arith.mulf %308, %311 : vector<8x128xf32>
    %c4_235 = arith.constant 4 : index
    %c0_236 = arith.constant 0 : index
    %c0_237 = arith.constant 0 : index
    %313 = vector.load %arg4[%c4_235, %c0_236, %c0_237] : memref<6x8x1xf32, #tpu.memory_space<vmem>>, vector<1x8x1xf32>
    %314 = vector.shape_cast %313 : vector<1x8x1xf32> to vector<8x1xf32>
    %315 = vector.broadcast %314 : vector<8x1xf32> to vector<8x128xf32>
    %316 = arith.addf %312, %315 : vector<8x128xf32>
    %cst_238 = arith.constant 0.000000e+00 : f32
    %317 = vector.broadcast %cst_238 : f32 to vector<8x128xf32>
    %318 = arith.maximumf %316, %317 : vector<8x128xf32>
    %c4_239 = arith.constant 4 : index
    %c0_240 = arith.constant 0 : index
    %c0_241 = arith.constant 0 : index
    %319 = vector.load %arg5[%c4_239, %c0_240, %c0_241] : memref<6x8x8xf32, #tpu.memory_space<vmem>>, vector<1x8x8xf32>
    %320 = vector.shape_cast %319 : vector<1x8x8xf32> to vector<8x8xf32>
    %cst_242 = arith.constant dense<0.000000e+00> : vector<8x128xf32>
    %321 = tpu.matmul %320, %318, %cst_242 {dimension_numbers = #tpu.dot_dimension_numbers<[1], [0], [0], [1], [0, 0, 1, 1], [], []>} : vector<8x8xf32>, vector<8x128xf32>, vector<8x128xf32> -> vector<8x128xf32>
    %c4_243 = arith.constant 4 : index
    %c0_244 = arith.constant 0 : index
    %c0_245 = arith.constant 0 : index
    %322 = vector.load %arg6[%c4_243, %c0_244, %c0_245] : memref<6x8x1xf32, #tpu.memory_space<vmem>>, vector<1x8x1xf32>
    %323 = vector.shape_cast %322 : vector<1x8x1xf32> to vector<8x1xf32>
    %324 = vector.broadcast %323 : vector<8x1xf32> to vector<8x128xf32>
    %325 = arith.addf %321, %324 : vector<8x128xf32>
    %cst_246 = arith.constant 0.000000e+00 : f32
    %326 = vector.broadcast %cst_246 : f32 to vector<8x128xf32>
    %327 = arith.maximumf %325, %326 : vector<8x128xf32>
    %c5_i32_247 = arith.constant 5 : i32
    %328 = tpu.dynamic_rotate %327 by %c5_i32_247 dim 1 : vector<8x128xf32>, i32 -> vector<8x128xf32>
    %c0_248 = arith.constant 0 : index
    %c0_249 = arith.constant 0 : index
    %c0_250 = arith.constant 0 : index
    %329 = vector.load %arg2[%c0_248, %c0_249, %c0_250] : memref<9x1x128xf32, #tpu.memory_space<vmem>>, vector<1x1x128xf32>
    %330 = vector.shape_cast %329 : vector<1x1x128xf32> to vector<1x128xf32>
    %331 = vector.broadcast %330 : vector<1x128xf32> to vector<8x128xf32>
    %332 = arith.mulf %328, %331 : vector<8x128xf32>
    %c4_i32_251 = arith.constant 4 : i32
    %333 = tpu.dynamic_rotate %327 by %c4_i32_251 dim 1 : vector<8x128xf32>, i32 -> vector<8x128xf32>
    %c1_252 = arith.constant 1 : index
    %c0_253 = arith.constant 0 : index
    %c0_254 = arith.constant 0 : index
    %334 = vector.load %arg2[%c1_252, %c0_253, %c0_254] : memref<9x1x128xf32, #tpu.memory_space<vmem>>, vector<1x1x128xf32>
    %335 = vector.shape_cast %334 : vector<1x1x128xf32> to vector<1x128xf32>
    %336 = vector.broadcast %335 : vector<1x128xf32> to vector<8x128xf32>
    %337 = arith.mulf %333, %336 : vector<8x128xf32>
    %c3_i32_255 = arith.constant 3 : i32
    %338 = tpu.dynamic_rotate %327 by %c3_i32_255 dim 1 : vector<8x128xf32>, i32 -> vector<8x128xf32>
    %c2_256 = arith.constant 2 : index
    %c0_257 = arith.constant 0 : index
    %c0_258 = arith.constant 0 : index
    %339 = vector.load %arg2[%c2_256, %c0_257, %c0_258] : memref<9x1x128xf32, #tpu.memory_space<vmem>>, vector<1x1x128xf32>
    %340 = vector.shape_cast %339 : vector<1x1x128xf32> to vector<1x128xf32>
    %341 = vector.broadcast %340 : vector<1x128xf32> to vector<8x128xf32>
    %342 = arith.mulf %338, %341 : vector<8x128xf32>
    %c1_i32_259 = arith.constant 1 : i32
    %343 = tpu.dynamic_rotate %327 by %c1_i32_259 dim 1 : vector<8x128xf32>, i32 -> vector<8x128xf32>
    %c3_260 = arith.constant 3 : index
    %c0_261 = arith.constant 0 : index
    %c0_262 = arith.constant 0 : index
    %344 = vector.load %arg2[%c3_260, %c0_261, %c0_262] : memref<9x1x128xf32, #tpu.memory_space<vmem>>, vector<1x1x128xf32>
    %345 = vector.shape_cast %344 : vector<1x1x128xf32> to vector<1x128xf32>
    %346 = vector.broadcast %345 : vector<1x128xf32> to vector<8x128xf32>
    %347 = arith.mulf %343, %346 : vector<8x128xf32>
    %c127_i32_263 = arith.constant 127 : i32
    %348 = tpu.dynamic_rotate %327 by %c127_i32_263 dim 1 : vector<8x128xf32>, i32 -> vector<8x128xf32>
    %c5_264 = arith.constant 5 : index
    %c0_265 = arith.constant 0 : index
    %c0_266 = arith.constant 0 : index
    %349 = vector.load %arg2[%c5_264, %c0_265, %c0_266] : memref<9x1x128xf32, #tpu.memory_space<vmem>>, vector<1x1x128xf32>
    %350 = vector.shape_cast %349 : vector<1x1x128xf32> to vector<1x128xf32>
    %351 = vector.broadcast %350 : vector<1x128xf32> to vector<8x128xf32>
    %352 = arith.mulf %348, %351 : vector<8x128xf32>
    %c125_i32_267 = arith.constant 125 : i32
    %353 = tpu.dynamic_rotate %327 by %c125_i32_267 dim 1 : vector<8x128xf32>, i32 -> vector<8x128xf32>
    %c6_268 = arith.constant 6 : index
    %c0_269 = arith.constant 0 : index
    %c0_270 = arith.constant 0 : index
    %354 = vector.load %arg2[%c6_268, %c0_269, %c0_270] : memref<9x1x128xf32, #tpu.memory_space<vmem>>, vector<1x1x128xf32>
    %355 = vector.shape_cast %354 : vector<1x1x128xf32> to vector<1x128xf32>
    %356 = vector.broadcast %355 : vector<1x128xf32> to vector<8x128xf32>
    %357 = arith.mulf %353, %356 : vector<8x128xf32>
    %c124_i32_271 = arith.constant 124 : i32
    %358 = tpu.dynamic_rotate %327 by %c124_i32_271 dim 1 : vector<8x128xf32>, i32 -> vector<8x128xf32>
    %c7_272 = arith.constant 7 : index
    %c0_273 = arith.constant 0 : index
    %c0_274 = arith.constant 0 : index
    %359 = vector.load %arg2[%c7_272, %c0_273, %c0_274] : memref<9x1x128xf32, #tpu.memory_space<vmem>>, vector<1x1x128xf32>
    %360 = vector.shape_cast %359 : vector<1x1x128xf32> to vector<1x128xf32>
    %361 = vector.broadcast %360 : vector<1x128xf32> to vector<8x128xf32>
    %362 = arith.mulf %358, %361 : vector<8x128xf32>
    %c123_i32_275 = arith.constant 123 : i32
    %363 = tpu.dynamic_rotate %327 by %c123_i32_275 dim 1 : vector<8x128xf32>, i32 -> vector<8x128xf32>
    %c8_276 = arith.constant 8 : index
    %c0_277 = arith.constant 0 : index
    %c0_278 = arith.constant 0 : index
    %364 = vector.load %arg2[%c8_276, %c0_277, %c0_278] : memref<9x1x128xf32, #tpu.memory_space<vmem>>, vector<1x1x128xf32>
    %365 = vector.shape_cast %364 : vector<1x1x128xf32> to vector<1x128xf32>
    %366 = vector.broadcast %365 : vector<1x128xf32> to vector<8x128xf32>
    %367 = arith.mulf %363, %366 : vector<8x128xf32>
    %368 = tpu.concatenate %332, %337, %342, %347, %327, %352, %357, %362, %367 in 0 : vector<8x128xf32>, vector<8x128xf32>, vector<8x128xf32>, vector<8x128xf32>, vector<8x128xf32>, vector<8x128xf32>, vector<8x128xf32>, vector<8x128xf32>, vector<8x128xf32> -> vector<72x128xf32>
    %c4_279 = arith.constant 4 : index
    %c0_280 = arith.constant 0 : index
    %c0_281 = arith.constant 0 : index
    %369 = vector.load %arg7[%c4_279, %c0_280, %c0_281] : memref<6x8x72xf32, #tpu.memory_space<vmem>>, vector<1x8x72xf32>
    %370 = vector.shape_cast %369 : vector<1x8x72xf32> to vector<8x72xf32>
    %cst_282 = arith.constant dense<0.000000e+00> : vector<8x128xf32>
    %371 = tpu.matmul %370, %368, %cst_282 {dimension_numbers = #tpu.dot_dimension_numbers<[1], [0], [0], [1], [0, 0, 1, 1], [], []>} : vector<8x72xf32>, vector<72x128xf32>, vector<8x128xf32> -> vector<8x128xf32>
    %c4_283 = arith.constant 4 : index
    %c0_284 = arith.constant 0 : index
    %c0_285 = arith.constant 0 : index
    %372 = vector.load %arg8[%c4_283, %c0_284, %c0_285] : memref<6x8x1xf32, #tpu.memory_space<vmem>>, vector<1x8x1xf32>
    %373 = vector.shape_cast %372 : vector<1x8x1xf32> to vector<8x1xf32>
    %374 = vector.broadcast %373 : vector<8x1xf32> to vector<8x128xf32>
    %375 = arith.addf %371, %374 : vector<8x128xf32>
    %cst_286 = arith.constant 0.000000e+00 : f32
    %376 = vector.broadcast %cst_286 : f32 to vector<8x128xf32>
    %377 = arith.maximumf %375, %376 : vector<8x128xf32>
    %c4_287 = arith.constant 4 : index
    %c0_288 = arith.constant 0 : index
    %c0_289 = arith.constant 0 : index
    %378 = vector.load %arg9[%c4_287, %c0_288, %c0_289] : memref<6x8x8xf32, #tpu.memory_space<vmem>>, vector<1x8x8xf32>
    %379 = vector.shape_cast %378 : vector<1x8x8xf32> to vector<8x8xf32>
    %cst_290 = arith.constant dense<0.000000e+00> : vector<8x128xf32>
    %380 = tpu.matmul %379, %377, %cst_290 {dimension_numbers = #tpu.dot_dimension_numbers<[1], [0], [0], [1], [0, 0, 1, 1], [], []>} : vector<8x8xf32>, vector<8x128xf32>, vector<8x128xf32> -> vector<8x128xf32>
    %381 = arith.addf %308, %380 : vector<8x128xf32>
    %c4_291 = arith.constant 4 : index
    %c0_292 = arith.constant 0 : index
    %c0_293 = arith.constant 0 : index
    %382 = vector.load %arg10[%c4_291, %c0_292, %c0_293] : memref<6x8x1xf32, #tpu.memory_space<vmem>>, vector<1x8x1xf32>
    %383 = vector.shape_cast %382 : vector<1x8x1xf32> to vector<8x1xf32>
    %384 = vector.broadcast %383 : vector<8x1xf32> to vector<8x128xf32>
    %385 = arith.addf %381, %384 : vector<8x128xf32>
    %c5_294 = arith.constant 5 : index
    %c0_295 = arith.constant 0 : index
    %c0_296 = arith.constant 0 : index
    %386 = vector.load %arg3[%c5_294, %c0_295, %c0_296] : memref<6x8x1xf32, #tpu.memory_space<vmem>>, vector<1x8x1xf32>
    %387 = vector.shape_cast %386 : vector<1x8x1xf32> to vector<8x1xf32>
    %388 = vector.broadcast %387 : vector<8x1xf32> to vector<8x128xf32>
    %389 = arith.mulf %385, %388 : vector<8x128xf32>
    %c5_297 = arith.constant 5 : index
    %c0_298 = arith.constant 0 : index
    %c0_299 = arith.constant 0 : index
    %390 = vector.load %arg4[%c5_297, %c0_298, %c0_299] : memref<6x8x1xf32, #tpu.memory_space<vmem>>, vector<1x8x1xf32>
    %391 = vector.shape_cast %390 : vector<1x8x1xf32> to vector<8x1xf32>
    %392 = vector.broadcast %391 : vector<8x1xf32> to vector<8x128xf32>
    %393 = arith.addf %389, %392 : vector<8x128xf32>
    %cst_300 = arith.constant 0.000000e+00 : f32
    %394 = vector.broadcast %cst_300 : f32 to vector<8x128xf32>
    %395 = arith.maximumf %393, %394 : vector<8x128xf32>
    %c5_301 = arith.constant 5 : index
    %c0_302 = arith.constant 0 : index
    %c0_303 = arith.constant 0 : index
    %396 = vector.load %arg5[%c5_301, %c0_302, %c0_303] : memref<6x8x8xf32, #tpu.memory_space<vmem>>, vector<1x8x8xf32>
    %397 = vector.shape_cast %396 : vector<1x8x8xf32> to vector<8x8xf32>
    %cst_304 = arith.constant dense<0.000000e+00> : vector<8x128xf32>
    %398 = tpu.matmul %397, %395, %cst_304 {dimension_numbers = #tpu.dot_dimension_numbers<[1], [0], [0], [1], [0, 0, 1, 1], [], []>} : vector<8x8xf32>, vector<8x128xf32>, vector<8x128xf32> -> vector<8x128xf32>
    %c5_305 = arith.constant 5 : index
    %c0_306 = arith.constant 0 : index
    %c0_307 = arith.constant 0 : index
    %399 = vector.load %arg6[%c5_305, %c0_306, %c0_307] : memref<6x8x1xf32, #tpu.memory_space<vmem>>, vector<1x8x1xf32>
    %400 = vector.shape_cast %399 : vector<1x8x1xf32> to vector<8x1xf32>
    %401 = vector.broadcast %400 : vector<8x1xf32> to vector<8x128xf32>
    %402 = arith.addf %398, %401 : vector<8x128xf32>
    %cst_308 = arith.constant 0.000000e+00 : f32
    %403 = vector.broadcast %cst_308 : f32 to vector<8x128xf32>
    %404 = arith.maximumf %402, %403 : vector<8x128xf32>
    %c5_i32_309 = arith.constant 5 : i32
    %405 = tpu.dynamic_rotate %404 by %c5_i32_309 dim 1 : vector<8x128xf32>, i32 -> vector<8x128xf32>
    %c0_310 = arith.constant 0 : index
    %c0_311 = arith.constant 0 : index
    %c0_312 = arith.constant 0 : index
    %406 = vector.load %arg2[%c0_310, %c0_311, %c0_312] : memref<9x1x128xf32, #tpu.memory_space<vmem>>, vector<1x1x128xf32>
    %407 = vector.shape_cast %406 : vector<1x1x128xf32> to vector<1x128xf32>
    %408 = vector.broadcast %407 : vector<1x128xf32> to vector<8x128xf32>
    %409 = arith.mulf %405, %408 : vector<8x128xf32>
    %c4_i32_313 = arith.constant 4 : i32
    %410 = tpu.dynamic_rotate %404 by %c4_i32_313 dim 1 : vector<8x128xf32>, i32 -> vector<8x128xf32>
    %c1_314 = arith.constant 1 : index
    %c0_315 = arith.constant 0 : index
    %c0_316 = arith.constant 0 : index
    %411 = vector.load %arg2[%c1_314, %c0_315, %c0_316] : memref<9x1x128xf32, #tpu.memory_space<vmem>>, vector<1x1x128xf32>
    %412 = vector.shape_cast %411 : vector<1x1x128xf32> to vector<1x128xf32>
    %413 = vector.broadcast %412 : vector<1x128xf32> to vector<8x128xf32>
    %414 = arith.mulf %410, %413 : vector<8x128xf32>
    %c3_i32_317 = arith.constant 3 : i32
    %415 = tpu.dynamic_rotate %404 by %c3_i32_317 dim 1 : vector<8x128xf32>, i32 -> vector<8x128xf32>
    %c2_318 = arith.constant 2 : index
    %c0_319 = arith.constant 0 : index
    %c0_320 = arith.constant 0 : index
    %416 = vector.load %arg2[%c2_318, %c0_319, %c0_320] : memref<9x1x128xf32, #tpu.memory_space<vmem>>, vector<1x1x128xf32>
    %417 = vector.shape_cast %416 : vector<1x1x128xf32> to vector<1x128xf32>
    %418 = vector.broadcast %417 : vector<1x128xf32> to vector<8x128xf32>
    %419 = arith.mulf %415, %418 : vector<8x128xf32>
    %c1_i32_321 = arith.constant 1 : i32
    %420 = tpu.dynamic_rotate %404 by %c1_i32_321 dim 1 : vector<8x128xf32>, i32 -> vector<8x128xf32>
    %c3_322 = arith.constant 3 : index
    %c0_323 = arith.constant 0 : index
    %c0_324 = arith.constant 0 : index
    %421 = vector.load %arg2[%c3_322, %c0_323, %c0_324] : memref<9x1x128xf32, #tpu.memory_space<vmem>>, vector<1x1x128xf32>
    %422 = vector.shape_cast %421 : vector<1x1x128xf32> to vector<1x128xf32>
    %423 = vector.broadcast %422 : vector<1x128xf32> to vector<8x128xf32>
    %424 = arith.mulf %420, %423 : vector<8x128xf32>
    %c127_i32_325 = arith.constant 127 : i32
    %425 = tpu.dynamic_rotate %404 by %c127_i32_325 dim 1 : vector<8x128xf32>, i32 -> vector<8x128xf32>
    %c5_326 = arith.constant 5 : index
    %c0_327 = arith.constant 0 : index
    %c0_328 = arith.constant 0 : index
    %426 = vector.load %arg2[%c5_326, %c0_327, %c0_328] : memref<9x1x128xf32, #tpu.memory_space<vmem>>, vector<1x1x128xf32>
    %427 = vector.shape_cast %426 : vector<1x1x128xf32> to vector<1x128xf32>
    %428 = vector.broadcast %427 : vector<1x128xf32> to vector<8x128xf32>
    %429 = arith.mulf %425, %428 : vector<8x128xf32>
    %c125_i32_329 = arith.constant 125 : i32
    %430 = tpu.dynamic_rotate %404 by %c125_i32_329 dim 1 : vector<8x128xf32>, i32 -> vector<8x128xf32>
    %c6_330 = arith.constant 6 : index
    %c0_331 = arith.constant 0 : index
    %c0_332 = arith.constant 0 : index
    %431 = vector.load %arg2[%c6_330, %c0_331, %c0_332] : memref<9x1x128xf32, #tpu.memory_space<vmem>>, vector<1x1x128xf32>
    %432 = vector.shape_cast %431 : vector<1x1x128xf32> to vector<1x128xf32>
    %433 = vector.broadcast %432 : vector<1x128xf32> to vector<8x128xf32>
    %434 = arith.mulf %430, %433 : vector<8x128xf32>
    %c124_i32_333 = arith.constant 124 : i32
    %435 = tpu.dynamic_rotate %404 by %c124_i32_333 dim 1 : vector<8x128xf32>, i32 -> vector<8x128xf32>
    %c7_334 = arith.constant 7 : index
    %c0_335 = arith.constant 0 : index
    %c0_336 = arith.constant 0 : index
    %436 = vector.load %arg2[%c7_334, %c0_335, %c0_336] : memref<9x1x128xf32, #tpu.memory_space<vmem>>, vector<1x1x128xf32>
    %437 = vector.shape_cast %436 : vector<1x1x128xf32> to vector<1x128xf32>
    %438 = vector.broadcast %437 : vector<1x128xf32> to vector<8x128xf32>
    %439 = arith.mulf %435, %438 : vector<8x128xf32>
    %c123_i32_337 = arith.constant 123 : i32
    %440 = tpu.dynamic_rotate %404 by %c123_i32_337 dim 1 : vector<8x128xf32>, i32 -> vector<8x128xf32>
    %c8_338 = arith.constant 8 : index
    %c0_339 = arith.constant 0 : index
    %c0_340 = arith.constant 0 : index
    %441 = vector.load %arg2[%c8_338, %c0_339, %c0_340] : memref<9x1x128xf32, #tpu.memory_space<vmem>>, vector<1x1x128xf32>
    %442 = vector.shape_cast %441 : vector<1x1x128xf32> to vector<1x128xf32>
    %443 = vector.broadcast %442 : vector<1x128xf32> to vector<8x128xf32>
    %444 = arith.mulf %440, %443 : vector<8x128xf32>
    %445 = tpu.concatenate %409, %414, %419, %424, %404, %429, %434, %439, %444 in 0 : vector<8x128xf32>, vector<8x128xf32>, vector<8x128xf32>, vector<8x128xf32>, vector<8x128xf32>, vector<8x128xf32>, vector<8x128xf32>, vector<8x128xf32>, vector<8x128xf32> -> vector<72x128xf32>
    %c5_341 = arith.constant 5 : index
    %c0_342 = arith.constant 0 : index
    %c0_343 = arith.constant 0 : index
    %446 = vector.load %arg7[%c5_341, %c0_342, %c0_343] : memref<6x8x72xf32, #tpu.memory_space<vmem>>, vector<1x8x72xf32>
    %447 = vector.shape_cast %446 : vector<1x8x72xf32> to vector<8x72xf32>
    %cst_344 = arith.constant dense<0.000000e+00> : vector<8x128xf32>
    %448 = tpu.matmul %447, %445, %cst_344 {dimension_numbers = #tpu.dot_dimension_numbers<[1], [0], [0], [1], [0, 0, 1, 1], [], []>} : vector<8x72xf32>, vector<72x128xf32>, vector<8x128xf32> -> vector<8x128xf32>
    %c5_345 = arith.constant 5 : index
    %c0_346 = arith.constant 0 : index
    %c0_347 = arith.constant 0 : index
    %449 = vector.load %arg8[%c5_345, %c0_346, %c0_347] : memref<6x8x1xf32, #tpu.memory_space<vmem>>, vector<1x8x1xf32>
    %450 = vector.shape_cast %449 : vector<1x8x1xf32> to vector<8x1xf32>
    %451 = vector.broadcast %450 : vector<8x1xf32> to vector<8x128xf32>
    %452 = arith.addf %448, %451 : vector<8x128xf32>
    %cst_348 = arith.constant 0.000000e+00 : f32
    %453 = vector.broadcast %cst_348 : f32 to vector<8x128xf32>
    %454 = arith.maximumf %452, %453 : vector<8x128xf32>
    %c5_349 = arith.constant 5 : index
    %c0_350 = arith.constant 0 : index
    %c0_351 = arith.constant 0 : index
    %455 = vector.load %arg9[%c5_349, %c0_350, %c0_351] : memref<6x8x8xf32, #tpu.memory_space<vmem>>, vector<1x8x8xf32>
    %456 = vector.shape_cast %455 : vector<1x8x8xf32> to vector<8x8xf32>
    %cst_352 = arith.constant dense<0.000000e+00> : vector<8x128xf32>
    %457 = tpu.matmul %456, %454, %cst_352 {dimension_numbers = #tpu.dot_dimension_numbers<[1], [0], [0], [1], [0, 0, 1, 1], [], []>} : vector<8x8xf32>, vector<8x128xf32>, vector<8x128xf32> -> vector<8x128xf32>
    %458 = arith.addf %385, %457 : vector<8x128xf32>
    %c5_353 = arith.constant 5 : index
    %c0_354 = arith.constant 0 : index
    %c0_355 = arith.constant 0 : index
    %459 = vector.load %arg10[%c5_353, %c0_354, %c0_355] : memref<6x8x1xf32, #tpu.memory_space<vmem>>, vector<1x8x1xf32>
    %460 = vector.shape_cast %459 : vector<1x8x1xf32> to vector<8x1xf32>
    %461 = vector.broadcast %460 : vector<8x1xf32> to vector<8x128xf32>
    %462 = arith.addf %458, %461 : vector<8x128xf32>
    %c0_356 = arith.constant 0 : index
    %c0_357 = arith.constant 0 : index
    %463 = vector.load %arg11[%c0_356, %c0_357] : memref<8x128xf32, #tpu.memory_space<vmem>>, vector<8x128xf32>
    tpu.vector_store %arg11[%c0_356, %c0_357], %462 {strides = array<i32>} : memref<8x128xf32, #tpu.memory_space<vmem>>, vector<8x128xf32>,
    return
  }
  func.func @transform_0(%arg0: i32) -> (i32, i32) {
    %c0_i32 = arith.constant 0 : i32
    %c0_i32_0 = arith.constant 0 : i32
    return %c0_i32, %arg0 : i32, i32
  }
  func.func @transform_1(%arg0: i32) -> (i32, i32, i32) {
    %c0_i32 = arith.constant 0 : i32
    %c0_i32_0 = arith.constant 0 : i32
    %c0_i32_1 = arith.constant 0 : i32
    %c0_i32_2 = arith.constant 0 : i32
    return %c0_i32, %c0_i32_0, %c0_i32_1 : i32, i32, i32
  }
  func.func @transform_2(%arg0: i32) -> (i32, i32, i32) {
    %c0_i32 = arith.constant 0 : i32
    %c0_i32_0 = arith.constant 0 : i32
    %c0_i32_1 = arith.constant 0 : i32
    %c0_i32_2 = arith.constant 0 : i32
    return %c0_i32, %c0_i32_0, %c0_i32_1 : i32, i32, i32
  }
  func.func @transform_3(%arg0: i32) -> (i32, i32, i32) {
    %c0_i32 = arith.constant 0 : i32
    %c0_i32_0 = arith.constant 0 : i32
    %c0_i32_1 = arith.constant 0 : i32
    %c0_i32_2 = arith.constant 0 : i32
    return %c0_i32, %c0_i32_0, %c0_i32_1 : i32, i32, i32
  }
  func.func @transform_4(%arg0: i32) -> (i32, i32, i32) {
    %c0_i32 = arith.constant 0 : i32
    %c0_i32_0 = arith.constant 0 : i32
    %c0_i32_1 = arith.constant 0 : i32
    %c0_i32_2 = arith.constant 0 : i32
    return %c0_i32, %c0_i32_0, %c0_i32_1 : i32, i32, i32
  }
  func.func @transform_5(%arg0: i32) -> (i32, i32, i32) {
    %c0_i32 = arith.constant 0 : i32
    %c0_i32_0 = arith.constant 0 : i32
    %c0_i32_1 = arith.constant 0 : i32
    %c0_i32_2 = arith.constant 0 : i32
    return %c0_i32, %c0_i32_0, %c0_i32_1 : i32, i32, i32
  }
  func.func @transform_6(%arg0: i32) -> (i32, i32, i32) {
    %c0_i32 = arith.constant 0 : i32
    %c0_i32_0 = arith.constant 0 : i32
    %c0_i32_1 = arith.constant 0 : i32
    %c0_i32_2 = arith.constant 0 : i32
    return %c0_i32, %c0_i32_0, %c0_i32_1 : i32, i32, i32
  }
  func.func @transform_7(%arg0: i32) -> (i32, i32, i32) {
    %c0_i32 = arith.constant 0 : i32
    %c0_i32_0 = arith.constant 0 : i32
    %c0_i32_1 = arith.constant 0 : i32
    %c0_i32_2 = arith.constant 0 : i32
    return %c0_i32, %c0_i32_0, %c0_i32_1 : i32, i32, i32
  }
  func.func @transform_8(%arg0: i32) -> (i32, i32, i32) {
    %c0_i32 = arith.constant 0 : i32
    %c0_i32_0 = arith.constant 0 : i32
    %c0_i32_1 = arith.constant 0 : i32
    %c0_i32_2 = arith.constant 0 : i32
    return %c0_i32, %c0_i32_0, %c0_i32_1 : i32, i32, i32
  }
  func.func @transform_9(%arg0: i32) -> (i32, i32, i32) {
    %c0_i32 = arith.constant 0 : i32
    %c0_i32_0 = arith.constant 0 : i32
    %c0_i32_1 = arith.constant 0 : i32
    %c0_i32_2 = arith.constant 0 : i32
    return %c0_i32, %c0_i32_0, %c0_i32_1 : i32, i32, i32
  }
  func.func @transform_10(%arg0: i32) -> (i32, i32) {
    %c0_i32 = arith.constant 0 : i32
    %c0_i32_0 = arith.constant 0 : i32
    return %c0_i32, %arg0 : i32, i32
  }
}

module attributes {stable_mosaic.version = 11 : i64} {
  func.func @residual_chain_kernel(%arg0: i32, %arg1: memref<8x128xf32, #tpu.memory_space<vmem>>, %arg2: memref<9x1x128xf32, #tpu.memory_space<vmem>>, %arg3: memref<2x8x1xf32, #tpu.memory_space<vmem>>, %arg4: memref<2x8x1xf32, #tpu.memory_space<vmem>>, %arg5: memref<2x8x8xf32, #tpu.memory_space<vmem>>, %arg6: memref<2x8x1xf32, #tpu.memory_space<vmem>>, %arg7: memref<2x8x72xf32, #tpu.memory_space<vmem>>, %arg8: memref<2x8x1xf32, #tpu.memory_space<vmem>>, %arg9: memref<2x8x8xf32, #tpu.memory_space<vmem>>, %arg10: memref<2x8x1xf32, #tpu.memory_space<vmem>>, %arg11: memref<8x128xf32, #tpu.memory_space<vmem>>) attributes {dimension_semantics = [#tpu.dimension_semantics<parallel>], iteration_bounds = array<i64: 1>, scalar_prefetch = 0 : i64, scratch_operands = 0 : i64, tpu.core_type = #tpu.core_type<tc>, window_params = [{transform_indices = @transform_0, window_bounds = array<i64: 8, 128>}, {pipeline_mode = #tpu.pipeline_mode<synchronous>, transform_indices = @transform_1, window_bounds = array<i64: 9, 1, 128>}, {pipeline_mode = #tpu.pipeline_mode<synchronous>, transform_indices = @transform_2, window_bounds = array<i64: 2, 8, 1>}, {pipeline_mode = #tpu.pipeline_mode<synchronous>, transform_indices = @transform_3, window_bounds = array<i64: 2, 8, 1>}, {pipeline_mode = #tpu.pipeline_mode<synchronous>, transform_indices = @transform_4, window_bounds = array<i64: 2, 8, 8>}, {pipeline_mode = #tpu.pipeline_mode<synchronous>, transform_indices = @transform_5, window_bounds = array<i64: 2, 8, 1>}, {pipeline_mode = #tpu.pipeline_mode<synchronous>, transform_indices = @transform_6, window_bounds = array<i64: 2, 8, 72>}, {pipeline_mode = #tpu.pipeline_mode<synchronous>, transform_indices = @transform_7, window_bounds = array<i64: 2, 8, 1>}, {pipeline_mode = #tpu.pipeline_mode<synchronous>, transform_indices = @transform_8, window_bounds = array<i64: 2, 8, 8>}, {pipeline_mode = #tpu.pipeline_mode<synchronous>, transform_indices = @transform_9, window_bounds = array<i64: 2, 8, 1>}, {transform_indices = @transform_10, window_bounds = array<i64: 8, 128>}]} {
    %c0 = arith.constant 0 : index
    %c0_0 = arith.constant 0 : index
    %0 = vector.load %arg1[%c0, %c0_0] : memref<8x128xf32, #tpu.memory_space<vmem>>, vector<8x128xf32>
    %c0_1 = arith.constant 0 : index
    %c0_2 = arith.constant 0 : index
    %c0_3 = arith.constant 0 : index
    %1 = vector.load %arg3[%c0_1, %c0_2, %c0_3] : memref<2x8x1xf32, #tpu.memory_space<vmem>>, vector<1x8x1xf32>
    %2 = vector.shape_cast %1 : vector<1x8x1xf32> to vector<8x1xf32>
    %3 = vector.broadcast %2 : vector<8x1xf32> to vector<8x128xf32>
    %4 = arith.mulf %0, %3 : vector<8x128xf32>
    %c0_4 = arith.constant 0 : index
    %c0_5 = arith.constant 0 : index
    %c0_6 = arith.constant 0 : index
    %5 = vector.load %arg4[%c0_4, %c0_5, %c0_6] : memref<2x8x1xf32, #tpu.memory_space<vmem>>, vector<1x8x1xf32>
    %6 = vector.shape_cast %5 : vector<1x8x1xf32> to vector<8x1xf32>
    %7 = vector.broadcast %6 : vector<8x1xf32> to vector<8x128xf32>
    %8 = arith.addf %4, %7 : vector<8x128xf32>
    %cst = arith.constant 0.000000e+00 : f32
    %9 = vector.broadcast %cst : f32 to vector<8x128xf32>
    %10 = arith.maximumf %8, %9 : vector<8x128xf32>
    %c0_7 = arith.constant 0 : index
    %c0_8 = arith.constant 0 : index
    %c0_9 = arith.constant 0 : index
    %11 = vector.load %arg5[%c0_7, %c0_8, %c0_9] : memref<2x8x8xf32, #tpu.memory_space<vmem>>, vector<1x8x8xf32>
    %12 = vector.shape_cast %11 : vector<1x8x8xf32> to vector<8x8xf32>
    %cst_10 = arith.constant dense<0.000000e+00> : vector<8x128xf32>
    %13 = tpu.matmul %12, %10, %cst_10 {dimension_numbers = #tpu.dot_dimension_numbers<[1], [0], [0], [1], [0, 0, 1, 1], [], []>} : vector<8x8xf32>, vector<8x128xf32>, vector<8x128xf32> -> vector<8x128xf32>
    %c0_11 = arith.constant 0 : index
    %c0_12 = arith.constant 0 : index
    %c0_13 = arith.constant 0 : index
    %14 = vector.load %arg6[%c0_11, %c0_12, %c0_13] : memref<2x8x1xf32, #tpu.memory_space<vmem>>, vector<1x8x1xf32>
    %15 = vector.shape_cast %14 : vector<1x8x1xf32> to vector<8x1xf32>
    %16 = vector.broadcast %15 : vector<8x1xf32> to vector<8x128xf32>
    %17 = arith.addf %13, %16 : vector<8x128xf32>
    %cst_14 = arith.constant 0.000000e+00 : f32
    %18 = vector.broadcast %cst_14 : f32 to vector<8x128xf32>
    %19 = arith.maximumf %17, %18 : vector<8x128xf32>
    %c9_i32 = arith.constant 9 : i32
    %20 = tpu.dynamic_rotate %19 by %c9_i32 dim 1 : vector<8x128xf32>, i32 -> vector<8x128xf32>
    %c0_15 = arith.constant 0 : index
    %c0_16 = arith.constant 0 : index
    %c0_17 = arith.constant 0 : index
    %21 = vector.load %arg2[%c0_15, %c0_16, %c0_17] : memref<9x1x128xf32, #tpu.memory_space<vmem>>, vector<1x1x128xf32>
    %22 = vector.shape_cast %21 : vector<1x1x128xf32> to vector<1x128xf32>
    %23 = vector.broadcast %22 : vector<1x128xf32> to vector<8x128xf32>
    %24 = arith.mulf %20, %23 : vector<8x128xf32>
    %c8_i32 = arith.constant 8 : i32
    %25 = tpu.dynamic_rotate %19 by %c8_i32 dim 1 : vector<8x128xf32>, i32 -> vector<8x128xf32>
    %c1 = arith.constant 1 : index
    %c0_18 = arith.constant 0 : index
    %c0_19 = arith.constant 0 : index
    %26 = vector.load %arg2[%c1, %c0_18, %c0_19] : memref<9x1x128xf32, #tpu.memory_space<vmem>>, vector<1x1x128xf32>
    %27 = vector.shape_cast %26 : vector<1x1x128xf32> to vector<1x128xf32>
    %28 = vector.broadcast %27 : vector<1x128xf32> to vector<8x128xf32>
    %29 = arith.mulf %25, %28 : vector<8x128xf32>
    %c7_i32 = arith.constant 7 : i32
    %30 = tpu.dynamic_rotate %19 by %c7_i32 dim 1 : vector<8x128xf32>, i32 -> vector<8x128xf32>
    %c2 = arith.constant 2 : index
    %c0_20 = arith.constant 0 : index
    %c0_21 = arith.constant 0 : index
    %31 = vector.load %arg2[%c2, %c0_20, %c0_21] : memref<9x1x128xf32, #tpu.memory_space<vmem>>, vector<1x1x128xf32>
    %32 = vector.shape_cast %31 : vector<1x1x128xf32> to vector<1x128xf32>
    %33 = vector.broadcast %32 : vector<1x128xf32> to vector<8x128xf32>
    %34 = arith.mulf %30, %33 : vector<8x128xf32>
    %c1_i32 = arith.constant 1 : i32
    %35 = tpu.dynamic_rotate %19 by %c1_i32 dim 1 : vector<8x128xf32>, i32 -> vector<8x128xf32>
    %c3 = arith.constant 3 : index
    %c0_22 = arith.constant 0 : index
    %c0_23 = arith.constant 0 : index
    %36 = vector.load %arg2[%c3, %c0_22, %c0_23] : memref<9x1x128xf32, #tpu.memory_space<vmem>>, vector<1x1x128xf32>
    %37 = vector.shape_cast %36 : vector<1x1x128xf32> to vector<1x128xf32>
    %38 = vector.broadcast %37 : vector<1x128xf32> to vector<8x128xf32>
    %39 = arith.mulf %35, %38 : vector<8x128xf32>
    %c127_i32 = arith.constant 127 : i32
    %40 = tpu.dynamic_rotate %19 by %c127_i32 dim 1 : vector<8x128xf32>, i32 -> vector<8x128xf32>
    %c5 = arith.constant 5 : index
    %c0_24 = arith.constant 0 : index
    %c0_25 = arith.constant 0 : index
    %41 = vector.load %arg2[%c5, %c0_24, %c0_25] : memref<9x1x128xf32, #tpu.memory_space<vmem>>, vector<1x1x128xf32>
    %42 = vector.shape_cast %41 : vector<1x1x128xf32> to vector<1x128xf32>
    %43 = vector.broadcast %42 : vector<1x128xf32> to vector<8x128xf32>
    %44 = arith.mulf %40, %43 : vector<8x128xf32>
    %c121_i32 = arith.constant 121 : i32
    %45 = tpu.dynamic_rotate %19 by %c121_i32 dim 1 : vector<8x128xf32>, i32 -> vector<8x128xf32>
    %c6 = arith.constant 6 : index
    %c0_26 = arith.constant 0 : index
    %c0_27 = arith.constant 0 : index
    %46 = vector.load %arg2[%c6, %c0_26, %c0_27] : memref<9x1x128xf32, #tpu.memory_space<vmem>>, vector<1x1x128xf32>
    %47 = vector.shape_cast %46 : vector<1x1x128xf32> to vector<1x128xf32>
    %48 = vector.broadcast %47 : vector<1x128xf32> to vector<8x128xf32>
    %49 = arith.mulf %45, %48 : vector<8x128xf32>
    %c120_i32 = arith.constant 120 : i32
    %50 = tpu.dynamic_rotate %19 by %c120_i32 dim 1 : vector<8x128xf32>, i32 -> vector<8x128xf32>
    %c7 = arith.constant 7 : index
    %c0_28 = arith.constant 0 : index
    %c0_29 = arith.constant 0 : index
    %51 = vector.load %arg2[%c7, %c0_28, %c0_29] : memref<9x1x128xf32, #tpu.memory_space<vmem>>, vector<1x1x128xf32>
    %52 = vector.shape_cast %51 : vector<1x1x128xf32> to vector<1x128xf32>
    %53 = vector.broadcast %52 : vector<1x128xf32> to vector<8x128xf32>
    %54 = arith.mulf %50, %53 : vector<8x128xf32>
    %c119_i32 = arith.constant 119 : i32
    %55 = tpu.dynamic_rotate %19 by %c119_i32 dim 1 : vector<8x128xf32>, i32 -> vector<8x128xf32>
    %c8 = arith.constant 8 : index
    %c0_30 = arith.constant 0 : index
    %c0_31 = arith.constant 0 : index
    %56 = vector.load %arg2[%c8, %c0_30, %c0_31] : memref<9x1x128xf32, #tpu.memory_space<vmem>>, vector<1x1x128xf32>
    %57 = vector.shape_cast %56 : vector<1x1x128xf32> to vector<1x128xf32>
    %58 = vector.broadcast %57 : vector<1x128xf32> to vector<8x128xf32>
    %59 = arith.mulf %55, %58 : vector<8x128xf32>
    %60 = tpu.concatenate %24, %29, %34, %39, %19, %44, %49, %54, %59 in 0 : vector<8x128xf32>, vector<8x128xf32>, vector<8x128xf32>, vector<8x128xf32>, vector<8x128xf32>, vector<8x128xf32>, vector<8x128xf32>, vector<8x128xf32>, vector<8x128xf32> -> vector<72x128xf32>
    %c0_32 = arith.constant 0 : index
    %c0_33 = arith.constant 0 : index
    %c0_34 = arith.constant 0 : index
    %61 = vector.load %arg7[%c0_32, %c0_33, %c0_34] : memref<2x8x72xf32, #tpu.memory_space<vmem>>, vector<1x8x72xf32>
    %62 = vector.shape_cast %61 : vector<1x8x72xf32> to vector<8x72xf32>
    %cst_35 = arith.constant dense<0.000000e+00> : vector<8x128xf32>
    %63 = tpu.matmul %62, %60, %cst_35 {dimension_numbers = #tpu.dot_dimension_numbers<[1], [0], [0], [1], [0, 0, 1, 1], [], []>} : vector<8x72xf32>, vector<72x128xf32>, vector<8x128xf32> -> vector<8x128xf32>
    %c0_36 = arith.constant 0 : index
    %c0_37 = arith.constant 0 : index
    %c0_38 = arith.constant 0 : index
    %64 = vector.load %arg8[%c0_36, %c0_37, %c0_38] : memref<2x8x1xf32, #tpu.memory_space<vmem>>, vector<1x8x1xf32>
    %65 = vector.shape_cast %64 : vector<1x8x1xf32> to vector<8x1xf32>
    %66 = vector.broadcast %65 : vector<8x1xf32> to vector<8x128xf32>
    %67 = arith.addf %63, %66 : vector<8x128xf32>
    %cst_39 = arith.constant 0.000000e+00 : f32
    %68 = vector.broadcast %cst_39 : f32 to vector<8x128xf32>
    %69 = arith.maximumf %67, %68 : vector<8x128xf32>
    %c0_40 = arith.constant 0 : index
    %c0_41 = arith.constant 0 : index
    %c0_42 = arith.constant 0 : index
    %70 = vector.load %arg9[%c0_40, %c0_41, %c0_42] : memref<2x8x8xf32, #tpu.memory_space<vmem>>, vector<1x8x8xf32>
    %71 = vector.shape_cast %70 : vector<1x8x8xf32> to vector<8x8xf32>
    %cst_43 = arith.constant dense<0.000000e+00> : vector<8x128xf32>
    %72 = tpu.matmul %71, %69, %cst_43 {dimension_numbers = #tpu.dot_dimension_numbers<[1], [0], [0], [1], [0, 0, 1, 1], [], []>} : vector<8x8xf32>, vector<8x128xf32>, vector<8x128xf32> -> vector<8x128xf32>
    %73 = arith.addf %0, %72 : vector<8x128xf32>
    %c0_44 = arith.constant 0 : index
    %c0_45 = arith.constant 0 : index
    %c0_46 = arith.constant 0 : index
    %74 = vector.load %arg10[%c0_44, %c0_45, %c0_46] : memref<2x8x1xf32, #tpu.memory_space<vmem>>, vector<1x8x1xf32>
    %75 = vector.shape_cast %74 : vector<1x8x1xf32> to vector<8x1xf32>
    %76 = vector.broadcast %75 : vector<8x1xf32> to vector<8x128xf32>
    %77 = arith.addf %73, %76 : vector<8x128xf32>
    %c1_47 = arith.constant 1 : index
    %c0_48 = arith.constant 0 : index
    %c0_49 = arith.constant 0 : index
    %78 = vector.load %arg3[%c1_47, %c0_48, %c0_49] : memref<2x8x1xf32, #tpu.memory_space<vmem>>, vector<1x8x1xf32>
    %79 = vector.shape_cast %78 : vector<1x8x1xf32> to vector<8x1xf32>
    %80 = vector.broadcast %79 : vector<8x1xf32> to vector<8x128xf32>
    %81 = arith.mulf %77, %80 : vector<8x128xf32>
    %c1_50 = arith.constant 1 : index
    %c0_51 = arith.constant 0 : index
    %c0_52 = arith.constant 0 : index
    %82 = vector.load %arg4[%c1_50, %c0_51, %c0_52] : memref<2x8x1xf32, #tpu.memory_space<vmem>>, vector<1x8x1xf32>
    %83 = vector.shape_cast %82 : vector<1x8x1xf32> to vector<8x1xf32>
    %84 = vector.broadcast %83 : vector<8x1xf32> to vector<8x128xf32>
    %85 = arith.addf %81, %84 : vector<8x128xf32>
    %cst_53 = arith.constant 0.000000e+00 : f32
    %86 = vector.broadcast %cst_53 : f32 to vector<8x128xf32>
    %87 = arith.maximumf %85, %86 : vector<8x128xf32>
    %c1_54 = arith.constant 1 : index
    %c0_55 = arith.constant 0 : index
    %c0_56 = arith.constant 0 : index
    %88 = vector.load %arg5[%c1_54, %c0_55, %c0_56] : memref<2x8x8xf32, #tpu.memory_space<vmem>>, vector<1x8x8xf32>
    %89 = vector.shape_cast %88 : vector<1x8x8xf32> to vector<8x8xf32>
    %cst_57 = arith.constant dense<0.000000e+00> : vector<8x128xf32>
    %90 = tpu.matmul %89, %87, %cst_57 {dimension_numbers = #tpu.dot_dimension_numbers<[1], [0], [0], [1], [0, 0, 1, 1], [], []>} : vector<8x8xf32>, vector<8x128xf32>, vector<8x128xf32> -> vector<8x128xf32>
    %c1_58 = arith.constant 1 : index
    %c0_59 = arith.constant 0 : index
    %c0_60 = arith.constant 0 : index
    %91 = vector.load %arg6[%c1_58, %c0_59, %c0_60] : memref<2x8x1xf32, #tpu.memory_space<vmem>>, vector<1x8x1xf32>
    %92 = vector.shape_cast %91 : vector<1x8x1xf32> to vector<8x1xf32>
    %93 = vector.broadcast %92 : vector<8x1xf32> to vector<8x128xf32>
    %94 = arith.addf %90, %93 : vector<8x128xf32>
    %cst_61 = arith.constant 0.000000e+00 : f32
    %95 = vector.broadcast %cst_61 : f32 to vector<8x128xf32>
    %96 = arith.maximumf %94, %95 : vector<8x128xf32>
    %c9_i32_62 = arith.constant 9 : i32
    %97 = tpu.dynamic_rotate %96 by %c9_i32_62 dim 1 : vector<8x128xf32>, i32 -> vector<8x128xf32>
    %c0_63 = arith.constant 0 : index
    %c0_64 = arith.constant 0 : index
    %c0_65 = arith.constant 0 : index
    %98 = vector.load %arg2[%c0_63, %c0_64, %c0_65] : memref<9x1x128xf32, #tpu.memory_space<vmem>>, vector<1x1x128xf32>
    %99 = vector.shape_cast %98 : vector<1x1x128xf32> to vector<1x128xf32>
    %100 = vector.broadcast %99 : vector<1x128xf32> to vector<8x128xf32>
    %101 = arith.mulf %97, %100 : vector<8x128xf32>
    %c8_i32_66 = arith.constant 8 : i32
    %102 = tpu.dynamic_rotate %96 by %c8_i32_66 dim 1 : vector<8x128xf32>, i32 -> vector<8x128xf32>
    %c1_67 = arith.constant 1 : index
    %c0_68 = arith.constant 0 : index
    %c0_69 = arith.constant 0 : index
    %103 = vector.load %arg2[%c1_67, %c0_68, %c0_69] : memref<9x1x128xf32, #tpu.memory_space<vmem>>, vector<1x1x128xf32>
    %104 = vector.shape_cast %103 : vector<1x1x128xf32> to vector<1x128xf32>
    %105 = vector.broadcast %104 : vector<1x128xf32> to vector<8x128xf32>
    %106 = arith.mulf %102, %105 : vector<8x128xf32>
    %c7_i32_70 = arith.constant 7 : i32
    %107 = tpu.dynamic_rotate %96 by %c7_i32_70 dim 1 : vector<8x128xf32>, i32 -> vector<8x128xf32>
    %c2_71 = arith.constant 2 : index
    %c0_72 = arith.constant 0 : index
    %c0_73 = arith.constant 0 : index
    %108 = vector.load %arg2[%c2_71, %c0_72, %c0_73] : memref<9x1x128xf32, #tpu.memory_space<vmem>>, vector<1x1x128xf32>
    %109 = vector.shape_cast %108 : vector<1x1x128xf32> to vector<1x128xf32>
    %110 = vector.broadcast %109 : vector<1x128xf32> to vector<8x128xf32>
    %111 = arith.mulf %107, %110 : vector<8x128xf32>
    %c1_i32_74 = arith.constant 1 : i32
    %112 = tpu.dynamic_rotate %96 by %c1_i32_74 dim 1 : vector<8x128xf32>, i32 -> vector<8x128xf32>
    %c3_75 = arith.constant 3 : index
    %c0_76 = arith.constant 0 : index
    %c0_77 = arith.constant 0 : index
    %113 = vector.load %arg2[%c3_75, %c0_76, %c0_77] : memref<9x1x128xf32, #tpu.memory_space<vmem>>, vector<1x1x128xf32>
    %114 = vector.shape_cast %113 : vector<1x1x128xf32> to vector<1x128xf32>
    %115 = vector.broadcast %114 : vector<1x128xf32> to vector<8x128xf32>
    %116 = arith.mulf %112, %115 : vector<8x128xf32>
    %c127_i32_78 = arith.constant 127 : i32
    %117 = tpu.dynamic_rotate %96 by %c127_i32_78 dim 1 : vector<8x128xf32>, i32 -> vector<8x128xf32>
    %c5_79 = arith.constant 5 : index
    %c0_80 = arith.constant 0 : index
    %c0_81 = arith.constant 0 : index
    %118 = vector.load %arg2[%c5_79, %c0_80, %c0_81] : memref<9x1x128xf32, #tpu.memory_space<vmem>>, vector<1x1x128xf32>
    %119 = vector.shape_cast %118 : vector<1x1x128xf32> to vector<1x128xf32>
    %120 = vector.broadcast %119 : vector<1x128xf32> to vector<8x128xf32>
    %121 = arith.mulf %117, %120 : vector<8x128xf32>
    %c121_i32_82 = arith.constant 121 : i32
    %122 = tpu.dynamic_rotate %96 by %c121_i32_82 dim 1 : vector<8x128xf32>, i32 -> vector<8x128xf32>
    %c6_83 = arith.constant 6 : index
    %c0_84 = arith.constant 0 : index
    %c0_85 = arith.constant 0 : index
    %123 = vector.load %arg2[%c6_83, %c0_84, %c0_85] : memref<9x1x128xf32, #tpu.memory_space<vmem>>, vector<1x1x128xf32>
    %124 = vector.shape_cast %123 : vector<1x1x128xf32> to vector<1x128xf32>
    %125 = vector.broadcast %124 : vector<1x128xf32> to vector<8x128xf32>
    %126 = arith.mulf %122, %125 : vector<8x128xf32>
    %c120_i32_86 = arith.constant 120 : i32
    %127 = tpu.dynamic_rotate %96 by %c120_i32_86 dim 1 : vector<8x128xf32>, i32 -> vector<8x128xf32>
    %c7_87 = arith.constant 7 : index
    %c0_88 = arith.constant 0 : index
    %c0_89 = arith.constant 0 : index
    %128 = vector.load %arg2[%c7_87, %c0_88, %c0_89] : memref<9x1x128xf32, #tpu.memory_space<vmem>>, vector<1x1x128xf32>
    %129 = vector.shape_cast %128 : vector<1x1x128xf32> to vector<1x128xf32>
    %130 = vector.broadcast %129 : vector<1x128xf32> to vector<8x128xf32>
    %131 = arith.mulf %127, %130 : vector<8x128xf32>
    %c119_i32_90 = arith.constant 119 : i32
    %132 = tpu.dynamic_rotate %96 by %c119_i32_90 dim 1 : vector<8x128xf32>, i32 -> vector<8x128xf32>
    %c8_91 = arith.constant 8 : index
    %c0_92 = arith.constant 0 : index
    %c0_93 = arith.constant 0 : index
    %133 = vector.load %arg2[%c8_91, %c0_92, %c0_93] : memref<9x1x128xf32, #tpu.memory_space<vmem>>, vector<1x1x128xf32>
    %134 = vector.shape_cast %133 : vector<1x1x128xf32> to vector<1x128xf32>
    %135 = vector.broadcast %134 : vector<1x128xf32> to vector<8x128xf32>
    %136 = arith.mulf %132, %135 : vector<8x128xf32>
    %137 = tpu.concatenate %101, %106, %111, %116, %96, %121, %126, %131, %136 in 0 : vector<8x128xf32>, vector<8x128xf32>, vector<8x128xf32>, vector<8x128xf32>, vector<8x128xf32>, vector<8x128xf32>, vector<8x128xf32>, vector<8x128xf32>, vector<8x128xf32> -> vector<72x128xf32>
    %c1_94 = arith.constant 1 : index
    %c0_95 = arith.constant 0 : index
    %c0_96 = arith.constant 0 : index
    %138 = vector.load %arg7[%c1_94, %c0_95, %c0_96] : memref<2x8x72xf32, #tpu.memory_space<vmem>>, vector<1x8x72xf32>
    %139 = vector.shape_cast %138 : vector<1x8x72xf32> to vector<8x72xf32>
    %cst_97 = arith.constant dense<0.000000e+00> : vector<8x128xf32>
    %140 = tpu.matmul %139, %137, %cst_97 {dimension_numbers = #tpu.dot_dimension_numbers<[1], [0], [0], [1], [0, 0, 1, 1], [], []>} : vector<8x72xf32>, vector<72x128xf32>, vector<8x128xf32> -> vector<8x128xf32>
    %c1_98 = arith.constant 1 : index
    %c0_99 = arith.constant 0 : index
    %c0_100 = arith.constant 0 : index
    %141 = vector.load %arg8[%c1_98, %c0_99, %c0_100] : memref<2x8x1xf32, #tpu.memory_space<vmem>>, vector<1x8x1xf32>
    %142 = vector.shape_cast %141 : vector<1x8x1xf32> to vector<8x1xf32>
    %143 = vector.broadcast %142 : vector<8x1xf32> to vector<8x128xf32>
    %144 = arith.addf %140, %143 : vector<8x128xf32>
    %cst_101 = arith.constant 0.000000e+00 : f32
    %145 = vector.broadcast %cst_101 : f32 to vector<8x128xf32>
    %146 = arith.maximumf %144, %145 : vector<8x128xf32>
    %c1_102 = arith.constant 1 : index
    %c0_103 = arith.constant 0 : index
    %c0_104 = arith.constant 0 : index
    %147 = vector.load %arg9[%c1_102, %c0_103, %c0_104] : memref<2x8x8xf32, #tpu.memory_space<vmem>>, vector<1x8x8xf32>
    %148 = vector.shape_cast %147 : vector<1x8x8xf32> to vector<8x8xf32>
    %cst_105 = arith.constant dense<0.000000e+00> : vector<8x128xf32>
    %149 = tpu.matmul %148, %146, %cst_105 {dimension_numbers = #tpu.dot_dimension_numbers<[1], [0], [0], [1], [0, 0, 1, 1], [], []>} : vector<8x8xf32>, vector<8x128xf32>, vector<8x128xf32> -> vector<8x128xf32>
    %150 = arith.addf %77, %149 : vector<8x128xf32>
    %c1_106 = arith.constant 1 : index
    %c0_107 = arith.constant 0 : index
    %c0_108 = arith.constant 0 : index
    %151 = vector.load %arg10[%c1_106, %c0_107, %c0_108] : memref<2x8x1xf32, #tpu.memory_space<vmem>>, vector<1x8x1xf32>
    %152 = vector.shape_cast %151 : vector<1x8x1xf32> to vector<8x1xf32>
    %153 = vector.broadcast %152 : vector<8x1xf32> to vector<8x128xf32>
    %154 = arith.addf %150, %153 : vector<8x128xf32>
    %c0_109 = arith.constant 0 : index
    %c0_110 = arith.constant 0 : index
    %155 = vector.load %arg11[%c0_109, %c0_110] : memref<8x128xf32, #tpu.memory_space<vmem>>, vector<8x128xf32>
    tpu.vector_store %arg11[%c0_109, %c0_110], %154 {strides = array<i32>} : memref<8x128xf32, #tpu.memory_space<vmem>>, vector<8x128xf32>,
    return
  }
  func.func @transform_0(%arg0: i32) -> (i32, i32) {
    %c0_i32 = arith.constant 0 : i32
    %c0_i32_0 = arith.constant 0 : i32
    return %c0_i32, %arg0 : i32, i32
  }
  func.func @transform_1(%arg0: i32) -> (i32, i32, i32) {
    %c0_i32 = arith.constant 0 : i32
    %c0_i32_0 = arith.constant 0 : i32
    %c0_i32_1 = arith.constant 0 : i32
    %c0_i32_2 = arith.constant 0 : i32
    return %c0_i32, %c0_i32_0, %c0_i32_1 : i32, i32, i32
  }
  func.func @transform_2(%arg0: i32) -> (i32, i32, i32) {
    %c0_i32 = arith.constant 0 : i32
    %c0_i32_0 = arith.constant 0 : i32
    %c0_i32_1 = arith.constant 0 : i32
    %c0_i32_2 = arith.constant 0 : i32
    return %c0_i32, %c0_i32_0, %c0_i32_1 : i32, i32, i32
  }
  func.func @transform_3(%arg0: i32) -> (i32, i32, i32) {
    %c0_i32 = arith.constant 0 : i32
    %c0_i32_0 = arith.constant 0 : i32
    %c0_i32_1 = arith.constant 0 : i32
    %c0_i32_2 = arith.constant 0 : i32
    return %c0_i32, %c0_i32_0, %c0_i32_1 : i32, i32, i32
  }
  func.func @transform_4(%arg0: i32) -> (i32, i32, i32) {
    %c0_i32 = arith.constant 0 : i32
    %c0_i32_0 = arith.constant 0 : i32
    %c0_i32_1 = arith.constant 0 : i32
    %c0_i32_2 = arith.constant 0 : i32
    return %c0_i32, %c0_i32_0, %c0_i32_1 : i32, i32, i32
  }
  func.func @transform_5(%arg0: i32) -> (i32, i32, i32) {
    %c0_i32 = arith.constant 0 : i32
    %c0_i32_0 = arith.constant 0 : i32
    %c0_i32_1 = arith.constant 0 : i32
    %c0_i32_2 = arith.constant 0 : i32
    return %c0_i32, %c0_i32_0, %c0_i32_1 : i32, i32, i32
  }
  func.func @transform_6(%arg0: i32) -> (i32, i32, i32) {
    %c0_i32 = arith.constant 0 : i32
    %c0_i32_0 = arith.constant 0 : i32
    %c0_i32_1 = arith.constant 0 : i32
    %c0_i32_2 = arith.constant 0 : i32
    return %c0_i32, %c0_i32_0, %c0_i32_1 : i32, i32, i32
  }
  func.func @transform_7(%arg0: i32) -> (i32, i32, i32) {
    %c0_i32 = arith.constant 0 : i32
    %c0_i32_0 = arith.constant 0 : i32
    %c0_i32_1 = arith.constant 0 : i32
    %c0_i32_2 = arith.constant 0 : i32
    return %c0_i32, %c0_i32_0, %c0_i32_1 : i32, i32, i32
  }
  func.func @transform_8(%arg0: i32) -> (i32, i32, i32) {
    %c0_i32 = arith.constant 0 : i32
    %c0_i32_0 = arith.constant 0 : i32
    %c0_i32_1 = arith.constant 0 : i32
    %c0_i32_2 = arith.constant 0 : i32
    return %c0_i32, %c0_i32_0, %c0_i32_1 : i32, i32, i32
  }
  func.func @transform_9(%arg0: i32) -> (i32, i32, i32) {
    %c0_i32 = arith.constant 0 : i32
    %c0_i32_0 = arith.constant 0 : i32
    %c0_i32_1 = arith.constant 0 : i32
    %c0_i32_2 = arith.constant 0 : i32
    return %c0_i32, %c0_i32_0, %c0_i32_1 : i32, i32, i32
  }
  func.func @transform_10(%arg0: i32) -> (i32, i32) {
    %c0_i32 = arith.constant 0 : i32
    %c0_i32_0 = arith.constant 0 : i32
    return %c0_i32, %arg0 : i32, i32
  }
}

module attributes {stable_mosaic.version = 11 : i64} {
  func.func @residual_chain_kernel(%arg0: i32, %arg1: memref<8x256xf32, #tpu.memory_space<vmem>>, %arg2: memref<9x1x256xf32, #tpu.memory_space<vmem>>, %arg3: memref<2x8x1xf32, #tpu.memory_space<vmem>>, %arg4: memref<2x8x1xf32, #tpu.memory_space<vmem>>, %arg5: memref<2x8x8xf32, #tpu.memory_space<vmem>>, %arg6: memref<2x8x1xf32, #tpu.memory_space<vmem>>, %arg7: memref<2x8x72xf32, #tpu.memory_space<vmem>>, %arg8: memref<2x8x1xf32, #tpu.memory_space<vmem>>, %arg9: memref<2x8x8xf32, #tpu.memory_space<vmem>>, %arg10: memref<2x8x1xf32, #tpu.memory_space<vmem>>, %arg11: memref<8x256xf32, #tpu.memory_space<vmem>>) attributes {dimension_semantics = [#tpu.dimension_semantics<parallel>], iteration_bounds = array<i64: 2>, scalar_prefetch = 0 : i64, scratch_operands = 0 : i64, tpu.core_type = #tpu.core_type<tc>, window_params = [{transform_indices = @transform_0, window_bounds = array<i64: 8, 256>}, {pipeline_mode = #tpu.pipeline_mode<synchronous>, transform_indices = @transform_1, window_bounds = array<i64: 9, 1, 256>}, {pipeline_mode = #tpu.pipeline_mode<synchronous>, transform_indices = @transform_2, window_bounds = array<i64: 2, 8, 1>}, {pipeline_mode = #tpu.pipeline_mode<synchronous>, transform_indices = @transform_3, window_bounds = array<i64: 2, 8, 1>}, {pipeline_mode = #tpu.pipeline_mode<synchronous>, transform_indices = @transform_4, window_bounds = array<i64: 2, 8, 8>}, {pipeline_mode = #tpu.pipeline_mode<synchronous>, transform_indices = @transform_5, window_bounds = array<i64: 2, 8, 1>}, {pipeline_mode = #tpu.pipeline_mode<synchronous>, transform_indices = @transform_6, window_bounds = array<i64: 2, 8, 72>}, {pipeline_mode = #tpu.pipeline_mode<synchronous>, transform_indices = @transform_7, window_bounds = array<i64: 2, 8, 1>}, {pipeline_mode = #tpu.pipeline_mode<synchronous>, transform_indices = @transform_8, window_bounds = array<i64: 2, 8, 8>}, {pipeline_mode = #tpu.pipeline_mode<synchronous>, transform_indices = @transform_9, window_bounds = array<i64: 2, 8, 1>}, {transform_indices = @transform_10, window_bounds = array<i64: 8, 256>}]} {
    %c0 = arith.constant 0 : index
    %c0_0 = arith.constant 0 : index
    %0 = vector.load %arg1[%c0, %c0_0] : memref<8x256xf32, #tpu.memory_space<vmem>>, vector<8x256xf32>
    %c0_1 = arith.constant 0 : index
    %c0_2 = arith.constant 0 : index
    %c0_3 = arith.constant 0 : index
    %1 = vector.load %arg3[%c0_1, %c0_2, %c0_3] : memref<2x8x1xf32, #tpu.memory_space<vmem>>, vector<1x8x1xf32>
    %2 = vector.shape_cast %1 : vector<1x8x1xf32> to vector<8x1xf32>
    %3 = vector.broadcast %2 : vector<8x1xf32> to vector<8x256xf32>
    %4 = arith.mulf %0, %3 : vector<8x256xf32>
    %c0_4 = arith.constant 0 : index
    %c0_5 = arith.constant 0 : index
    %c0_6 = arith.constant 0 : index
    %5 = vector.load %arg4[%c0_4, %c0_5, %c0_6] : memref<2x8x1xf32, #tpu.memory_space<vmem>>, vector<1x8x1xf32>
    %6 = vector.shape_cast %5 : vector<1x8x1xf32> to vector<8x1xf32>
    %7 = vector.broadcast %6 : vector<8x1xf32> to vector<8x256xf32>
    %8 = arith.addf %4, %7 : vector<8x256xf32>
    %cst = arith.constant 0.000000e+00 : f32
    %9 = vector.broadcast %cst : f32 to vector<8x256xf32>
    %10 = arith.maximumf %8, %9 : vector<8x256xf32>
    %c0_7 = arith.constant 0 : index
    %c0_8 = arith.constant 0 : index
    %c0_9 = arith.constant 0 : index
    %11 = vector.load %arg5[%c0_7, %c0_8, %c0_9] : memref<2x8x8xf32, #tpu.memory_space<vmem>>, vector<1x8x8xf32>
    %12 = vector.shape_cast %11 : vector<1x8x8xf32> to vector<8x8xf32>
    %cst_10 = arith.constant dense<0.000000e+00> : vector<8x256xf32>
    %13 = tpu.matmul %12, %10, %cst_10 {dimension_numbers = #tpu.dot_dimension_numbers<[1], [0], [0], [1], [0, 0, 1, 1], [], []>} : vector<8x8xf32>, vector<8x256xf32>, vector<8x256xf32> -> vector<8x256xf32>
    %c0_11 = arith.constant 0 : index
    %c0_12 = arith.constant 0 : index
    %c0_13 = arith.constant 0 : index
    %14 = vector.load %arg6[%c0_11, %c0_12, %c0_13] : memref<2x8x1xf32, #tpu.memory_space<vmem>>, vector<1x8x1xf32>
    %15 = vector.shape_cast %14 : vector<1x8x1xf32> to vector<8x1xf32>
    %16 = vector.broadcast %15 : vector<8x1xf32> to vector<8x256xf32>
    %17 = arith.addf %13, %16 : vector<8x256xf32>
    %cst_14 = arith.constant 0.000000e+00 : f32
    %18 = vector.broadcast %cst_14 : f32 to vector<8x256xf32>
    %19 = arith.maximumf %17, %18 : vector<8x256xf32>
    %c17_i32 = arith.constant 17 : i32
    %20 = tpu.dynamic_rotate %19 by %c17_i32 dim 1 : vector<8x256xf32>, i32 -> vector<8x256xf32>
    %c0_15 = arith.constant 0 : index
    %c0_16 = arith.constant 0 : index
    %c0_17 = arith.constant 0 : index
    %21 = vector.load %arg2[%c0_15, %c0_16, %c0_17] : memref<9x1x256xf32, #tpu.memory_space<vmem>>, vector<1x1x256xf32>
    %22 = vector.shape_cast %21 : vector<1x1x256xf32> to vector<1x256xf32>
    %23 = vector.broadcast %22 : vector<1x256xf32> to vector<8x256xf32>
    %24 = arith.mulf %20, %23 : vector<8x256xf32>
    %c16_i32 = arith.constant 16 : i32
    %25 = tpu.dynamic_rotate %19 by %c16_i32 dim 1 : vector<8x256xf32>, i32 -> vector<8x256xf32>
    %c1 = arith.constant 1 : index
    %c0_18 = arith.constant 0 : index
    %c0_19 = arith.constant 0 : index
    %26 = vector.load %arg2[%c1, %c0_18, %c0_19] : memref<9x1x256xf32, #tpu.memory_space<vmem>>, vector<1x1x256xf32>
    %27 = vector.shape_cast %26 : vector<1x1x256xf32> to vector<1x256xf32>
    %28 = vector.broadcast %27 : vector<1x256xf32> to vector<8x256xf32>
    %29 = arith.mulf %25, %28 : vector<8x256xf32>
    %c15_i32 = arith.constant 15 : i32
    %30 = tpu.dynamic_rotate %19 by %c15_i32 dim 1 : vector<8x256xf32>, i32 -> vector<8x256xf32>
    %c2 = arith.constant 2 : index
    %c0_20 = arith.constant 0 : index
    %c0_21 = arith.constant 0 : index
    %31 = vector.load %arg2[%c2, %c0_20, %c0_21] : memref<9x1x256xf32, #tpu.memory_space<vmem>>, vector<1x1x256xf32>
    %32 = vector.shape_cast %31 : vector<1x1x256xf32> to vector<1x256xf32>
    %33 = vector.broadcast %32 : vector<1x256xf32> to vector<8x256xf32>
    %34 = arith.mulf %30, %33 : vector<8x256xf32>
    %c1_i32 = arith.constant 1 : i32
    %35 = tpu.dynamic_rotate %19 by %c1_i32 dim 1 : vector<8x256xf32>, i32 -> vector<8x256xf32>
    %c3 = arith.constant 3 : index
    %c0_22 = arith.constant 0 : index
    %c0_23 = arith.constant 0 : index
    %36 = vector.load %arg2[%c3, %c0_22, %c0_23] : memref<9x1x256xf32, #tpu.memory_space<vmem>>, vector<1x1x256xf32>
    %37 = vector.shape_cast %36 : vector<1x1x256xf32> to vector<1x256xf32>
    %38 = vector.broadcast %37 : vector<1x256xf32> to vector<8x256xf32>
    %39 = arith.mulf %35, %38 : vector<8x256xf32>
    %c255_i32 = arith.constant 255 : i32
    %40 = tpu.dynamic_rotate %19 by %c255_i32 dim 1 : vector<8x256xf32>, i32 -> vector<8x256xf32>
    %c5 = arith.constant 5 : index
    %c0_24 = arith.constant 0 : index
    %c0_25 = arith.constant 0 : index
    %41 = vector.load %arg2[%c5, %c0_24, %c0_25] : memref<9x1x256xf32, #tpu.memory_space<vmem>>, vector<1x1x256xf32>
    %42 = vector.shape_cast %41 : vector<1x1x256xf32> to vector<1x256xf32>
    %43 = vector.broadcast %42 : vector<1x256xf32> to vector<8x256xf32>
    %44 = arith.mulf %40, %43 : vector<8x256xf32>
    %c241_i32 = arith.constant 241 : i32
    %45 = tpu.dynamic_rotate %19 by %c241_i32 dim 1 : vector<8x256xf32>, i32 -> vector<8x256xf32>
    %c6 = arith.constant 6 : index
    %c0_26 = arith.constant 0 : index
    %c0_27 = arith.constant 0 : index
    %46 = vector.load %arg2[%c6, %c0_26, %c0_27] : memref<9x1x256xf32, #tpu.memory_space<vmem>>, vector<1x1x256xf32>
    %47 = vector.shape_cast %46 : vector<1x1x256xf32> to vector<1x256xf32>
    %48 = vector.broadcast %47 : vector<1x256xf32> to vector<8x256xf32>
    %49 = arith.mulf %45, %48 : vector<8x256xf32>
    %c240_i32 = arith.constant 240 : i32
    %50 = tpu.dynamic_rotate %19 by %c240_i32 dim 1 : vector<8x256xf32>, i32 -> vector<8x256xf32>
    %c7 = arith.constant 7 : index
    %c0_28 = arith.constant 0 : index
    %c0_29 = arith.constant 0 : index
    %51 = vector.load %arg2[%c7, %c0_28, %c0_29] : memref<9x1x256xf32, #tpu.memory_space<vmem>>, vector<1x1x256xf32>
    %52 = vector.shape_cast %51 : vector<1x1x256xf32> to vector<1x256xf32>
    %53 = vector.broadcast %52 : vector<1x256xf32> to vector<8x256xf32>
    %54 = arith.mulf %50, %53 : vector<8x256xf32>
    %c239_i32 = arith.constant 239 : i32
    %55 = tpu.dynamic_rotate %19 by %c239_i32 dim 1 : vector<8x256xf32>, i32 -> vector<8x256xf32>
    %c8 = arith.constant 8 : index
    %c0_30 = arith.constant 0 : index
    %c0_31 = arith.constant 0 : index
    %56 = vector.load %arg2[%c8, %c0_30, %c0_31] : memref<9x1x256xf32, #tpu.memory_space<vmem>>, vector<1x1x256xf32>
    %57 = vector.shape_cast %56 : vector<1x1x256xf32> to vector<1x256xf32>
    %58 = vector.broadcast %57 : vector<1x256xf32> to vector<8x256xf32>
    %59 = arith.mulf %55, %58 : vector<8x256xf32>
    %60 = tpu.concatenate %24, %29, %34, %39, %19, %44, %49, %54, %59 in 0 : vector<8x256xf32>, vector<8x256xf32>, vector<8x256xf32>, vector<8x256xf32>, vector<8x256xf32>, vector<8x256xf32>, vector<8x256xf32>, vector<8x256xf32>, vector<8x256xf32> -> vector<72x256xf32>
    %c0_32 = arith.constant 0 : index
    %c0_33 = arith.constant 0 : index
    %c0_34 = arith.constant 0 : index
    %61 = vector.load %arg7[%c0_32, %c0_33, %c0_34] : memref<2x8x72xf32, #tpu.memory_space<vmem>>, vector<1x8x72xf32>
    %62 = vector.shape_cast %61 : vector<1x8x72xf32> to vector<8x72xf32>
    %cst_35 = arith.constant dense<0.000000e+00> : vector<8x256xf32>
    %63 = tpu.matmul %62, %60, %cst_35 {dimension_numbers = #tpu.dot_dimension_numbers<[1], [0], [0], [1], [0, 0, 1, 1], [], []>} : vector<8x72xf32>, vector<72x256xf32>, vector<8x256xf32> -> vector<8x256xf32>
    %c0_36 = arith.constant 0 : index
    %c0_37 = arith.constant 0 : index
    %c0_38 = arith.constant 0 : index
    %64 = vector.load %arg8[%c0_36, %c0_37, %c0_38] : memref<2x8x1xf32, #tpu.memory_space<vmem>>, vector<1x8x1xf32>
    %65 = vector.shape_cast %64 : vector<1x8x1xf32> to vector<8x1xf32>
    %66 = vector.broadcast %65 : vector<8x1xf32> to vector<8x256xf32>
    %67 = arith.addf %63, %66 : vector<8x256xf32>
    %cst_39 = arith.constant 0.000000e+00 : f32
    %68 = vector.broadcast %cst_39 : f32 to vector<8x256xf32>
    %69 = arith.maximumf %67, %68 : vector<8x256xf32>
    %c0_40 = arith.constant 0 : index
    %c0_41 = arith.constant 0 : index
    %c0_42 = arith.constant 0 : index
    %70 = vector.load %arg9[%c0_40, %c0_41, %c0_42] : memref<2x8x8xf32, #tpu.memory_space<vmem>>, vector<1x8x8xf32>
    %71 = vector.shape_cast %70 : vector<1x8x8xf32> to vector<8x8xf32>
    %cst_43 = arith.constant dense<0.000000e+00> : vector<8x256xf32>
    %72 = tpu.matmul %71, %69, %cst_43 {dimension_numbers = #tpu.dot_dimension_numbers<[1], [0], [0], [1], [0, 0, 1, 1], [], []>} : vector<8x8xf32>, vector<8x256xf32>, vector<8x256xf32> -> vector<8x256xf32>
    %73 = arith.addf %0, %72 : vector<8x256xf32>
    %c0_44 = arith.constant 0 : index
    %c0_45 = arith.constant 0 : index
    %c0_46 = arith.constant 0 : index
    %74 = vector.load %arg10[%c0_44, %c0_45, %c0_46] : memref<2x8x1xf32, #tpu.memory_space<vmem>>, vector<1x8x1xf32>
    %75 = vector.shape_cast %74 : vector<1x8x1xf32> to vector<8x1xf32>
    %76 = vector.broadcast %75 : vector<8x1xf32> to vector<8x256xf32>
    %77 = arith.addf %73, %76 : vector<8x256xf32>
    %c1_47 = arith.constant 1 : index
    %c0_48 = arith.constant 0 : index
    %c0_49 = arith.constant 0 : index
    %78 = vector.load %arg3[%c1_47, %c0_48, %c0_49] : memref<2x8x1xf32, #tpu.memory_space<vmem>>, vector<1x8x1xf32>
    %79 = vector.shape_cast %78 : vector<1x8x1xf32> to vector<8x1xf32>
    %80 = vector.broadcast %79 : vector<8x1xf32> to vector<8x256xf32>
    %81 = arith.mulf %77, %80 : vector<8x256xf32>
    %c1_50 = arith.constant 1 : index
    %c0_51 = arith.constant 0 : index
    %c0_52 = arith.constant 0 : index
    %82 = vector.load %arg4[%c1_50, %c0_51, %c0_52] : memref<2x8x1xf32, #tpu.memory_space<vmem>>, vector<1x8x1xf32>
    %83 = vector.shape_cast %82 : vector<1x8x1xf32> to vector<8x1xf32>
    %84 = vector.broadcast %83 : vector<8x1xf32> to vector<8x256xf32>
    %85 = arith.addf %81, %84 : vector<8x256xf32>
    %cst_53 = arith.constant 0.000000e+00 : f32
    %86 = vector.broadcast %cst_53 : f32 to vector<8x256xf32>
    %87 = arith.maximumf %85, %86 : vector<8x256xf32>
    %c1_54 = arith.constant 1 : index
    %c0_55 = arith.constant 0 : index
    %c0_56 = arith.constant 0 : index
    %88 = vector.load %arg5[%c1_54, %c0_55, %c0_56] : memref<2x8x8xf32, #tpu.memory_space<vmem>>, vector<1x8x8xf32>
    %89 = vector.shape_cast %88 : vector<1x8x8xf32> to vector<8x8xf32>
    %cst_57 = arith.constant dense<0.000000e+00> : vector<8x256xf32>
    %90 = tpu.matmul %89, %87, %cst_57 {dimension_numbers = #tpu.dot_dimension_numbers<[1], [0], [0], [1], [0, 0, 1, 1], [], []>} : vector<8x8xf32>, vector<8x256xf32>, vector<8x256xf32> -> vector<8x256xf32>
    %c1_58 = arith.constant 1 : index
    %c0_59 = arith.constant 0 : index
    %c0_60 = arith.constant 0 : index
    %91 = vector.load %arg6[%c1_58, %c0_59, %c0_60] : memref<2x8x1xf32, #tpu.memory_space<vmem>>, vector<1x8x1xf32>
    %92 = vector.shape_cast %91 : vector<1x8x1xf32> to vector<8x1xf32>
    %93 = vector.broadcast %92 : vector<8x1xf32> to vector<8x256xf32>
    %94 = arith.addf %90, %93 : vector<8x256xf32>
    %cst_61 = arith.constant 0.000000e+00 : f32
    %95 = vector.broadcast %cst_61 : f32 to vector<8x256xf32>
    %96 = arith.maximumf %94, %95 : vector<8x256xf32>
    %c17_i32_62 = arith.constant 17 : i32
    %97 = tpu.dynamic_rotate %96 by %c17_i32_62 dim 1 : vector<8x256xf32>, i32 -> vector<8x256xf32>
    %c0_63 = arith.constant 0 : index
    %c0_64 = arith.constant 0 : index
    %c0_65 = arith.constant 0 : index
    %98 = vector.load %arg2[%c0_63, %c0_64, %c0_65] : memref<9x1x256xf32, #tpu.memory_space<vmem>>, vector<1x1x256xf32>
    %99 = vector.shape_cast %98 : vector<1x1x256xf32> to vector<1x256xf32>
    %100 = vector.broadcast %99 : vector<1x256xf32> to vector<8x256xf32>
    %101 = arith.mulf %97, %100 : vector<8x256xf32>
    %c16_i32_66 = arith.constant 16 : i32
    %102 = tpu.dynamic_rotate %96 by %c16_i32_66 dim 1 : vector<8x256xf32>, i32 -> vector<8x256xf32>
    %c1_67 = arith.constant 1 : index
    %c0_68 = arith.constant 0 : index
    %c0_69 = arith.constant 0 : index
    %103 = vector.load %arg2[%c1_67, %c0_68, %c0_69] : memref<9x1x256xf32, #tpu.memory_space<vmem>>, vector<1x1x256xf32>
    %104 = vector.shape_cast %103 : vector<1x1x256xf32> to vector<1x256xf32>
    %105 = vector.broadcast %104 : vector<1x256xf32> to vector<8x256xf32>
    %106 = arith.mulf %102, %105 : vector<8x256xf32>
    %c15_i32_70 = arith.constant 15 : i32
    %107 = tpu.dynamic_rotate %96 by %c15_i32_70 dim 1 : vector<8x256xf32>, i32 -> vector<8x256xf32>
    %c2_71 = arith.constant 2 : index
    %c0_72 = arith.constant 0 : index
    %c0_73 = arith.constant 0 : index
    %108 = vector.load %arg2[%c2_71, %c0_72, %c0_73] : memref<9x1x256xf32, #tpu.memory_space<vmem>>, vector<1x1x256xf32>
    %109 = vector.shape_cast %108 : vector<1x1x256xf32> to vector<1x256xf32>
    %110 = vector.broadcast %109 : vector<1x256xf32> to vector<8x256xf32>
    %111 = arith.mulf %107, %110 : vector<8x256xf32>
    %c1_i32_74 = arith.constant 1 : i32
    %112 = tpu.dynamic_rotate %96 by %c1_i32_74 dim 1 : vector<8x256xf32>, i32 -> vector<8x256xf32>
    %c3_75 = arith.constant 3 : index
    %c0_76 = arith.constant 0 : index
    %c0_77 = arith.constant 0 : index
    %113 = vector.load %arg2[%c3_75, %c0_76, %c0_77] : memref<9x1x256xf32, #tpu.memory_space<vmem>>, vector<1x1x256xf32>
    %114 = vector.shape_cast %113 : vector<1x1x256xf32> to vector<1x256xf32>
    %115 = vector.broadcast %114 : vector<1x256xf32> to vector<8x256xf32>
    %116 = arith.mulf %112, %115 : vector<8x256xf32>
    %c255_i32_78 = arith.constant 255 : i32
    %117 = tpu.dynamic_rotate %96 by %c255_i32_78 dim 1 : vector<8x256xf32>, i32 -> vector<8x256xf32>
    %c5_79 = arith.constant 5 : index
    %c0_80 = arith.constant 0 : index
    %c0_81 = arith.constant 0 : index
    %118 = vector.load %arg2[%c5_79, %c0_80, %c0_81] : memref<9x1x256xf32, #tpu.memory_space<vmem>>, vector<1x1x256xf32>
    %119 = vector.shape_cast %118 : vector<1x1x256xf32> to vector<1x256xf32>
    %120 = vector.broadcast %119 : vector<1x256xf32> to vector<8x256xf32>
    %121 = arith.mulf %117, %120 : vector<8x256xf32>
    %c241_i32_82 = arith.constant 241 : i32
    %122 = tpu.dynamic_rotate %96 by %c241_i32_82 dim 1 : vector<8x256xf32>, i32 -> vector<8x256xf32>
    %c6_83 = arith.constant 6 : index
    %c0_84 = arith.constant 0 : index
    %c0_85 = arith.constant 0 : index
    %123 = vector.load %arg2[%c6_83, %c0_84, %c0_85] : memref<9x1x256xf32, #tpu.memory_space<vmem>>, vector<1x1x256xf32>
    %124 = vector.shape_cast %123 : vector<1x1x256xf32> to vector<1x256xf32>
    %125 = vector.broadcast %124 : vector<1x256xf32> to vector<8x256xf32>
    %126 = arith.mulf %122, %125 : vector<8x256xf32>
    %c240_i32_86 = arith.constant 240 : i32
    %127 = tpu.dynamic_rotate %96 by %c240_i32_86 dim 1 : vector<8x256xf32>, i32 -> vector<8x256xf32>
    %c7_87 = arith.constant 7 : index
    %c0_88 = arith.constant 0 : index
    %c0_89 = arith.constant 0 : index
    %128 = vector.load %arg2[%c7_87, %c0_88, %c0_89] : memref<9x1x256xf32, #tpu.memory_space<vmem>>, vector<1x1x256xf32>
    %129 = vector.shape_cast %128 : vector<1x1x256xf32> to vector<1x256xf32>
    %130 = vector.broadcast %129 : vector<1x256xf32> to vector<8x256xf32>
    %131 = arith.mulf %127, %130 : vector<8x256xf32>
    %c239_i32_90 = arith.constant 239 : i32
    %132 = tpu.dynamic_rotate %96 by %c239_i32_90 dim 1 : vector<8x256xf32>, i32 -> vector<8x256xf32>
    %c8_91 = arith.constant 8 : index
    %c0_92 = arith.constant 0 : index
    %c0_93 = arith.constant 0 : index
    %133 = vector.load %arg2[%c8_91, %c0_92, %c0_93] : memref<9x1x256xf32, #tpu.memory_space<vmem>>, vector<1x1x256xf32>
    %134 = vector.shape_cast %133 : vector<1x1x256xf32> to vector<1x256xf32>
    %135 = vector.broadcast %134 : vector<1x256xf32> to vector<8x256xf32>
    %136 = arith.mulf %132, %135 : vector<8x256xf32>
    %137 = tpu.concatenate %101, %106, %111, %116, %96, %121, %126, %131, %136 in 0 : vector<8x256xf32>, vector<8x256xf32>, vector<8x256xf32>, vector<8x256xf32>, vector<8x256xf32>, vector<8x256xf32>, vector<8x256xf32>, vector<8x256xf32>, vector<8x256xf32> -> vector<72x256xf32>
    %c1_94 = arith.constant 1 : index
    %c0_95 = arith.constant 0 : index
    %c0_96 = arith.constant 0 : index
    %138 = vector.load %arg7[%c1_94, %c0_95, %c0_96] : memref<2x8x72xf32, #tpu.memory_space<vmem>>, vector<1x8x72xf32>
    %139 = vector.shape_cast %138 : vector<1x8x72xf32> to vector<8x72xf32>
    %cst_97 = arith.constant dense<0.000000e+00> : vector<8x256xf32>
    %140 = tpu.matmul %139, %137, %cst_97 {dimension_numbers = #tpu.dot_dimension_numbers<[1], [0], [0], [1], [0, 0, 1, 1], [], []>} : vector<8x72xf32>, vector<72x256xf32>, vector<8x256xf32> -> vector<8x256xf32>
    %c1_98 = arith.constant 1 : index
    %c0_99 = arith.constant 0 : index
    %c0_100 = arith.constant 0 : index
    %141 = vector.load %arg8[%c1_98, %c0_99, %c0_100] : memref<2x8x1xf32, #tpu.memory_space<vmem>>, vector<1x8x1xf32>
    %142 = vector.shape_cast %141 : vector<1x8x1xf32> to vector<8x1xf32>
    %143 = vector.broadcast %142 : vector<8x1xf32> to vector<8x256xf32>
    %144 = arith.addf %140, %143 : vector<8x256xf32>
    %cst_101 = arith.constant 0.000000e+00 : f32
    %145 = vector.broadcast %cst_101 : f32 to vector<8x256xf32>
    %146 = arith.maximumf %144, %145 : vector<8x256xf32>
    %c1_102 = arith.constant 1 : index
    %c0_103 = arith.constant 0 : index
    %c0_104 = arith.constant 0 : index
    %147 = vector.load %arg9[%c1_102, %c0_103, %c0_104] : memref<2x8x8xf32, #tpu.memory_space<vmem>>, vector<1x8x8xf32>
    %148 = vector.shape_cast %147 : vector<1x8x8xf32> to vector<8x8xf32>
    %cst_105 = arith.constant dense<0.000000e+00> : vector<8x256xf32>
    %149 = tpu.matmul %148, %146, %cst_105 {dimension_numbers = #tpu.dot_dimension_numbers<[1], [0], [0], [1], [0, 0, 1, 1], [], []>} : vector<8x8xf32>, vector<8x256xf32>, vector<8x256xf32> -> vector<8x256xf32>
    %150 = arith.addf %77, %149 : vector<8x256xf32>
    %c1_106 = arith.constant 1 : index
    %c0_107 = arith.constant 0 : index
    %c0_108 = arith.constant 0 : index
    %151 = vector.load %arg10[%c1_106, %c0_107, %c0_108] : memref<2x8x1xf32, #tpu.memory_space<vmem>>, vector<1x8x1xf32>
    %152 = vector.shape_cast %151 : vector<1x8x1xf32> to vector<8x1xf32>
    %153 = vector.broadcast %152 : vector<8x1xf32> to vector<8x256xf32>
    %154 = arith.addf %150, %153 : vector<8x256xf32>
    %c0_109 = arith.constant 0 : index
    %c0_110 = arith.constant 0 : index
    %155 = vector.load %arg11[%c0_109, %c0_110] : memref<8x256xf32, #tpu.memory_space<vmem>>, vector<8x256xf32>
    tpu.vector_store %arg11[%c0_109, %c0_110], %154 {strides = array<i32>} : memref<8x256xf32, #tpu.memory_space<vmem>>, vector<8x256xf32>,
    return
  }
  func.func @transform_0(%arg0: i32) -> (i32, i32) {
    %c0_i32 = arith.constant 0 : i32
    %c0_i32_0 = arith.constant 0 : i32
    return %c0_i32, %arg0 : i32, i32
  }
  func.func @transform_1(%arg0: i32) -> (i32, i32, i32) {
    %c0_i32 = arith.constant 0 : i32
    %c0_i32_0 = arith.constant 0 : i32
    %c0_i32_1 = arith.constant 0 : i32
    %c0_i32_2 = arith.constant 0 : i32
    return %c0_i32, %c0_i32_0, %c0_i32_1 : i32, i32, i32
  }
  func.func @transform_2(%arg0: i32) -> (i32, i32, i32) {
    %c0_i32 = arith.constant 0 : i32
    %c0_i32_0 = arith.constant 0 : i32
    %c0_i32_1 = arith.constant 0 : i32
    %c0_i32_2 = arith.constant 0 : i32
    return %c0_i32, %c0_i32_0, %c0_i32_1 : i32, i32, i32
  }
  func.func @transform_3(%arg0: i32) -> (i32, i32, i32) {
    %c0_i32 = arith.constant 0 : i32
    %c0_i32_0 = arith.constant 0 : i32
    %c0_i32_1 = arith.constant 0 : i32
    %c0_i32_2 = arith.constant 0 : i32
    return %c0_i32, %c0_i32_0, %c0_i32_1 : i32, i32, i32
  }
  func.func @transform_4(%arg0: i32) -> (i32, i32, i32) {
    %c0_i32 = arith.constant 0 : i32
    %c0_i32_0 = arith.constant 0 : i32
    %c0_i32_1 = arith.constant 0 : i32
    %c0_i32_2 = arith.constant 0 : i32
    return %c0_i32, %c0_i32_0, %c0_i32_1 : i32, i32, i32
  }
  func.func @transform_5(%arg0: i32) -> (i32, i32, i32) {
    %c0_i32 = arith.constant 0 : i32
    %c0_i32_0 = arith.constant 0 : i32
    %c0_i32_1 = arith.constant 0 : i32
    %c0_i32_2 = arith.constant 0 : i32
    return %c0_i32, %c0_i32_0, %c0_i32_1 : i32, i32, i32
  }
  func.func @transform_6(%arg0: i32) -> (i32, i32, i32) {
    %c0_i32 = arith.constant 0 : i32
    %c0_i32_0 = arith.constant 0 : i32
    %c0_i32_1 = arith.constant 0 : i32
    %c0_i32_2 = arith.constant 0 : i32
    return %c0_i32, %c0_i32_0, %c0_i32_1 : i32, i32, i32
  }
  func.func @transform_7(%arg0: i32) -> (i32, i32, i32) {
    %c0_i32 = arith.constant 0 : i32
    %c0_i32_0 = arith.constant 0 : i32
    %c0_i32_1 = arith.constant 0 : i32
    %c0_i32_2 = arith.constant 0 : i32
    return %c0_i32, %c0_i32_0, %c0_i32_1 : i32, i32, i32
  }
  func.func @transform_8(%arg0: i32) -> (i32, i32, i32) {
    %c0_i32 = arith.constant 0 : i32
    %c0_i32_0 = arith.constant 0 : i32
    %c0_i32_1 = arith.constant 0 : i32
    %c0_i32_2 = arith.constant 0 : i32
    return %c0_i32, %c0_i32_0, %c0_i32_1 : i32, i32, i32
  }
  func.func @transform_9(%arg0: i32) -> (i32, i32, i32) {
    %c0_i32 = arith.constant 0 : i32
    %c0_i32_0 = arith.constant 0 : i32
    %c0_i32_1 = arith.constant 0 : i32
    %c0_i32_2 = arith.constant 0 : i32
    return %c0_i32, %c0_i32_0, %c0_i32_1 : i32, i32, i32
  }
  func.func @transform_10(%arg0: i32) -> (i32, i32) {
    %c0_i32 = arith.constant 0 : i32
    %c0_i32_0 = arith.constant 0 : i32
    return %c0_i32, %arg0 : i32, i32
  }
}

</mosaic_0001>

<bundles_post_ra>
// kernel: fwd_pallas.5
= control target key start
LH: loop header
LB: loop body
LE: loop exit
PB: predicated region body
PF: predicated region fallthrough
CT: control target
= control target key end

     0   :  { %v1584_v0 = vmov 0   ;;  %v1585_v3 = vmov 0.0   ;;  %vm1586_vm0 = vmmov 0   ;;  %vm60_vm1 = vcmask 64512   ;;  %s1588_s27 = smov 119   ;;  %s1589_s28 = smov 127   ;;  %s1961_s2 = inlined_call_operand.vmem [shape: f32[4,8,1], index: 2, kind: input, shape index: {}]   ;;  %s1962_s3 = inlined_call_operand.vmem [shape: f32[4,8,1], index: 3, kind: input, shape index: {}]   ;;  %s1963_s5 = inlined_call_operand.vmem [shape: f32[4,8,1], index: 5, kind: input, shape index: {}]   ;;  %s1964_s0 = inlined_call_operand.vmem [shape: f32[8,128], index: 0, kind: input, shape index: {}]   ;;  %s1965_s4 = inlined_call_operand.vmem [shape: f32[4,8,8], index: 4, kind: input, shape index: {}]   ;;  %s1966_s9 = inlined_call_operand.vmem [shape: f32[4,8,1], index: 9, kind: input, shape index: {}]   ;;  %s1967_s7 = inlined_call_operand.vmem [shape: f32[4,8,1], index: 7, kind: input, shape index: {}]   ;;  %s1968_s1 = inlined_call_operand.vmem [shape: f32[9,1,128], index: 1, kind: input, shape index: {}]   ;;  %s1969_s6 = inlined_call_operand.vmem [shape: f32[4,8,72], index: 6, kind: input, shape index: {}]   ;;  %s1970_s8 = inlined_call_operand.vmem [shape: f32[4,8,8], index: 8, kind: input, shape index: {}]   ;;  %s1971_s11 = inlined_call_operand.vmem [shape: f32[8,128], index: 11, kind: output, shape index: {1}]   ;;  %s1972_s10 = inlined_call_operand.vmem [shape: f32[8,128], index: 10, kind: output, shape index: {0}]  }
   0x1   :  { %1582 = vset.pattern.permute.xlu0 %v1584_v0  ;;  %v38_v1 = vld [vmem:[%s1961_s2] sm:$0xff]  ;;  %1583 = vset.pattern.permute.xlu1 %v1584_v0  ;;  %s1590_s29 = smov 121   ;;  %s1591_s30 = smov 7   ;;  %v1344_v19 = vld [vmem:[%s1962_s3 + $0x8] sm:$0xff]  ;;  %vm229_vm2 = vcmask 588800  }
   0x2   :  { %41 = vperm.xlu0 %1582, %v38_v1   ;;  %v45_v2 = vld [vmem:[%s1962_s3] sm:$0xff]  ;;  %1447 = vmatprep.subr.mxu1 %v1585_v3  ;;  %s1592_s12 = smov 1   ;;  %s1593_s13 = smov 9   ;;  %v1343_v20 = vld [vmem:[%s1961_s2 + $0x8] sm:$0xff] }
   0x3   :  { %1473 = vmatprep.subr.mxu0 %v1585_v3  ;;  %1449 = vmatprep.mubr.msk.f32.mxu1 %vm1586_vm0, %v1585_v3  ;;  %v54_v4 = vld [vmem:[%s1963_s5] sm:$0xff]  ;;  %s1594_s14 = smov 8   ;;  %v1346_v21 = vld [vmem:[%s1963_s5 + $0x8] sm:$0xff] }
   0x4   :  { %1475 = vmatprep.mubr.msk.f32.mxu0 %vm1586_vm0, %v1585_v3  ;;  %57 = vperm.xlu1 %1583, %v54_v4   ;;  %v1673_v6 = vld [vmem:[%s1964_s0] sm:$0xff]  ;;  %s1587_s0 = smov 120   ;;  %v1709_v22 = vld [vmem:[%s1968_s1 + $0x8] ss:$0 sm:$0xff] }
   0x5   :  { %v53_v11 = vld [vmem:[%s1965_s4] sm:$0xff]  ;;  %v1345_v63 = vld [vmem:[%s1965_s4 + $0x8] sm:$0xff] }
   0x6   :  { %48 = vperm.xlu0 %1582, %v45_v2   ;;  %v379_v17 = vld [vmem:[%s1966_s9] sm:$0xff] }
   0x7   :  { %v223_v18 = vld [vmem:[%s1967_s7] sm:$0xff] }
   0x8   :  { %v1714_v23 = vld [vmem:[%s1968_s1 + $0x7] ss:$0 sm:$0xff]  ;;  %v1720_v27 = vld [vmem:[%s1968_s1 + $0x6] ss:$0 sm:$0xff]  ;;  %v1726_v29 = vld [vmem:[%s1968_s1 + $0x5] ss:$0 sm:$0xff] }
   0x9   :  { %v1736_v35 = vld [vmem:[%s1968_s1 + $0x3] ss:$0 sm:$0xff]  ;;  %v1741_v37 = vld [vmem:[%s1968_s1 + $0x2] ss:$0 sm:$0xff]  ;;  %v1749_v39 = vld [vmem:[%s1968_s1 + $0x1] ss:$0 sm:$0xff] }
   0xa   :  { %v1755_v42 = vld [vmem:[%s1968_s1] ss:$0 sm:$0xff] }
   0xb   :  { %v222_v46 = vld [vmem:[%s1969_s6] sm:$0xff] }
   0xc   :  { %v304_v52 = vld [vmem:[%s1970_s8] sm:$0xff] }
  0x7d   :  { %v42_v5 = vpop.permute.xlu0 %41 }
  0x7e   :  { %v44_v7 = vmul.f32 %v42_v5, %v1673_v6 }
  0x7f   :  { %v58_v12 = vpop.permute.xlu1 %57 }
  0x81   :  { %v49_v8 = vpop.permute.xlu0 %48 }
  0x82   :  { %v51_v9 = vadd.f32 %v49_v8, %v44_v7  ;;  %v1349_v7 = vld [vmem:[%s1967_s7 + $0x8] sm:$0xff]  ;;  %v1355_v8 = vld [vmem:[%s1962_s3 + $0x10] sm:$0xff] }
  0x84   :  { %v52_v10 = vmax.f32 %v51_v9, 0.0  ;;  %v1354_v9 = vld [vmem:[%s1961_s2 + $0x10] sm:$0xff] }
  0x86   :  { %1448 = vmatpush3.msra.mxu1 %v52_v10  ;;  %v1357_v10 = vld [vmem:[%s1963_s5 + $0x10] sm:$0xff] }
  0x87   :  { %1450 = vmatmul.mubr.msk.f32.vlgmr.msra.gmra.mxu1 %vm60_vm1, %v53_v11  ;;  %1452 = vmatprep.subr.mxu1 %v1585_v3 }
  0x88   :  { %1470 = vmatprep.mubr.msk.f32.mxu1 %vm1586_vm0, %v1585_v3 }
 0x147   :  { %v130_v13 = vpop.f32.mrf.mxu1 }
 0x148   :  { %v131_v14 = vadd.f32 %v130_v13, %v58_v12 }
 0x149   :  { %v1451_v15 = vpop.f32.mrf.mxu1 }
 0x14a   :  { %v134_v16 = vmax.f32 %v131_v14, 0.0 }
 0x14c   :  { %200 = vrot.lane.b32.xlu0 %v134_v16, %s1587_s0  ;;  %211 = vrot.lane.b32.xlu1 %v134_v16, %s1588_s27 }
 0x150   :  { %178 = vrot.lane.b32.xlu0 %v134_v16, %s1589_s28  ;;  %189 = vrot.lane.b32.xlu1 %v134_v16, %s1590_s29 }
 0x154   :  { %156 = vrot.lane.b32.xlu0 %v134_v16, %s1591_s30  ;;  %167 = vrot.lane.b32.xlu1 %v134_v16, %s1592_s12 }
 0x158   :  { %135 = vrot.lane.b32.xlu0 %v134_v16, %s1593_s13  ;;  %145 = vrot.lane.b32.xlu1 %v134_v16, %s1594_s14 }
 0x15c   :  { %382 = vperm.xlu0 %1582, %v379_v17   ;;  %226 = vperm.xlu1 %1583, %v223_v18  }
 0x160   :  { %398 = vperm.xlu0 %1582, %v1344_v19   ;;  %390 = vperm.xlu1 %1583, %v1343_v20  }
 0x164   :  { %409 = vperm.xlu1 %1583, %v1346_v21  }
 0x1be   :  { %v201_v24 = vpop.permute.xlu0 %200  ;;  %v212_v25 = vpop.permute.xlu1 %211 }
 0x1bf   :  { %v221_v26 = vmul.f32 %v1709_v22, %v212_v25  ;;  %v210_v28 = vmul.f32 %v1714_v23, %v201_v24 }
 0x1c1   :  { %1453 = vmatpush3.msra.mxu1 %v221_v26 }
 0x1c2   :  { %v179_v30 = vpop.permute.xlu0 %178  ;;  %1454 = vmatprep.subr.mxu1 %v1585_v3  ;;  %v190_v31 = vpop.permute.xlu1 %189 }
 0x1c3   :  { %v199_v32 = vmul.f32 %v1720_v27, %v190_v31  ;;  %1455 = vmatpush3.msra.mxu1 %v210_v28  ;;  %v188_v33 = vmul.f32 %v1726_v29, %v179_v30  ;;  %v1348_v31 = vld [vmem:[%s1969_s6 + $0x8] sm:$0xff] }
 0x1c4   :  { %1456 = vmatprep.subr.mxu1 %v1585_v3 }
 0x1c5   :  { %1457 = vmatpush3.msra.mxu1 %v199_v32 }
 0x1c6   :  { %v157_v34 = vpop.permute.xlu0 %156  ;;  %1458 = vmatprep.subr.mxu1 %v1585_v3  ;;  %v168_v36 = vpop.permute.xlu1 %167 }
 0x1c7   :  { %1459 = vmatpush3.msra.mxu1 %v188_v33  ;;  %v177_v38 = vmul.f32 %v1736_v35, %v168_v36  ;;  %v166_v41 = vmul.f32 %v1741_v37, %v157_v34 }
 0x1c8   :  { %1460 = vmatprep.subr.mxu1 %v1585_v3 }
 0x1c9   :  { %1461 = vmatpush3.msra.mxu1 %v134_v16 }
 0x1ca   :  { %1462 = vmatprep.subr.mxu1 %v1585_v3  ;;  %v146_v40 = vpop.permute.xlu1 %145  ;;  %v136_v43 = vpop.permute.xlu0 %135 }
 0x1cb   :  { %1463 = vmatpush3.msra.mxu1 %v177_v38  ;;  %v155_v44 = vmul.f32 %v1749_v39, %v146_v40  ;;  %v144_v45 = vmul.f32 %v1755_v42, %v136_v43  ;;  %v1351_v40 = vld [vmem:[%s1970_s8 + $0x8] sm:$0xff] }
 0x1cc   :  { %1464 = vmatprep.subr.mxu1 %v1585_v3 }
 0x1cd   :  { %1465 = vmatpush3.msra.mxu1 %v166_v41 }
 0x1ce   :  { %1466 = vmatprep.subr.mxu1 %v1585_v3 }
 0x1cf   :  { %1467 = vmatpush3.msra.mxu1 %v155_v44 }
 0x1d0   :  { %1468 = vmatprep.subr.mxu1 %v1585_v3 }
 0x1d1   :  { %1469 = vmatpush3.msra.mxu1 %v144_v45 }
 0x1d2   :  { %1471 = vmatmul.mubr.msk.f32.vlgmr.msra.gmra.mxu1 %vm229_vm2, %v222_v46  ;;  %1504 = vmatprep.subr.mxu1 %v1585_v3 }
 0x1d3   :  { %1506 = vmatprep.mubr.msk.f32.mxu1 %vm1586_vm0, %v1585_v3 }
 0x1d7   :  { %v227_v47 = vpop.permute.xlu1 %226  ;;  %v383_v53 = vpop.permute.xlu0 %382 }
 0x1db   :  { %v391_v58 = vpop.permute.xlu1 %390  ;;  %v399_v60 = vpop.permute.xlu0 %398 }
 0x1df   :  { %v410_v0 = vpop.permute.xlu1 %409 }
 0x292   :  { %v299_v48 = vpop.f32.mrf.mxu1 }
 0x293   :  { %v300_v49 = vadd.f32 %v299_v48, %v227_v47 }
 0x294   :  { %v1472_v50 = vpop.f32.mrf.mxu1 }
 0x295   :  { %v303_v51 = vmax.f32 %v300_v49, 0.0 }
 0x297   :  { %1474 = vmatpush3.msra.mxu0 %v303_v51 }
 0x298   :  { %1476 = vmatmul.mubr.msk.f32.vlgmr.msra.gmra.mxu0 %vm60_vm1, %v304_v52  ;;  %1478 = vmatprep.subr.mxu0 %v1585_v3  ;;  %v1356_v52 = vld [vmem:[%s1965_s4 + $0x10] sm:$0xff] }
 0x299   :  { %1480 = vmatprep.mubr.msk.f32.mxu0 %vm1586_vm0, %v1585_v3 }
 0x358   :  { %v374_v54 = vpop.f32.mrf.mxu0 }
 0x359   :  { %v378_v55 = vadd.f32 %v374_v54, %v1673_v6  ;;  %v1353_v6 = vld [vmem:[%s1966_s9 + $0x8] sm:$0xff] }
 0x35a   :  { %v1477_v56 = vpop.f32.mrf.mxu0 }
 0x35b   :  { %v1777_v57 = vadd.f32 %v383_v53, %v378_v55 }
 0x35d   :  { %v393_v59 = vmul.f32 %v391_v58, %v1777_v57  ;;  %v1379_v58 = vld [vmem:[%s1966_s9 + $0x10] sm:$0xff] }
 0x35f   :  { %v401_v61 = vadd.f32 %v399_v60, %v393_v59  ;;  %v1375_v59 = vld [vmem:[%s1967_s7 + $0x10] sm:$0xff]  ;;  %v1381_v60 = vld [vmem:[%s1962_s3 + $0x18] sm:$0xff] }
 0x361   :  { %v402_v62 = vmax.f32 %v401_v61, 0.0  ;;  %v1380_v61 = vld [vmem:[%s1961_s2 + $0x18] sm:$0xff] }
 0x363   :  { %1479 = vmatpush3.msra.mxu0 %v402_v62  ;;  %v1383_v62 = vld [vmem:[%s1963_s5 + $0x18] sm:$0xff] }
 0x364   :  { %1481 = vmatmul.mubr.msk.f32.vlgmr.msra.gmra.mxu0 %vm60_vm1, %v1345_v63  ;;  %1483 = vmatprep.subr.mxu0 %v1585_v3 }
 0x365   :  { %1501 = vmatprep.mubr.msk.f32.mxu0 %vm1586_vm0, %v1585_v3 }
 0x424   :  { %v481_v1 = vpop.f32.mrf.mxu0 }
 0x425   :  { %v482_v2 = vadd.f32 %v481_v1, %v410_v0 }
 0x426   :  { %v1482_v4 = vpop.f32.mrf.mxu0 }
 0x427   :  { %v485_v5 = vmax.f32 %v482_v2, 0.0 }
 0x429   :  { %504 = vrot.lane.b32.xlu1 %v485_v5, %s1587_s0  ;;  %507 = vrot.lane.b32.xlu0 %v485_v5, %s1588_s27 }
 0x42d   :  { %498 = vrot.lane.b32.xlu1 %v485_v5, %s1589_s28  ;;  %501 = vrot.lane.b32.xlu0 %v485_v5, %s1590_s29 }
 0x431   :  { %492 = vrot.lane.b32.xlu1 %v485_v5, %s1591_s30  ;;  %495 = vrot.lane.b32.xlu0 %v485_v5, %s1592_s12 }
 0x435   :  { %486 = vrot.lane.b32.xlu1 %v485_v5, %s1593_s13  ;;  %489 = vrot.lane.b32.xlu0 %v485_v5, %s1594_s14 }
 0x439   :  { %673 = vperm.xlu1 %1583, %v1353_v6   ;;  %516 = vperm.xlu0 %1582, %v1349_v7  }
 0x43d   :  { %690 = vperm.xlu1 %1583, %v1355_v8   ;;  %682 = vperm.xlu0 %1582, %v1354_v9  }
 0x441   :  { %701 = vperm.xlu0 %1582, %v1357_v10  }
 0x49b   :  { %v505_v11 = vpop.permute.xlu1 %504  ;;  %v508_v12 = vpop.permute.xlu0 %507 }
 0x49c   :  { %v509_v13 = vmul.f32 %v1709_v22, %v508_v12  ;;  %v506_v14 = vmul.f32 %v1714_v23, %v505_v11 }
 0x49e   :  { %1484 = vmatpush3.msra.mxu0 %v509_v13 }
 0x49f   :  { %v499_v15 = vpop.permute.xlu1 %498  ;;  %1485 = vmatprep.subr.mxu0 %v1585_v3  ;;  %v502_v16 = vpop.permute.xlu0 %501 }
 0x4a0   :  { %v503_v17 = vmul.f32 %v1720_v27, %v502_v16  ;;  %1486 = vmatpush3.msra.mxu0 %v506_v14  ;;  %v500_v18 = vmul.f32 %v1726_v29, %v499_v15  ;;  %v1374_v16 = vld [vmem:[%s1969_s6 + $0x10] sm:$0xff] }
 0x4a1   :  { %1487 = vmatprep.subr.mxu0 %v1585_v3 }
 0x4a2   :  { %1488 = vmatpush3.msra.mxu0 %v503_v17 }
 0x4a3   :  { %v493_v19 = vpop.permute.xlu1 %492  ;;  %1489 = vmatprep.subr.mxu0 %v1585_v3  ;;  %v496_v20 = vpop.permute.xlu0 %495 }
 0x4a4   :  { %1490 = vmatpush3.msra.mxu0 %v500_v18  ;;  %v497_v21 = vmul.f32 %v1736_v35, %v496_v20  ;;  %v494_v25 = vmul.f32 %v1741_v37, %v493_v19 }
 0x4a5   :  { %1491 = vmatprep.subr.mxu0 %v1585_v3 }
 0x4a6   :  { %1492 = vmatpush3.msra.mxu0 %v485_v5 }
 0x4a7   :  { %1493 = vmatprep.subr.mxu0 %v1585_v3  ;;  %v490_v24 = vpop.permute.xlu0 %489  ;;  %v487_v26 = vpop.permute.xlu1 %486 }
 0x4a8   :  { %1494 = vmatpush3.msra.mxu0 %v497_v21  ;;  %v491_v28 = vmul.f32 %v1749_v39, %v490_v24  ;;  %v488_v30 = vmul.f32 %v1755_v42, %v487_v26  ;;  %v1377_v24 = vld [vmem:[%s1970_s8 + $0x10] sm:$0xff] }
 0x4a9   :  { %1495 = vmatprep.subr.mxu0 %v1585_v3 }
 0x4aa   :  { %1496 = vmatpush3.msra.mxu0 %v494_v25 }
 0x4ab   :  { %1497 = vmatprep.subr.mxu0 %v1585_v3 }
 0x4ac   :  { %1498 = vmatpush3.msra.mxu0 %v491_v28 }
 0x4ad   :  { %1499 = vmatprep.subr.mxu0 %v1585_v3 }
 0x4ae   :  { %1500 = vmatpush3.msra.mxu0 %v488_v30 }
 0x4af   :  { %1502 = vmatmul.mubr.msk.f32.vlgmr.msra.gmra.mxu0 %vm229_vm2, %v1348_v31  ;;  %1535 = vmatprep.subr.mxu0 %v1585_v3 }
 0x4b0   :  { %1537 = vmatprep.mubr.msk.f32.mxu0 %vm1586_vm0, %v1585_v3 }
 0x4b4   :  { %v517_v32 = vpop.permute.xlu0 %516  ;;  %v674_v41 = vpop.permute.xlu1 %673 }
 0x4b8   :  { %v683_v47 = vpop.permute.xlu0 %682  ;;  %v691_v49 = vpop.permute.xlu1 %690 }
 0x4bc   :  { %v702_v53 = vpop.permute.xlu0 %701 }
 0x56f   :  { %v588_v33 = vpop.f32.mrf.mxu0 }
 0x570   :  { %v589_v34 = vadd.f32 %v588_v33, %v517_v32 }
 0x571   :  { %v1503_v36 = vpop.f32.mrf.mxu0 }
 0x572   :  { %v592_v38 = vmax.f32 %v589_v34, 0.0 }
 0x574   :  { %1505 = vmatpush3.msra.mxu1 %v592_v38 }
 0x575   :  { %1507 = vmatmul.mubr.msk.f32.vlgmr.msra.gmra.mxu1 %vm60_vm1, %v1351_v40  ;;  %1509 = vmatprep.subr.mxu1 %v1585_v3  ;;  %v1382_v40 = vld [vmem:[%s1965_s4 + $0x18] sm:$0xff] }
 0x576   :  { %1511 = vmatprep.mubr.msk.f32.mxu1 %vm1586_vm0, %v1585_v3 }
 0x635   :  { %v664_v43 = vpop.f32.mrf.mxu1 }
 0x636   :  { %v668_v44 = vadd.f32 %v664_v43, %v1777_v57 }
 0x637   :  { %v1508_v45 = vpop.f32.mrf.mxu1 }
 0x638   :  { %v1841_v46 = vadd.f32 %v674_v41, %v668_v44 }
 0x63a   :  { %677 = vst [vmem:[%s1971_s11] sm:$0xff] %v1841_v46  ;;  %v685_v48 = vmul.f32 %v683_v47, %v1841_v46  ;;  %v1390_v47 = vld [vmem:[%s1966_s9 + $0x18] sm:$0xff] }
 0x63c   :  { %v693_v50 = vadd.f32 %v691_v49, %v685_v48  ;;  %v1386_v48 = vld [vmem:[%s1967_s7 + $0x18] sm:$0xff] }
 0x63e   :  { %v694_v51 = vmax.f32 %v693_v50, 0.0 }
 0x640   :  { %1510 = vmatpush3.msra.mxu1 %v694_v51 }
 0x641   :  { %1512 = vmatmul.mubr.msk.f32.vlgmr.msra.gmra.mxu1 %vm60_vm1, %v1356_v52  ;;  %1514 = vmatprep.subr.mxu1 %v1585_v3 }
 0x642   :  { %1532 = vmatprep.mubr.msk.f32.mxu1 %vm1586_vm0, %v1585_v3 }
 0x701   :  { %v773_v54 = vpop.f32.mrf.mxu1 }
 0x702   :  { %v774_v55 = vadd.f32 %v773_v54, %v702_v53 }
 0x703   :  { %v1513_v56 = vpop.f32.mrf.mxu1 }
 0x704   :  { %v777_v57 = vmax.f32 %v774_v55, 0.0 }
 0x706   :  { %838 = vrot.lane.b32.xlu0 %v777_v57, %s1587_s0  ;;  %848 = vrot.lane.b32.xlu1 %v777_v57, %s1588_s27 }
 0x70a   :  { %818 = vrot.lane.b32.xlu0 %v777_v57, %s1589_s28  ;;  %828 = vrot.lane.b32.xlu1 %v777_v57, %s1590_s29 }
 0x70e   :  { %798 = vrot.lane.b32.xlu0 %v777_v57, %s1591_s30  ;;  %808 = vrot.lane.b32.xlu1 %v777_v57, %s1592_s12 }
 0x712   :  { %778 = vrot.lane.b32.xlu0 %v777_v57, %s1593_s13  ;;  %788 = vrot.lane.b32.xlu1 %v777_v57, %s1594_s14 }
 0x716   :  { %1021 = vperm.xlu0 %1582, %v1379_v58   ;;  %864 = vperm.xlu1 %1583, %v1375_v59  }
 0x71a   :  { %1037 = vperm.xlu0 %1582, %v1381_v60   ;;  %1029 = vperm.xlu1 %1583, %v1380_v61  }
 0x71e   :  { %1048 = vperm.xlu1 %1583, %v1383_v62  }
 0x778   :  { %v839_v63 = vpop.permute.xlu0 %838  ;;  %v849_v0 = vpop.permute.xlu1 %848 }
 0x779   :  { %v857_v1 = vmul.f32 %v1709_v22, %v849_v0  ;;  %v847_v2 = vmul.f32 %v1714_v23, %v839_v63  ;;  %v1388_v0 = vld [vmem:[%s1970_s8 + $0x18] sm:$0xff] }
 0x77b   :  { %1515 = vmatpush3.msra.mxu1 %v857_v1 }
 0x77c   :  { %v819_v4 = vpop.permute.xlu0 %818  ;;  %1516 = vmatprep.subr.mxu1 %v1585_v3  ;;  %v829_v5 = vpop.permute.xlu1 %828 }
 0x77d   :  { %v837_v6 = vmul.f32 %v1720_v27, %v829_v5  ;;  %1517 = vmatpush3.msra.mxu1 %v847_v2  ;;  %v827_v7 = vmul.f32 %v1726_v29, %v819_v4 }
 0x77e   :  { %1518 = vmatprep.subr.mxu1 %v1585_v3 }
 0x77f   :  { %1519 = vmatpush3.msra.mxu1 %v837_v6 }
 0x780   :  { %v799_v8 = vpop.permute.xlu0 %798  ;;  %1520 = vmatprep.subr.mxu1 %v1585_v3  ;;  %v809_v9 = vpop.permute.xlu1 %808 }
 0x781   :  { %1521 = vmatpush3.msra.mxu1 %v827_v7  ;;  %v817_v10 = vmul.f32 %v1736_v35, %v809_v9  ;;  %v807_v12 = vmul.f32 %v1741_v37, %v799_v8 }
 0x782   :  { %1522 = vmatprep.subr.mxu1 %v1585_v3 }
 0x783   :  { %1523 = vmatpush3.msra.mxu1 %v777_v57 }
 0x784   :  { %1524 = vmatprep.subr.mxu1 %v1585_v3  ;;  %v789_v11 = vpop.permute.xlu1 %788  ;;  %v779_v13 = vpop.permute.xlu0 %778 }
 0x785   :  { %1525 = vmatpush3.msra.mxu1 %v817_v10  ;;  %v797_v14 = vmul.f32 %v1749_v39, %v789_v11  ;;  %v787_v15 = vmul.f32 %v1755_v42, %v779_v13 }
 0x786   :  { %1526 = vmatprep.subr.mxu1 %v1585_v3 }
 0x787   :  { %1527 = vmatpush3.msra.mxu1 %v807_v12 }
 0x788   :  { %1528 = vmatprep.subr.mxu1 %v1585_v3 }
 0x789   :  { %1529 = vmatpush3.msra.mxu1 %v797_v14 }
 0x78a   :  { %1530 = vmatprep.subr.mxu1 %v1585_v3 }
 0x78b   :  { %1531 = vmatpush3.msra.mxu1 %v787_v15 }
 0x78c   :  { %1533 = vmatmul.mubr.msk.f32.vlgmr.msra.gmra.mxu1 %vm229_vm2, %v1374_v16  ;;  %1566 = vmatprep.subr.mxu1 %v1585_v3 }
 0x78d   :  { %1568 = vmatprep.mubr.msk.f32.mxu1 %vm1586_vm0, %v1585_v3 }
 0x791   :  { %v865_v17 = vpop.permute.xlu1 %864  ;;  %v1022_v25 = vpop.permute.xlu0 %1021 }
 0x795   :  { %v1030_v32 = vpop.permute.xlu1 %1029  ;;  %v1038_v34 = vpop.permute.xlu0 %1037 }
 0x799   :  { %v1049_v41 = vpop.permute.xlu1 %1048 }
 0x84c   :  { %v936_v18 = vpop.f32.mrf.mxu1 }
 0x84d   :  { %v937_v19 = vadd.f32 %v936_v18, %v865_v17 }
 0x84e   :  { %v1534_v20 = vpop.f32.mrf.mxu1 }
 0x84f   :  { %v940_v21 = vmax.f32 %v937_v19, 0.0 }
 0x851   :  { %1536 = vmatpush3.msra.mxu0 %v940_v21 }
 0x852   :  { %1538 = vmatmul.mubr.msk.f32.vlgmr.msra.gmra.mxu0 %vm60_vm1, %v1377_v24  ;;  %1540 = vmatprep.subr.mxu0 %v1585_v3 }
 0x853   :  { %1542 = vmatprep.mubr.msk.f32.mxu0 %vm1586_vm0, %v1585_v3 }
 0x912   :  { %v1012_v26 = vpop.f32.mrf.mxu0 }
 0x913   :  { %v1016_v28 = vadd.f32 %v1012_v26, %v1841_v46 }
 0x914   :  { %v1539_v30 = vpop.f32.mrf.mxu0 }
 0x915   :  { %v1909_v31 = vadd.f32 %v1022_v25, %v1016_v28 }
 0x917   :  { %v1032_v33 = vmul.f32 %v1030_v32, %v1909_v31 }
 0x919   :  { %v1040_v36 = vadd.f32 %v1038_v34, %v1032_v33 }
 0x91b   :  { %v1041_v38 = vmax.f32 %v1040_v36, 0.0 }
 0x91d   :  { %1541 = vmatpush3.msra.mxu0 %v1041_v38 }
 0x91e   :  { %1543 = vmatmul.mubr.msk.f32.vlgmr.msra.gmra.mxu0 %vm60_vm1, %v1382_v40  ;;  %1545 = vmatprep.subr.mxu0 %v1585_v3 }
 0x91f   :  { %1563 = vmatprep.mubr.msk.f32.mxu0 %vm1586_vm0, %v1585_v3 }
 0x9de   :  { %v1120_v43 = vpop.f32.mrf.mxu0 }
 0x9df   :  { %v1121_v44 = vadd.f32 %v1120_v43, %v1049_v41 }
 0x9e0   :  { %v1544_v45 = vpop.f32.mrf.mxu0 }
 0x9e1   :  { %v1124_v46 = vmax.f32 %v1121_v44, 0.0 }
 0x9e3   :  { %1143 = vrot.lane.b32.xlu1 %v1124_v46, %s1587_s0  ;;  %1146 = vrot.lane.b32.xlu0 %v1124_v46, %s1588_s27 }
 0x9e7   :  { %1137 = vrot.lane.b32.xlu1 %v1124_v46, %s1589_s28  ;;  %1140 = vrot.lane.b32.xlu0 %v1124_v46, %s1590_s29 }
 0x9eb   :  { %1131 = vrot.lane.b32.xlu1 %v1124_v46, %s1591_s30  ;;  %1134 = vrot.lane.b32.xlu0 %v1124_v46, %s1592_s12 }
 0x9ef   :  { %1125 = vrot.lane.b32.xlu1 %v1124_v46, %s1593_s13  ;;  %1128 = vrot.lane.b32.xlu0 %v1124_v46, %s1594_s14 }
 0x9f3   :  { %1312 = vperm.xlu1 %1583, %v1390_v47   ;;  %1155 = vperm.xlu0 %1582, %v1386_v48  }
 0xa55   :  { %v1144_v49 = vpop.permute.xlu1 %1143  ;;  %v1147_v50 = vpop.permute.xlu0 %1146 }
 0xa56   :  { %v1148_v51 = vmul.f32 %v1709_v22, %v1147_v50  ;;  %v1145_v52 = vmul.f32 %v1714_v23, %v1144_v49 }
 0xa58   :  { %1546 = vmatpush3.msra.mxu0 %v1148_v51 }
 0xa59   :  { %v1138_v53 = vpop.permute.xlu1 %1137  ;;  %1547 = vmatprep.subr.mxu0 %v1585_v3  ;;  %v1141_v54 = vpop.permute.xlu0 %1140 }
 0xa5a   :  { %v1142_v55 = vmul.f32 %v1720_v27, %v1141_v54  ;;  %1548 = vmatpush3.msra.mxu0 %v1145_v52  ;;  %v1139_v56 = vmul.f32 %v1726_v29, %v1138_v53 }
 0xa5b   :  { %1549 = vmatprep.subr.mxu0 %v1585_v3 }
 0xa5c   :  { %1550 = vmatpush3.msra.mxu0 %v1142_v55 }
 0xa5d   :  { %v1132_v57 = vpop.permute.xlu1 %1131  ;;  %1551 = vmatprep.subr.mxu0 %v1585_v3  ;;  %v1135_v58 = vpop.permute.xlu0 %1134 }
 0xa5e   :  { %1552 = vmatpush3.msra.mxu0 %v1139_v56  ;;  %v1136_v22 = vmul.f32 %v1736_v35, %v1135_v58  ;;  %v1133_v27 = vmul.f32 %v1741_v37, %v1132_v57  ;;  %v1385_v35 = vld [vmem:[%s1969_s6 + $0x18] sm:$0xff] }
 0xa5f   :  { %1553 = vmatprep.subr.mxu0 %v1585_v3 }
 0xa60   :  { %1554 = vmatpush3.msra.mxu0 %v1124_v46 }
 0xa61   :  { %1555 = vmatprep.subr.mxu0 %v1585_v3  ;;  %v1129_v23 = vpop.permute.xlu0 %1128  ;;  %v1126_v59 = vpop.permute.xlu1 %1125 }
 0xa62   :  { %1556 = vmatpush3.msra.mxu0 %v1136_v22  ;;  %v1130_v29 = vmul.f32 %v1749_v39, %v1129_v23  ;;  %v1127_v60 = vmul.f32 %v1755_v42, %v1126_v59 }
 0xa63   :  { %1557 = vmatprep.subr.mxu0 %v1585_v3 }
 0xa64   :  { %1558 = vmatpush3.msra.mxu0 %v1133_v27 }
 0xa65   :  { %1559 = vmatprep.subr.mxu0 %v1585_v3 }
 0xa66   :  { %1560 = vmatpush3.msra.mxu0 %v1130_v29 }
 0xa67   :  { %1561 = vmatprep.subr.mxu0 %v1585_v3 }
 0xa68   :  { %1562 = vmatpush3.msra.mxu0 %v1127_v60 }
 0xa69   :  { %1564 = vmatmul.mubr.msk.f32.vlgmr.msra.gmra.mxu0 %vm229_vm2, %v1385_v35 }
 0xa6e   :  { %v1156_v37 = vpop.permute.xlu0 %1155  ;;  %v1313_v2 = vpop.permute.xlu1 %1312 }
 0xb29   :  { %v1227_v61 = vpop.f32.mrf.mxu0 }
 0xb2a   :  { %v1228_v62 = vadd.f32 %v1227_v61, %v1156_v37 }
 0xb2b   :  { %v1565_v63 = vpop.f32.mrf.mxu0 }
 0xb2c   :  { %v1231_v39 = vmax.f32 %v1228_v62, 0.0 }
 0xb2e   :  { %1567 = vmatpush3.msra.mxu1 %v1231_v39 }
 0xb2f   :  { %1569 = vmatmul.mubr.msk.f32.vlgmr.msra.gmra.mxu1 %vm60_vm1, %v1388_v0 }
 0xbef   :  { %v1303_v42 = vpop.f32.mrf.mxu1 }
 0xbf0   :  { %v1307_v1 = vadd.f32 %v1303_v42, %v1909_v31 }
 0xbf1   :  { %v1570_v3 = vpop.f32.mrf.mxu1 }
 0xbf2   :  { %v1315_v4 = vadd.f32 %v1313_v2, %v1307_v1 }
 0xbf4   :  { %1316 = vst [vmem:[%s1972_s10] sm:$0xff] %v1315_v4 }

// kernel: fwd_pallas.7
= control target key start
LH: loop header
LB: loop body
LE: loop exit
PB: predicated region body
PF: predicated region fallthrough
CT: control target
= control target key end

     0   :  { %v812_v0 = vmov 0   ;;  %v813_v3 = vmov 0.0   ;;  %vm814_vm0 = vmmov 0   ;;  %vm58_vm1 = vcmask 64512   ;;  %s816_s23 = smov 119   ;;  %s817_s24 = smov 127   ;;  %s1052_s2 = inlined_call_operand.vmem [shape: f32[2,8,1], index: 2, kind: input, shape index: {}]   ;;  %s1053_s3 = inlined_call_operand.vmem [shape: f32[2,8,1], index: 3, kind: input, shape index: {}]   ;;  %s1054_s5 = inlined_call_operand.vmem [shape: f32[2,8,1], index: 5, kind: input, shape index: {}]   ;;  %s1055_s0 = inlined_call_operand.vmem [shape: f32[8,128], index: 0, kind: input, shape index: {}]   ;;  %s1056_s4 = inlined_call_operand.vmem [shape: f32[2,8,8], index: 4, kind: input, shape index: {}]   ;;  %s1057_s9 = inlined_call_operand.vmem [shape: f32[2,8,1], index: 9, kind: input, shape index: {}]   ;;  %s1058_s7 = inlined_call_operand.vmem [shape: f32[2,8,1], index: 7, kind: input, shape index: {}]   ;;  %s1059_s1 = inlined_call_operand.vmem [shape: f32[9,1,128], index: 1, kind: input, shape index: {}]   ;;  %s1060_s6 = inlined_call_operand.vmem [shape: f32[2,8,72], index: 6, kind: input, shape index: {}]   ;;  %s1061_s8 = inlined_call_operand.vmem [shape: f32[2,8,8], index: 8, kind: input, shape index: {}]   ;;  %s1062_s10 = inlined_call_operand.vmem [shape: f32[8,128], index: 10, kind: output, shape index: {}]  }
   0x1   :  { %810 = vset.pattern.permute.xlu0 %v812_v0  ;;  %v36_v1 = vld [vmem:[%s1052_s2] sm:$0xff]  ;;  %811 = vset.pattern.permute.xlu1 %v812_v0  ;;  %s818_s25 = smov 121   ;;  %s819_s26 = smov 7   ;;  %v699_v19 = vld [vmem:[%s1053_s3 + $0x8] sm:$0xff]  ;;  %vm227_vm2 = vcmask 588800  }
   0x2   :  { %39 = vperm.xlu0 %810, %v36_v1   ;;  %v43_v2 = vld [vmem:[%s1053_s3] sm:$0xff]  ;;  %737 = vmatprep.subr.mxu1 %v813_v3  ;;  %s820_s27 = smov 1   ;;  %s821_s28 = smov 9   ;;  %v698_v20 = vld [vmem:[%s1052_s2 + $0x8] sm:$0xff] }
   0x3   :  { %763 = vmatprep.subr.mxu0 %v813_v3  ;;  %739 = vmatprep.mubr.msk.f32.mxu1 %vm814_vm0, %v813_v3  ;;  %v52_v4 = vld [vmem:[%s1054_s5] sm:$0xff]  ;;  %s822_s29 = smov 8   ;;  %v701_v21 = vld [vmem:[%s1054_s5 + $0x8] sm:$0xff] }
   0x4   :  { %765 = vmatprep.mubr.msk.f32.mxu0 %vm814_vm0, %v813_v3  ;;  %55 = vperm.xlu1 %811, %v52_v4   ;;  %v896_v6 = vld [vmem:[%s1055_s0] sm:$0xff]  ;;  %s815_s0 = smov 120   ;;  %v932_v22 = vld [vmem:[%s1059_s1 + $0x8] ss:$0 sm:$0xff] }
   0x5   :  { %v51_v11 = vld [vmem:[%s1056_s4] sm:$0xff]  ;;  %v700_v62 = vld [vmem:[%s1056_s4 + $0x8] sm:$0xff] }
   0x6   :  { %46 = vperm.xlu0 %810, %v43_v2   ;;  %v377_v17 = vld [vmem:[%s1057_s9] sm:$0xff] }
   0x7   :  { %v221_v18 = vld [vmem:[%s1058_s7] sm:$0xff] }
   0x8   :  { %v937_v23 = vld [vmem:[%s1059_s1 + $0x7] ss:$0 sm:$0xff]  ;;  %v943_v27 = vld [vmem:[%s1059_s1 + $0x6] ss:$0 sm:$0xff]  ;;  %v949_v29 = vld [vmem:[%s1059_s1 + $0x5] ss:$0 sm:$0xff] }
   0x9   :  { %v959_v35 = vld [vmem:[%s1059_s1 + $0x3] ss:$0 sm:$0xff]  ;;  %v964_v37 = vld [vmem:[%s1059_s1 + $0x2] ss:$0 sm:$0xff]  ;;  %v972_v39 = vld [vmem:[%s1059_s1 + $0x1] ss:$0 sm:$0xff] }
   0xa   :  { %v978_v42 = vld [vmem:[%s1059_s1] ss:$0 sm:$0xff] }
   0xb   :  { %v220_v46 = vld [vmem:[%s1060_s6] sm:$0xff] }
   0xc   :  { %v302_v52 = vld [vmem:[%s1061_s8] sm:$0xff] }
  0x7d   :  { %v40_v5 = vpop.permute.xlu0 %39 }
  0x7e   :  { %v42_v7 = vmul.f32 %v40_v5, %v896_v6 }
  0x7f   :  { %v56_v12 = vpop.permute.xlu1 %55 }
  0x81   :  { %v47_v8 = vpop.permute.xlu0 %46 }
  0x82   :  { %v49_v9 = vadd.f32 %v47_v8, %v42_v7  ;;  %v704_v7 = vld [vmem:[%s1058_s7 + $0x8] sm:$0xff] }
  0x84   :  { %v50_v10 = vmax.f32 %v49_v9, 0.0 }
  0x86   :  { %738 = vmatpush3.msra.mxu1 %v50_v10 }
  0x87   :  { %740 = vmatmul.mubr.msk.f32.vlgmr.msra.gmra.mxu1 %vm58_vm1, %v51_v11  ;;  %742 = vmatprep.subr.mxu1 %v813_v3 }
  0x88   :  { %760 = vmatprep.mubr.msk.f32.mxu1 %vm814_vm0, %v813_v3 }
 0x147   :  { %v128_v13 = vpop.f32.mrf.mxu1 }
 0x148   :  { %v129_v14 = vadd.f32 %v128_v13, %v56_v12 }
 0x149   :  { %v741_v15 = vpop.f32.mrf.mxu1 }
 0x14a   :  { %v132_v16 = vmax.f32 %v129_v14, 0.0 }
 0x14c   :  { %198 = vrot.lane.b32.xlu0 %v132_v16, %s815_s0  ;;  %209 = vrot.lane.b32.xlu1 %v132_v16, %s816_s23 }
 0x150   :  { %176 = vrot.lane.b32.xlu0 %v132_v16, %s817_s24  ;;  %187 = vrot.lane.b32.xlu1 %v132_v16, %s818_s25 }
 0x154   :  { %154 = vrot.lane.b32.xlu0 %v132_v16, %s819_s26  ;;  %165 = vrot.lane.b32.xlu1 %v132_v16, %s820_s27 }
 0x158   :  { %133 = vrot.lane.b32.xlu0 %v132_v16, %s821_s28  ;;  %143 = vrot.lane.b32.xlu1 %v132_v16, %s822_s29 }
 0x15c   :  { %380 = vperm.xlu0 %810, %v377_v17   ;;  %224 = vperm.xlu1 %811, %v221_v18  }
 0x160   :  { %396 = vperm.xlu0 %810, %v699_v19   ;;  %388 = vperm.xlu1 %811, %v698_v20  }
 0x164   :  { %407 = vperm.xlu1 %811, %v701_v21  }
 0x1be   :  { %v199_v24 = vpop.permute.xlu0 %198  ;;  %v210_v25 = vpop.permute.xlu1 %209 }
 0x1bf   :  { %v219_v26 = vmul.f32 %v932_v22, %v210_v25  ;;  %v208_v28 = vmul.f32 %v937_v23, %v199_v24  ;;  %v703_v24 = vld [vmem:[%s1060_s6 + $0x8] sm:$0xff] }
 0x1c1   :  { %743 = vmatpush3.msra.mxu1 %v219_v26 }
 0x1c2   :  { %v177_v30 = vpop.permute.xlu0 %176  ;;  %744 = vmatprep.subr.mxu1 %v813_v3  ;;  %v188_v31 = vpop.permute.xlu1 %187 }
 0x1c3   :  { %v197_v32 = vmul.f32 %v943_v27, %v188_v31  ;;  %745 = vmatpush3.msra.mxu1 %v208_v28  ;;  %v186_v33 = vmul.f32 %v949_v29, %v177_v30 }
 0x1c4   :  { %746 = vmatprep.subr.mxu1 %v813_v3 }
 0x1c5   :  { %747 = vmatpush3.msra.mxu1 %v197_v32 }
 0x1c6   :  { %v155_v34 = vpop.permute.xlu0 %154  ;;  %748 = vmatprep.subr.mxu1 %v813_v3  ;;  %v166_v36 = vpop.permute.xlu1 %165 }
 0x1c7   :  { %749 = vmatpush3.msra.mxu1 %v186_v33  ;;  %v175_v38 = vmul.f32 %v959_v35, %v166_v36  ;;  %v164_v41 = vmul.f32 %v964_v37, %v155_v34 }
 0x1c8   :  { %750 = vmatprep.subr.mxu1 %v813_v3 }
 0x1c9   :  { %751 = vmatpush3.msra.mxu1 %v132_v16 }
 0x1ca   :  { %752 = vmatprep.subr.mxu1 %v813_v3  ;;  %v144_v40 = vpop.permute.xlu1 %143  ;;  %v134_v43 = vpop.permute.xlu0 %133 }
 0x1cb   :  { %753 = vmatpush3.msra.mxu1 %v175_v38  ;;  %v153_v44 = vmul.f32 %v972_v39, %v144_v40  ;;  %v142_v45 = vmul.f32 %v978_v42, %v134_v43 }
 0x1cc   :  { %754 = vmatprep.subr.mxu1 %v813_v3 }
 0x1cd   :  { %755 = vmatpush3.msra.mxu1 %v164_v41 }
 0x1ce   :  { %756 = vmatprep.subr.mxu1 %v813_v3 }
 0x1cf   :  { %757 = vmatpush3.msra.mxu1 %v153_v44 }
 0x1d0   :  { %758 = vmatprep.subr.mxu1 %v813_v3 }
 0x1d1   :  { %759 = vmatpush3.msra.mxu1 %v142_v45 }
 0x1d2   :  { %761 = vmatmul.mubr.msk.f32.vlgmr.msra.gmra.mxu1 %vm227_vm2, %v220_v46  ;;  %794 = vmatprep.subr.mxu1 %v813_v3 }
 0x1d3   :  { %796 = vmatprep.mubr.msk.f32.mxu1 %vm814_vm0, %v813_v3 }
 0x1d7   :  { %v225_v47 = vpop.permute.xlu1 %224  ;;  %v381_v53 = vpop.permute.xlu0 %380 }
 0x1db   :  { %v389_v58 = vpop.permute.xlu1 %388  ;;  %v397_v60 = vpop.permute.xlu0 %396 }
 0x1df   :  { %v408_v0 = vpop.permute.xlu1 %407 }
 0x292   :  { %v297_v48 = vpop.f32.mrf.mxu1 }
 0x293   :  { %v298_v49 = vadd.f32 %v297_v48, %v225_v47 }
 0x294   :  { %v762_v50 = vpop.f32.mrf.mxu1 }
 0x295   :  { %v301_v51 = vmax.f32 %v298_v49, 0.0 }
 0x297   :  { %764 = vmatpush3.msra.mxu0 %v301_v51 }
 0x298   :  { %766 = vmatmul.mubr.msk.f32.vlgmr.msra.gmra.mxu0 %vm58_vm1, %v302_v52  ;;  %768 = vmatprep.subr.mxu0 %v813_v3 }
 0x299   :  { %770 = vmatprep.mubr.msk.f32.mxu0 %vm814_vm0, %v813_v3 }
 0x358   :  { %v372_v54 = vpop.f32.mrf.mxu0 }
 0x359   :  { %v376_v55 = vadd.f32 %v372_v54, %v896_v6  ;;  %v708_v6 = vld [vmem:[%s1057_s9 + $0x8] sm:$0xff] }
 0x35a   :  { %v767_v56 = vpop.f32.mrf.mxu0 }
 0x35b   :  { %v1000_v57 = vadd.f32 %v381_v53, %v376_v55 }
 0x35d   :  { %v391_v59 = vmul.f32 %v389_v58, %v1000_v57 }
 0x35f   :  { %v399_v61 = vadd.f32 %v397_v60, %v391_v59 }
 0x361   :  { %v400_v63 = vmax.f32 %v399_v61, 0.0 }
 0x363   :  { %769 = vmatpush3.msra.mxu0 %v400_v63 }
 0x364   :  { %771 = vmatmul.mubr.msk.f32.vlgmr.msra.gmra.mxu0 %vm58_vm1, %v700_v62  ;;  %773 = vmatprep.subr.mxu0 %v813_v3 }
 0x365   :  { %791 = vmatprep.mubr.msk.f32.mxu0 %vm814_vm0, %v813_v3 }
 0x424   :  { %v479_v1 = vpop.f32.mrf.mxu0 }
 0x425   :  { %v480_v2 = vadd.f32 %v479_v1, %v408_v0 }
 0x426   :  { %v772_v4 = vpop.f32.mrf.mxu0 }
 0x427   :  { %v483_v5 = vmax.f32 %v480_v2, 0.0 }
 0x429   :  { %502 = vrot.lane.b32.xlu1 %v483_v5, %s815_s0  ;;  %505 = vrot.lane.b32.xlu0 %v483_v5, %s816_s23 }
 0x42d   :  { %496 = vrot.lane.b32.xlu1 %v483_v5, %s817_s24  ;;  %499 = vrot.lane.b32.xlu0 %v483_v5, %s818_s25 }
 0x431   :  { %490 = vrot.lane.b32.xlu1 %v483_v5, %s819_s26  ;;  %493 = vrot.lane.b32.xlu0 %v483_v5, %s820_s27 }
 0x435   :  { %484 = vrot.lane.b32.xlu1 %v483_v5, %s821_s28  ;;  %487 = vrot.lane.b32.xlu0 %v483_v5, %s822_s29 }
 0x439   :  { %671 = vperm.xlu1 %811, %v708_v6   ;;  %514 = vperm.xlu0 %810, %v704_v7  }
 0x49b   :  { %v503_v8 = vpop.permute.xlu1 %502  ;;  %v506_v9 = vpop.permute.xlu0 %505 }
 0x49c   :  { %v507_v10 = vmul.f32 %v932_v22, %v506_v9  ;;  %v504_v11 = vmul.f32 %v937_v23, %v503_v8 }
 0x49e   :  { %774 = vmatpush3.msra.mxu0 %v507_v10 }
 0x49f   :  { %v497_v12 = vpop.permute.xlu1 %496  ;;  %775 = vmatprep.subr.mxu0 %v813_v3  ;;  %v500_v13 = vpop.permute.xlu0 %499 }
 0x4a0   :  { %v501_v14 = vmul.f32 %v943_v27, %v500_v13  ;;  %776 = vmatpush3.msra.mxu0 %v504_v11  ;;  %v498_v15 = vmul.f32 %v949_v29, %v497_v12  ;;  %v706_v29 = vld [vmem:[%s1061_s8 + $0x8] sm:$0xff] }
 0x4a1   :  { %777 = vmatprep.subr.mxu0 %v813_v3 }
 0x4a2   :  { %778 = vmatpush3.msra.mxu0 %v501_v14 }
 0x4a3   :  { %v491_v16 = vpop.permute.xlu1 %490  ;;  %779 = vmatprep.subr.mxu0 %v813_v3  ;;  %v494_v17 = vpop.permute.xlu0 %493 }
 0x4a4   :  { %780 = vmatpush3.msra.mxu0 %v498_v15  ;;  %v495_v18 = vmul.f32 %v959_v35, %v494_v17  ;;  %v492_v20 = vmul.f32 %v964_v37, %v491_v16 }
 0x4a5   :  { %781 = vmatprep.subr.mxu0 %v813_v3 }
 0x4a6   :  { %782 = vmatpush3.msra.mxu0 %v483_v5 }
 0x4a7   :  { %783 = vmatprep.subr.mxu0 %v813_v3  ;;  %v488_v19 = vpop.permute.xlu0 %487  ;;  %v485_v21 = vpop.permute.xlu1 %484 }
 0x4a8   :  { %784 = vmatpush3.msra.mxu0 %v495_v18  ;;  %v489_v22 = vmul.f32 %v972_v39, %v488_v19  ;;  %v486_v23 = vmul.f32 %v978_v42, %v485_v21 }
 0x4a9   :  { %785 = vmatprep.subr.mxu0 %v813_v3 }
 0x4aa   :  { %786 = vmatpush3.msra.mxu0 %v492_v20 }
 0x4ab   :  { %787 = vmatprep.subr.mxu0 %v813_v3 }
 0x4ac   :  { %788 = vmatpush3.msra.mxu0 %v489_v22 }
 0x4ad   :  { %789 = vmatprep.subr.mxu0 %v813_v3 }
 0x4ae   :  { %790 = vmatpush3.msra.mxu0 %v486_v23 }
 0x4af   :  { %792 = vmatmul.mubr.msk.f32.vlgmr.msra.gmra.mxu0 %vm227_vm2, %v703_v24 }
 0x4b4   :  { %v515_v25 = vpop.permute.xlu0 %514  ;;  %v672_v33 = vpop.permute.xlu1 %671 }
 0x56f   :  { %v586_v26 = vpop.f32.mrf.mxu0 }
 0x570   :  { %v587_v27 = vadd.f32 %v586_v26, %v515_v25 }
 0x571   :  { %v793_v28 = vpop.f32.mrf.mxu0 }
 0x572   :  { %v590_v30 = vmax.f32 %v587_v27, 0.0 }
 0x574   :  { %795 = vmatpush3.msra.mxu1 %v590_v30 }
 0x575   :  { %797 = vmatmul.mubr.msk.f32.vlgmr.msra.gmra.mxu1 %vm58_vm1, %v706_v29 }
 0x635   :  { %v662_v31 = vpop.f32.mrf.mxu1 }
 0x636   :  { %v666_v32 = vadd.f32 %v662_v31, %v1000_v57 }
 0x637   :  { %v798_v3 = vpop.f32.mrf.mxu1 }
 0x638   :  { %v674_v34 = vadd.f32 %v672_v33, %v666_v32 }
 0x63a   :  { %675 = vst [vmem:[%s1062_s10] sm:$0xff] %v674_v34 }

// kernel: fwd_pallas.6
= control target key start
LH: loop header
LB: loop body
LE: loop exit
PB: predicated region body
PF: predicated region fallthrough
CT: control target
= control target key end

     0   :  { %v2200_v0 = vmov 0   ;;  %v2201_v3 = vmov 0.0   ;;  %vm2202_vm0 = vmmov 0   ;;  %vm58_vm1 = vcmask 64512   ;;  %s2204_s23 = smov 123   ;;  %s2205_s24 = smov 127   ;;  %s2696_s2 = inlined_call_operand.vmem [shape: f32[6,8,1], index: 2, kind: input, shape index: {}]   ;;  %s2697_s3 = inlined_call_operand.vmem [shape: f32[6,8,1], index: 3, kind: input, shape index: {}]   ;;  %s2698_s5 = inlined_call_operand.vmem [shape: f32[6,8,1], index: 5, kind: input, shape index: {}]   ;;  %s2699_s0 = inlined_call_operand.vmem [shape: f32[8,128], index: 0, kind: input, shape index: {}]   ;;  %s2700_s4 = inlined_call_operand.vmem [shape: f32[6,8,8], index: 4, kind: input, shape index: {}]   ;;  %s2701_s9 = inlined_call_operand.vmem [shape: f32[6,8,1], index: 9, kind: input, shape index: {}]   ;;  %s2702_s7 = inlined_call_operand.vmem [shape: f32[6,8,1], index: 7, kind: input, shape index: {}]   ;;  %s2703_s1 = inlined_call_operand.vmem [shape: f32[9,1,128], index: 1, kind: input, shape index: {}]   ;;  %s2704_s6 = inlined_call_operand.vmem [shape: f32[6,8,72], index: 6, kind: input, shape index: {}]   ;;  %s2705_s8 = inlined_call_operand.vmem [shape: f32[6,8,8], index: 8, kind: input, shape index: {}]   ;;  %s2706_s10 = inlined_call_operand.vmem [shape: f32[8,128], index: 10, kind: output, shape index: {}]  }
   0x1   :  { %2198 = vset.pattern.permute.xlu0 %v2200_v0  ;;  %v36_v1 = vld [vmem:[%s2696_s2] sm:$0xff]  ;;  %2199 = vset.pattern.permute.xlu1 %v2200_v0  ;;  %s2206_s25 = smov 125   ;;  %s2207_s26 = smov 3   ;;  %v1863_v19 = vld [vmem:[%s2697_s3 + $0x8] sm:$0xff]  ;;  %vm227_vm2 = vcmask 588800  }
   0x2   :  { %39 = vperm.xlu0 %2198, %v36_v1   ;;  %v43_v2 = vld [vmem:[%s2697_s3] sm:$0xff]  ;;  %2001 = vmatprep.subr.mxu1 %v2201_v3  ;;  %s2208_s27 = smov 1   ;;  %s2209_s28 = smov 5   ;;  %v1862_v20 = vld [vmem:[%s2696_s2 + $0x8] sm:$0xff] }
   0x3   :  { %2027 = vmatprep.subr.mxu0 %v2201_v3  ;;  %2003 = vmatprep.mubr.msk.f32.mxu1 %vm2202_vm0, %v2201_v3  ;;  %v52_v4 = vld [vmem:[%s2698_s5] sm:$0xff]  ;;  %s2210_s29 = smov 4   ;;  %v1865_v21 = vld [vmem:[%s2698_s5 + $0x8] sm:$0xff] }
   0x4   :  { %2029 = vmatprep.mubr.msk.f32.mxu0 %vm2202_vm0, %v2201_v3  ;;  %55 = vperm.xlu1 %2199, %v52_v4   ;;  %v2284_v6 = vld [vmem:[%s2699_s0] sm:$0xff]  ;;  %s2203_s0 = smov 124   ;;  %v2320_v22 = vld [vmem:[%s2703_s1 + $0x8] ss:$0 sm:$0xff] }
   0x5   :  { %v51_v11 = vld [vmem:[%s2700_s4] sm:$0xff]  ;;  %v1864_v63 = vld [vmem:[%s2700_s4 + $0x8] sm:$0xff] }
   0x6   :  { %46 = vperm.xlu0 %2198, %v43_v2   ;;  %v377_v17 = vld [vmem:[%s2701_s9] sm:$0xff] }
   0x7   :  { %v221_v18 = vld [vmem:[%s2702_s7] sm:$0xff] }
   0x8   :  { %v2325_v23 = vld [vmem:[%s2703_s1 + $0x7] ss:$0 sm:$0xff]  ;;  %v2331_v27 = vld [vmem:[%s2703_s1 + $0x6] ss:$0 sm:$0xff]  ;;  %v2337_v29 = vld [vmem:[%s2703_s1 + $0x5] ss:$0 sm:$0xff] }
   0x9   :  { %v2347_v35 = vld [vmem:[%s2703_s1 + $0x3] ss:$0 sm:$0xff]  ;;  %v2352_v37 = vld [vmem:[%s2703_s1 + $0x2] ss:$0 sm:$0xff]  ;;  %v2360_v39 = vld [vmem:[%s2703_s1 + $0x1] ss:$0 sm:$0xff] }
   0xa   :  { %v2366_v42 = vld [vmem:[%s2703_s1] ss:$0 sm:$0xff] }
   0xb   :  { %v220_v46 = vld [vmem:[%s2704_s6] sm:$0xff] }
   0xc   :  { %v302_v52 = vld [vmem:[%s2705_s8] sm:$0xff] }
  0x7d   :  { %v40_v5 = vpop.permute.xlu0 %39 }
  0x7e   :  { %v42_v7 = vmul.f32 %v40_v5, %v2284_v6 }
  0x7f   :  { %v56_v12 = vpop.permute.xlu1 %55 }
  0x81   :  { %v47_v8 = vpop.permute.xlu0 %46 }
  0x82   :  { %v49_v9 = vadd.f32 %v47_v8, %v42_v7  ;;  %v1868_v7 = vld [vmem:[%s2702_s7 + $0x8] sm:$0xff]  ;;  %v1874_v8 = vld [vmem:[%s2697_s3 + $0x10] sm:$0xff] }
  0x84   :  { %v50_v10 = vmax.f32 %v49_v9, 0.0  ;;  %v1873_v9 = vld [vmem:[%s2696_s2 + $0x10] sm:$0xff] }
  0x86   :  { %2002 = vmatpush3.msra.mxu1 %v50_v10  ;;  %v1876_v10 = vld [vmem:[%s2698_s5 + $0x10] sm:$0xff] }
  0x87   :  { %2004 = vmatmul.mubr.msk.f32.vlgmr.msra.gmra.mxu1 %vm58_vm1, %v51_v11  ;;  %2006 = vmatprep.subr.mxu1 %v2201_v3 }
  0x88   :  { %2024 = vmatprep.mubr.msk.f32.mxu1 %vm2202_vm0, %v2201_v3 }
 0x147   :  { %v128_v13 = vpop.f32.mrf.mxu1 }
 0x148   :  { %v129_v14 = vadd.f32 %v128_v13, %v56_v12 }
 0x149   :  { %v2005_v15 = vpop.f32.mrf.mxu1 }
 0x14a   :  { %v132_v16 = vmax.f32 %v129_v14, 0.0 }
 0x14c   :  { %198 = vrot.lane.b32.xlu0 %v132_v16, %s2203_s0  ;;  %209 = vrot.lane.b32.xlu1 %v132_v16, %s2204_s23 }
 0x150   :  { %176 = vrot.lane.b32.xlu0 %v132_v16, %s2205_s24  ;;  %187 = vrot.lane.b32.xlu1 %v132_v16, %s2206_s25 }
 0x154   :  { %154 = vrot.lane.b32.xlu0 %v132_v16, %s2207_s26  ;;  %165 = vrot.lane.b32.xlu1 %v132_v16, %s2208_s27 }
 0x158   :  { %133 = vrot.lane.b32.xlu0 %v132_v16, %s2209_s28  ;;  %143 = vrot.lane.b32.xlu1 %v132_v16, %s2210_s29 }
 0x15c   :  { %380 = vperm.xlu0 %2198, %v377_v17   ;;  %224 = vperm.xlu1 %2199, %v221_v18  }
 0x160   :  { %396 = vperm.xlu0 %2198, %v1863_v19   ;;  %388 = vperm.xlu1 %2199, %v1862_v20  }
 0x164   :  { %407 = vperm.xlu1 %2199, %v1865_v21  }
 0x1be   :  { %v199_v24 = vpop.permute.xlu0 %198  ;;  %v210_v25 = vpop.permute.xlu1 %209 }
 0x1bf   :  { %v219_v26 = vmul.f32 %v2320_v22, %v210_v25  ;;  %v208_v28 = vmul.f32 %v2325_v23, %v199_v24 }
 0x1c1   :  { %2007 = vmatpush3.msra.mxu1 %v219_v26 }
 0x1c2   :  { %v177_v30 = vpop.permute.xlu0 %176  ;;  %2008 = vmatprep.subr.mxu1 %v2201_v3  ;;  %v188_v31 = vpop.permute.xlu1 %187 }
 0x1c3   :  { %v197_v32 = vmul.f32 %v2331_v27, %v188_v31  ;;  %2009 = vmatpush3.msra.mxu1 %v208_v28  ;;  %v186_v33 = vmul.f32 %v2337_v29, %v177_v30  ;;  %v1867_v31 = vld [vmem:[%s2704_s6 + $0x8] sm:$0xff] }
 0x1c4   :  { %2010 = vmatprep.subr.mxu1 %v2201_v3 }
 0x1c5   :  { %2011 = vmatpush3.msra.mxu1 %v197_v32 }
 0x1c6   :  { %v155_v34 = vpop.permute.xlu0 %154  ;;  %2012 = vmatprep.subr.mxu1 %v2201_v3  ;;  %v166_v36 = vpop.permute.xlu1 %165 }
 0x1c7   :  { %2013 = vmatpush3.msra.mxu1 %v186_v33  ;;  %v175_v38 = vmul.f32 %v2347_v35, %v166_v36  ;;  %v164_v41 = vmul.f32 %v2352_v37, %v155_v34 }
 0x1c8   :  { %2014 = vmatprep.subr.mxu1 %v2201_v3 }
 0x1c9   :  { %2015 = vmatpush3.msra.mxu1 %v132_v16 }
 0x1ca   :  { %2016 = vmatprep.subr.mxu1 %v2201_v3  ;;  %v144_v40 = vpop.permute.xlu1 %143  ;;  %v134_v43 = vpop.permute.xlu0 %133 }
 0x1cb   :  { %2017 = vmatpush3.msra.mxu1 %v175_v38  ;;  %v153_v44 = vmul.f32 %v2360_v39, %v144_v40  ;;  %v142_v45 = vmul.f32 %v2366_v42, %v134_v43  ;;  %v1870_v40 = vld [vmem:[%s2705_s8 + $0x8] sm:$0xff] }
 0x1cc   :  { %2018 = vmatprep.subr.mxu1 %v2201_v3 }
 0x1cd   :  { %2019 = vmatpush3.msra.mxu1 %v164_v41 }
 0x1ce   :  { %2020 = vmatprep.subr.mxu1 %v2201_v3 }
 0x1cf   :  { %2021 = vmatpush3.msra.mxu1 %v153_v44 }
 0x1d0   :  { %2022 = vmatprep.subr.mxu1 %v2201_v3 }
 0x1d1   :  { %2023 = vmatpush3.msra.mxu1 %v142_v45 }
 0x1d2   :  { %2025 = vmatmul.mubr.msk.f32.vlgmr.msra.gmra.mxu1 %vm227_vm2, %v220_v46  ;;  %2058 = vmatprep.subr.mxu1 %v2201_v3 }
 0x1d3   :  { %2060 = vmatprep.mubr.msk.f32.mxu1 %vm2202_vm0, %v2201_v3 }
 0x1d7   :  { %v225_v47 = vpop.permute.xlu1 %224  ;;  %v381_v53 = vpop.permute.xlu0 %380 }
 0x1db   :  { %v389_v58 = vpop.permute.xlu1 %388  ;;  %v397_v60 = vpop.permute.xlu0 %396 }
 0x1df   :  { %v408_v0 = vpop.permute.xlu1 %407 }
 0x292   :  { %v297_v48 = vpop.f32.mrf.mxu1 }
 0x293   :  { %v298_v49 = vadd.f32 %v297_v48, %v225_v47 }
 0x294   :  { %v2026_v50 = vpop.f32.mrf.mxu1 }
 0x295   :  { %v301_v51 = vmax.f32 %v298_v49, 0.0 }
 0x297   :  { %2028 = vmatpush3.msra.mxu0 %v301_v51 }
 0x298   :  { %2030 = vmatmul.mubr.msk.f32.vlgmr.msra.gmra.mxu0 %vm58_vm1, %v302_v52  ;;  %2032 = vmatprep.subr.mxu0 %v2201_v3  ;;  %v1875_v52 = vld [vmem:[%s2700_s4 + $0x10] sm:$0xff] }
 0x299   :  { %2034 = vmatprep.mubr.msk.f32.mxu0 %vm2202_vm0, %v2201_v3 }
 0x358   :  { %v372_v54 = vpop.f32.mrf.mxu0 }
 0x359   :  { %v376_v55 = vadd.f32 %v372_v54, %v2284_v6  ;;  %v1872_v6 = vld [vmem:[%s2701_s9 + $0x8] sm:$0xff] }
 0x35a   :  { %v2031_v56 = vpop.f32.mrf.mxu0 }
 0x35b   :  { %v2388_v57 = vadd.f32 %v381_v53, %v376_v55 }
 0x35d   :  { %v391_v59 = vmul.f32 %v389_v58, %v2388_v57  ;;  %v1883_v58 = vld [vmem:[%s2701_s9 + $0x10] sm:$0xff] }
 0x35f   :  { %v399_v61 = vadd.f32 %v397_v60, %v391_v59  ;;  %v1879_v59 = vld [vmem:[%s2702_s7 + $0x10] sm:$0xff]  ;;  %v1885_v60 = vld [vmem:[%s2697_s3 + $0x18] sm:$0xff] }
 0x361   :  { %v400_v62 = vmax.f32 %v399_v61, 0.0  ;;  %v1884_v61 = vld [vmem:[%s2696_s2 + $0x18] sm:$0xff] }
 0x363   :  { %2033 = vmatpush3.msra.mxu0 %v400_v62  ;;  %v1887_v62 = vld [vmem:[%s2698_s5 + $0x18] sm:$0xff] }
 0x364   :  { %2035 = vmatmul.mubr.msk.f32.vlgmr.msra.gmra.mxu0 %vm58_vm1, %v1864_v63  ;;  %2037 = vmatprep.subr.mxu0 %v2201_v3 }
 0x365   :  { %2055 = vmatprep.mubr.msk.f32.mxu0 %vm2202_vm0, %v2201_v3 }
 0x424   :  { %v479_v1 = vpop.f32.mrf.mxu0 }
 0x425   :  { %v480_v2 = vadd.f32 %v479_v1, %v408_v0 }
 0x426   :  { %v2036_v4 = vpop.f32.mrf.mxu0 }
 0x427   :  { %v483_v5 = vmax.f32 %v480_v2, 0.0 }
 0x429   :  { %502 = vrot.lane.b32.xlu1 %v483_v5, %s2203_s0  ;;  %505 = vrot.lane.b32.xlu0 %v483_v5, %s2204_s23 }
 0x42d   :  { %496 = vrot.lane.b32.xlu1 %v483_v5, %s2205_s24  ;;  %499 = vrot.lane.b32.xlu0 %v483_v5, %s2206_s25 }
 0x431   :  { %490 = vrot.lane.b32.xlu1 %v483_v5, %s2207_s26  ;;  %493 = vrot.lane.b32.xlu0 %v483_v5, %s2208_s27 }
 0x435   :  { %484 = vrot.lane.b32.xlu1 %v483_v5, %s2209_s28  ;;  %487 = vrot.lane.b32.xlu0 %v483_v5, %s2210_s29 }
 0x439   :  { %671 = vperm.xlu1 %2199, %v1872_v6   ;;  %514 = vperm.xlu0 %2198, %v1868_v7  }
 0x43d   :  { %687 = vperm.xlu1 %2199, %v1874_v8   ;;  %679 = vperm.xlu0 %2198, %v1873_v9  }
 0x441   :  { %698 = vperm.xlu0 %2198, %v1876_v10  }
 0x49b   :  { %v503_v11 = vpop.permute.xlu1 %502  ;;  %v506_v12 = vpop.permute.xlu0 %505 }
 0x49c   :  { %v507_v13 = vmul.f32 %v2320_v22, %v506_v12  ;;  %v504_v14 = vmul.f32 %v2325_v23, %v503_v11 }
 0x49e   :  { %2038 = vmatpush3.msra.mxu0 %v507_v13 }
 0x49f   :  { %v497_v15 = vpop.permute.xlu1 %496  ;;  %2039 = vmatprep.subr.mxu0 %v2201_v3  ;;  %v500_v16 = vpop.permute.xlu0 %499 }
 0x4a0   :  { %v501_v17 = vmul.f32 %v2331_v27, %v500_v16  ;;  %2040 = vmatpush3.msra.mxu0 %v504_v14  ;;  %v498_v18 = vmul.f32 %v2337_v29, %v497_v15  ;;  %v1878_v16 = vld [vmem:[%s2704_s6 + $0x10] sm:$0xff] }
 0x4a1   :  { %2041 = vmatprep.subr.mxu0 %v2201_v3 }
 0x4a2   :  { %2042 = vmatpush3.msra.mxu0 %v501_v17 }
 0x4a3   :  { %v491_v19 = vpop.permute.xlu1 %490  ;;  %2043 = vmatprep.subr.mxu0 %v2201_v3  ;;  %v494_v20 = vpop.permute.xlu0 %493 }
 0x4a4   :  { %2044 = vmatpush3.msra.mxu0 %v498_v18  ;;  %v495_v21 = vmul.f32 %v2347_v35, %v494_v20  ;;  %v492_v25 = vmul.f32 %v2352_v37, %v491_v19 }
 0x4a5   :  { %2045 = vmatprep.subr.mxu0 %v2201_v3 }
 0x4a6   :  { %2046 = vmatpush3.msra.mxu0 %v483_v5 }
 0x4a7   :  { %2047 = vmatprep.subr.mxu0 %v2201_v3  ;;  %v488_v24 = vpop.permute.xlu0 %487  ;;  %v485_v26 = vpop.permute.xlu1 %484 }
 0x4a8   :  { %2048 = vmatpush3.msra.mxu0 %v495_v21  ;;  %v489_v28 = vmul.f32 %v2360_v39, %v488_v24  ;;  %v486_v30 = vmul.f32 %v2366_v42, %v485_v26  ;;  %v1881_v24 = vld [vmem:[%s2705_s8 + $0x10] sm:$0xff] }
 0x4a9   :  { %2049 = vmatprep.subr.mxu0 %v2201_v3 }
 0x4aa   :  { %2050 = vmatpush3.msra.mxu0 %v492_v25 }
 0x4ab   :  { %2051 = vmatprep.subr.mxu0 %v2201_v3 }
 0x4ac   :  { %2052 = vmatpush3.msra.mxu0 %v489_v28 }
 0x4ad   :  { %2053 = vmatprep.subr.mxu0 %v2201_v3 }
 0x4ae   :  { %2054 = vmatpush3.msra.mxu0 %v486_v30 }
 0x4af   :  { %2056 = vmatmul.mubr.msk.f32.vlgmr.msra.gmra.mxu0 %vm227_vm2, %v1867_v31  ;;  %2089 = vmatprep.subr.mxu0 %v2201_v3 }
 0x4b0   :  { %2091 = vmatprep.mubr.msk.f32.mxu0 %vm2202_vm0, %v2201_v3 }
 0x4b4   :  { %v515_v32 = vpop.permute.xlu0 %514  ;;  %v672_v41 = vpop.permute.xlu1 %671 }
 0x4b8   :  { %v680_v47 = vpop.permute.xlu0 %679  ;;  %v688_v49 = vpop.permute.xlu1 %687 }
 0x4bc   :  { %v699_v53 = vpop.permute.xlu0 %698 }
 0x56f   :  { %v586_v33 = vpop.f32.mrf.mxu0 }
 0x570   :  { %v587_v34 = vadd.f32 %v586_v33, %v515_v32 }
 0x571   :  { %v2057_v36 = vpop.f32.mrf.mxu0 }
 0x572   :  { %v590_v38 = vmax.f32 %v587_v34, 0.0 }
 0x574   :  { %2059 = vmatpush3.msra.mxu1 %v590_v38 }
 0x575   :  { %2061 = vmatmul.mubr.msk.f32.vlgmr.msra.gmra.mxu1 %vm58_vm1, %v1870_v40  ;;  %2063 = vmatprep.subr.mxu1 %v2201_v3  ;;  %v1886_v40 = vld [vmem:[%s2700_s4 + $0x18] sm:$0xff] }
 0x576   :  { %2065 = vmatprep.mubr.msk.f32.mxu1 %vm2202_vm0, %v2201_v3 }
 0x635   :  { %v662_v43 = vpop.f32.mrf.mxu1 }
 0x636   :  { %v666_v44 = vadd.f32 %v662_v43, %v2388_v57 }
 0x637   :  { %v2062_v45 = vpop.f32.mrf.mxu1 }
 0x638   :  { %v2452_v46 = vadd.f32 %v672_v41, %v666_v44 }
 0x63a   :  { %v682_v48 = vmul.f32 %v680_v47, %v2452_v46  ;;  %v1894_v47 = vld [vmem:[%s2701_s9 + $0x18] sm:$0xff] }
 0x63c   :  { %v690_v50 = vadd.f32 %v688_v49, %v682_v48  ;;  %v1890_v48 = vld [vmem:[%s2702_s7 + $0x18] sm:$0xff]  ;;  %v1896_v49 = vld [vmem:[%s2697_s3 + $0x20] sm:$0xff] }
 0x63e   :  { %v691_v51 = vmax.f32 %v690_v50, 0.0  ;;  %v1895_v50 = vld [vmem:[%s2696_s2 + $0x20] sm:$0xff] }
 0x640   :  { %2064 = vmatpush3.msra.mxu1 %v691_v51  ;;  %v1898_v51 = vld [vmem:[%s2698_s5 + $0x20] sm:$0xff] }
 0x641   :  { %2066 = vmatmul.mubr.msk.f32.vlgmr.msra.gmra.mxu1 %vm58_vm1, %v1875_v52  ;;  %2068 = vmatprep.subr.mxu1 %v2201_v3 }
 0x642   :  { %2086 = vmatprep.mubr.msk.f32.mxu1 %vm2202_vm0, %v2201_v3 }
 0x701   :  { %v770_v54 = vpop.f32.mrf.mxu1 }
 0x702   :  { %v771_v55 = vadd.f32 %v770_v54, %v699_v53 }
 0x703   :  { %v2067_v56 = vpop.f32.mrf.mxu1 }
 0x704   :  { %v774_v57 = vmax.f32 %v771_v55, 0.0 }
 0x706   :  { %793 = vrot.lane.b32.xlu0 %v774_v57, %s2203_s0  ;;  %796 = vrot.lane.b32.xlu1 %v774_v57, %s2204_s23 }
 0x70a   :  { %787 = vrot.lane.b32.xlu0 %v774_v57, %s2205_s24  ;;  %790 = vrot.lane.b32.xlu1 %v774_v57, %s2206_s25 }
 0x70e   :  { %781 = vrot.lane.b32.xlu0 %v774_v57, %s2207_s26  ;;  %784 = vrot.lane.b32.xlu1 %v774_v57, %s2208_s27 }
 0x712   :  { %775 = vrot.lane.b32.xlu0 %v774_v57, %s2209_s28  ;;  %778 = vrot.lane.b32.xlu1 %v774_v57, %s2210_s29 }
 0x716   :  { %962 = vperm.xlu0 %2198, %v1883_v58   ;;  %805 = vperm.xlu1 %2199, %v1879_v59  }
 0x71a   :  { %978 = vperm.xlu0 %2198, %v1885_v60   ;;  %970 = vperm.xlu1 %2199, %v1884_v61  }
 0x71e   :  { %989 = vperm.xlu1 %2199, %v1887_v62  }
 0x778   :  { %v794_v63 = vpop.permute.xlu0 %793  ;;  %v797_v0 = vpop.permute.xlu1 %796 }
 0x779   :  { %v798_v1 = vmul.f32 %v2320_v22, %v797_v0  ;;  %v795_v2 = vmul.f32 %v2325_v23, %v794_v63 }
 0x77b   :  { %2069 = vmatpush3.msra.mxu1 %v798_v1 }
 0x77c   :  { %v788_v4 = vpop.permute.xlu0 %787  ;;  %2070 = vmatprep.subr.mxu1 %v2201_v3  ;;  %v791_v5 = vpop.permute.xlu1 %790 }
 0x77d   :  { %v792_v6 = vmul.f32 %v2331_v27, %v791_v5  ;;  %2071 = vmatpush3.msra.mxu1 %v795_v2  ;;  %v789_v7 = vmul.f32 %v2337_v29, %v788_v4  ;;  %v1889_v5 = vld [vmem:[%s2704_s6 + $0x18] sm:$0xff] }
 0x77e   :  { %2072 = vmatprep.subr.mxu1 %v2201_v3 }
 0x77f   :  { %2073 = vmatpush3.msra.mxu1 %v792_v6 }
 0x780   :  { %v782_v8 = vpop.permute.xlu0 %781  ;;  %2074 = vmatprep.subr.mxu1 %v2201_v3  ;;  %v785_v9 = vpop.permute.xlu1 %784 }
 0x781   :  { %2075 = vmatpush3.msra.mxu1 %v789_v7  ;;  %v786_v10 = vmul.f32 %v2347_v35, %v785_v9  ;;  %v783_v12 = vmul.f32 %v2352_v37, %v782_v8 }
 0x782   :  { %2076 = vmatprep.subr.mxu1 %v2201_v3 }
 0x783   :  { %2077 = vmatpush3.msra.mxu1 %v774_v57 }
 0x784   :  { %2078 = vmatprep.subr.mxu1 %v2201_v3  ;;  %v779_v11 = vpop.permute.xlu1 %778  ;;  %v776_v13 = vpop.permute.xlu0 %775 }
 0x785   :  { %2079 = vmatpush3.msra.mxu1 %v786_v10  ;;  %v780_v14 = vmul.f32 %v2360_v39, %v779_v11  ;;  %v777_v15 = vmul.f32 %v2366_v42, %v776_v13  ;;  %v1892_v11 = vld [vmem:[%s2705_s8 + $0x18] sm:$0xff] }
 0x786   :  { %2080 = vmatprep.subr.mxu1 %v2201_v3 }
 0x787   :  { %2081 = vmatpush3.msra.mxu1 %v783_v12 }
 0x788   :  { %2082 = vmatprep.subr.mxu1 %v2201_v3 }
 0x789   :  { %2083 = vmatpush3.msra.mxu1 %v780_v14 }
 0x78a   :  { %2084 = vmatprep.subr.mxu1 %v2201_v3 }
 0x78b   :  { %2085 = vmatpush3.msra.mxu1 %v777_v15 }
 0x78c   :  { %2087 = vmatmul.mubr.msk.f32.vlgmr.msra.gmra.mxu1 %vm227_vm2, %v1878_v16  ;;  %2120 = vmatprep.subr.mxu1 %v2201_v3 }
 0x78d   :  { %2122 = vmatprep.mubr.msk.f32.mxu1 %vm2202_vm0, %v2201_v3 }
 0x791   :  { %v806_v17 = vpop.permute.xlu1 %805  ;;  %v963_v25 = vpop.permute.xlu0 %962 }
 0x795   :  { %v971_v32 = vpop.permute.xlu1 %970  ;;  %v979_v34 = vpop.permute.xlu0 %978 }
 0x799   :  { %v990_v41 = vpop.permute.xlu1 %989 }
 0x84c   :  { %v877_v18 = vpop.f32.mrf.mxu1 }
 0x84d   :  { %v878_v19 = vadd.f32 %v877_v18, %v806_v17 }
 0x84e   :  { %v2088_v20 = vpop.f32.mrf.mxu1 }
 0x84f   :  { %v881_v21 = vmax.f32 %v878_v19, 0.0 }
 0x851   :  { %2090 = vmatpush3.msra.mxu0 %v881_v21 }
 0x852   :  { %2092 = vmatmul.mubr.msk.f32.vlgmr.msra.gmra.mxu0 %vm58_vm1, %v1881_v24  ;;  %2094 = vmatprep.subr.mxu0 %v2201_v3  ;;  %v1897_v24 = vld [vmem:[%s2700_s4 + $0x20] sm:$0xff] }
 0x853   :  { %2096 = vmatprep.mubr.msk.f32.mxu0 %vm2202_vm0, %v2201_v3 }
 0x912   :  { %v953_v26 = vpop.f32.mrf.mxu0 }
 0x913   :  { %v957_v28 = vadd.f32 %v953_v26, %v2452_v46 }
 0x914   :  { %v2093_v30 = vpop.f32.mrf.mxu0 }
 0x915   :  { %v2516_v31 = vadd.f32 %v963_v25, %v957_v28 }
 0x917   :  { %v973_v33 = vmul.f32 %v971_v32, %v2516_v31  ;;  %v1905_v32 = vld [vmem:[%s2701_s9 + $0x20] sm:$0xff] }
 0x919   :  { %v981_v36 = vadd.f32 %v979_v34, %v973_v33  ;;  %v1901_v33 = vld [vmem:[%s2702_s7 + $0x20] sm:$0xff]  ;;  %v1907_v34 = vld [vmem:[%s2697_s3 + $0x28] sm:$0xff] }
 0x91b   :  { %v982_v38 = vmax.f32 %v981_v36, 0.0  ;;  %v1906_v36 = vld [vmem:[%s2696_s2 + $0x28] sm:$0xff] }
 0x91d   :  { %2095 = vmatpush3.msra.mxu0 %v982_v38  ;;  %v1909_v38 = vld [vmem:[%s2698_s5 + $0x28] sm:$0xff] }
 0x91e   :  { %2097 = vmatmul.mubr.msk.f32.vlgmr.msra.gmra.mxu0 %vm58_vm1, %v1886_v40  ;;  %2099 = vmatprep.subr.mxu0 %v2201_v3 }
 0x91f   :  { %2117 = vmatprep.mubr.msk.f32.mxu0 %vm2202_vm0, %v2201_v3 }
 0x9de   :  { %v1061_v43 = vpop.f32.mrf.mxu0 }
 0x9df   :  { %v1062_v44 = vadd.f32 %v1061_v43, %v990_v41 }
 0x9e0   :  { %v2098_v45 = vpop.f32.mrf.mxu0 }
 0x9e1   :  { %v1065_v46 = vmax.f32 %v1062_v44, 0.0 }
 0x9e3   :  { %1084 = vrot.lane.b32.xlu1 %v1065_v46, %s2203_s0  ;;  %1087 = vrot.lane.b32.xlu0 %v1065_v46, %s2204_s23 }
 0x9e7   :  { %1078 = vrot.lane.b32.xlu1 %v1065_v46, %s2205_s24  ;;  %1081 = vrot.lane.b32.xlu0 %v1065_v46, %s2206_s25 }
 0x9eb   :  { %1072 = vrot.lane.b32.xlu1 %v1065_v46, %s2207_s26  ;;  %1075 = vrot.lane.b32.xlu0 %v1065_v46, %s2208_s27 }
 0x9ef   :  { %1066 = vrot.lane.b32.xlu1 %v1065_v46, %s2209_s28  ;;  %1069 = vrot.lane.b32.xlu0 %v1065_v46, %s2210_s29 }
 0x9f3   :  { %1253 = vperm.xlu1 %2199, %v1894_v47   ;;  %1096 = vperm.xlu0 %2198, %v1890_v48  }
 0x9f7   :  { %1269 = vperm.xlu1 %2199, %v1896_v49   ;;  %1261 = vperm.xlu0 %2198, %v1895_v50  }
 0x9fb   :  { %1280 = vperm.xlu0 %2198, %v1898_v51  }
 0xa55   :  { %v1085_v52 = vpop.permute.xlu1 %1084  ;;  %v1088_v53 = vpop.permute.xlu0 %1087 }
 0xa56   :  { %v1089_v54 = vmul.f32 %v2320_v22, %v1088_v53  ;;  %v1086_v55 = vmul.f32 %v2325_v23, %v1085_v52 }
 0xa58   :  { %2100 = vmatpush3.msra.mxu0 %v1089_v54 }
 0xa59   :  { %v1079_v56 = vpop.permute.xlu1 %1078  ;;  %2101 = vmatprep.subr.mxu0 %v2201_v3  ;;  %v1082_v57 = vpop.permute.xlu0 %1081 }
 0xa5a   :  { %v1083_v58 = vmul.f32 %v2331_v27, %v1082_v57  ;;  %2102 = vmatpush3.msra.mxu0 %v1086_v55  ;;  %v1080_v59 = vmul.f32 %v2337_v29, %v1079_v56  ;;  %v1900_v57 = vld [vmem:[%s2704_s6 + $0x20] sm:$0xff] }
 0xa5b   :  { %2103 = vmatprep.subr.mxu0 %v2201_v3 }
 0xa5c   :  { %2104 = vmatpush3.msra.mxu0 %v1083_v58 }
 0xa5d   :  { %v1073_v60 = vpop.permute.xlu1 %1072  ;;  %2105 = vmatprep.subr.mxu0 %v2201_v3  ;;  %v1076_v61 = vpop.permute.xlu0 %1075 }
 0xa5e   :  { %2106 = vmatpush3.msra.mxu0 %v1080_v59  ;;  %v1077_v62 = vmul.f32 %v2347_v35, %v1076_v61  ;;  %v1074_v0 = vmul.f32 %v2352_v37, %v1073_v60 }
 0xa5f   :  { %2107 = vmatprep.subr.mxu0 %v2201_v3 }
 0xa60   :  { %2108 = vmatpush3.msra.mxu0 %v1065_v46 }
 0xa61   :  { %2109 = vmatprep.subr.mxu0 %v2201_v3  ;;  %v1070_v63 = vpop.permute.xlu0 %1069  ;;  %v1067_v1 = vpop.permute.xlu1 %1066 }
 0xa62   :  { %2110 = vmatpush3.msra.mxu0 %v1077_v62  ;;  %v1071_v2 = vmul.f32 %v2360_v39, %v1070_v63  ;;  %v1068_v4 = vmul.f32 %v2366_v42, %v1067_v1  ;;  %v1903_v63 = vld [vmem:[%s2705_s8 + $0x20] sm:$0xff] }
 0xa63   :  { %2111 = vmatprep.subr.mxu0 %v2201_v3 }
 0xa64   :  { %2112 = vmatpush3.msra.mxu0 %v1074_v0 }
 0xa65   :  { %2113 = vmatprep.subr.mxu0 %v2201_v3 }
 0xa66   :  { %2114 = vmatpush3.msra.mxu0 %v1071_v2 }
 0xa67   :  { %2115 = vmatprep.subr.mxu0 %v2201_v3 }
 0xa68   :  { %2116 = vmatpush3.msra.mxu0 %v1068_v4 }
 0xa69   :  { %2118 = vmatmul.mubr.msk.f32.vlgmr.msra.gmra.mxu0 %vm227_vm2, %v1889_v5  ;;  %2151 = vmatprep.subr.mxu0 %v2201_v3 }
 0xa6a   :  { %2153 = vmatprep.mubr.msk.f32.mxu0 %vm2202_vm0, %v2201_v3 }
 0xa6e   :  { %v1097_v6 = vpop.permute.xlu0 %1096  ;;  %v1254_v12 = vpop.permute.xlu1 %1253 }
 0xa72   :  { %v1262_v17 = vpop.permute.xlu0 %1261  ;;  %v1270_v19 = vpop.permute.xlu1 %1269 }
 0xa76   :  { %v1281_v25 = vpop.permute.xlu0 %1280 }
 0xb29   :  { %v1168_v7 = vpop.f32.mrf.mxu0 }
 0xb2a   :  { %v1169_v8 = vadd.f32 %v1168_v7, %v1097_v6 }
 0xb2b   :  { %v2119_v9 = vpop.f32.mrf.mxu0 }
 0xb2c   :  { %v1172_v10 = vmax.f32 %v1169_v8, 0.0 }
 0xb2e   :  { %2121 = vmatpush3.msra.mxu1 %v1172_v10 }
 0xb2f   :  { %2123 = vmatmul.mubr.msk.f32.vlgmr.msra.gmra.mxu1 %vm58_vm1, %v1892_v11  ;;  %2125 = vmatprep.subr.mxu1 %v2201_v3  ;;  %v1908_v11 = vld [vmem:[%s2700_s4 + $0x28] sm:$0xff] }
 0xb30   :  { %2127 = vmatprep.mubr.msk.f32.mxu1 %vm2202_vm0, %v2201_v3 }
 0xbef   :  { %v1244_v13 = vpop.f32.mrf.mxu1 }
 0xbf0   :  { %v1248_v14 = vadd.f32 %v1244_v13, %v2516_v31 }
 0xbf1   :  { %v2124_v15 = vpop.f32.mrf.mxu1 }
 0xbf2   :  { %v2580_v16 = vadd.f32 %v1254_v12, %v1248_v14 }
 0xbf4   :  { %v1264_v18 = vmul.f32 %v1262_v17, %v2580_v16  ;;  %v1916_v17 = vld [vmem:[%s2701_s9 + $0x28] sm:$0xff] }
 0xbf6   :  { %v1272_v20 = vadd.f32 %v1270_v19, %v1264_v18  ;;  %v1912_v18 = vld [vmem:[%s2702_s7 + $0x28] sm:$0xff] }
 0xbf8   :  { %v1273_v21 = vmax.f32 %v1272_v20, 0.0 }
 0xbfa   :  { %2126 = vmatpush3.msra.mxu1 %v1273_v21 }
 0xbfb   :  { %2128 = vmatmul.mubr.msk.f32.vlgmr.msra.gmra.mxu1 %vm58_vm1, %v1897_v24  ;;  %2130 = vmatprep.subr.mxu1 %v2201_v3 }
 0xbfc   :  { %2148 = vmatprep.mubr.msk.f32.mxu1 %vm2202_vm0, %v2201_v3 }
 0xcbb   :  { %v1352_v26 = vpop.f32.mrf.mxu1 }
 0xcbc   :  { %v1353_v28 = vadd.f32 %v1352_v26, %v1281_v25 }
 0xcbd   :  { %v2129_v30 = vpop.f32.mrf.mxu1 }
 0xcbe   :  { %v1356_v31 = vmax.f32 %v1353_v28, 0.0 }
 0xcc0   :  { %1375 = vrot.lane.b32.xlu0 %v1356_v31, %s2203_s0  ;;  %1378 = vrot.lane.b32.xlu1 %v1356_v31, %s2204_s23 }
 0xcc4   :  { %1369 = vrot.lane.b32.xlu0 %v1356_v31, %s2205_s24  ;;  %1372 = vrot.lane.b32.xlu1 %v1356_v31, %s2206_s25 }
 0xcc8   :  { %1363 = vrot.lane.b32.xlu0 %v1356_v31, %s2207_s26  ;;  %1366 = vrot.lane.b32.xlu1 %v1356_v31, %s2208_s27 }
 0xccc   :  { %1357 = vrot.lane.b32.xlu0 %v1356_v31, %s2209_s28  ;;  %1360 = vrot.lane.b32.xlu1 %v1356_v31, %s2210_s29 }
 0xcd0   :  { %1544 = vperm.xlu0 %2198, %v1905_v32   ;;  %1387 = vperm.xlu1 %2199, %v1901_v33  }
 0xcd4   :  { %1560 = vperm.xlu0 %2198, %v1907_v34   ;;  %1552 = vperm.xlu1 %2199, %v1906_v36  }
 0xcd8   :  { %1571 = vperm.xlu1 %2199, %v1909_v38  }
 0xd32   :  { %v1376_v40 = vpop.permute.xlu0 %1375  ;;  %v1379_v41 = vpop.permute.xlu1 %1378 }
 0xd33   :  { %v1380_v43 = vmul.f32 %v2320_v22, %v1379_v41  ;;  %v1377_v44 = vmul.f32 %v2325_v23, %v1376_v40  ;;  %v1914_v41 = vld [vmem:[%s2705_s8 + $0x28] sm:$0xff] }
 0xd35   :  { %2131 = vmatpush3.msra.mxu1 %v1380_v43 }
 0xd36   :  { %v1370_v45 = vpop.permute.xlu0 %1369  ;;  %2132 = vmatprep.subr.mxu1 %v2201_v3  ;;  %v1373_v46 = vpop.permute.xlu1 %1372 }
 0xd37   :  { %v1374_v47 = vmul.f32 %v2331_v27, %v1373_v46  ;;  %2133 = vmatpush3.msra.mxu1 %v1377_v44  ;;  %v1371_v48 = vmul.f32 %v2337_v29, %v1370_v45 }
 0xd38   :  { %2134 = vmatprep.subr.mxu1 %v2201_v3 }
 0xd39   :  { %2135 = vmatpush3.msra.mxu1 %v1374_v47 }
 0xd3a   :  { %v1364_v49 = vpop.permute.xlu0 %1363  ;;  %2136 = vmatprep.subr.mxu1 %v2201_v3  ;;  %v1367_v50 = vpop.permute.xlu1 %1366 }
 0xd3b   :  { %2137 = vmatpush3.msra.mxu1 %v1371_v48  ;;  %v1368_v51 = vmul.f32 %v2347_v35, %v1367_v50  ;;  %v1365_v53 = vmul.f32 %v2352_v37, %v1364_v49 }
 0xd3c   :  { %2138 = vmatprep.subr.mxu1 %v2201_v3 }
 0xd3d   :  { %2139 = vmatpush3.msra.mxu1 %v1356_v31 }
 0xd3e   :  { %2140 = vmatprep.subr.mxu1 %v2201_v3  ;;  %v1361_v52 = vpop.permute.xlu1 %1360  ;;  %v1358_v54 = vpop.permute.xlu0 %1357 }
 0xd3f   :  { %2141 = vmatpush3.msra.mxu1 %v1368_v51  ;;  %v1362_v55 = vmul.f32 %v2360_v39, %v1361_v52  ;;  %v1359_v56 = vmul.f32 %v2366_v42, %v1358_v54 }
 0xd40   :  { %2142 = vmatprep.subr.mxu1 %v2201_v3 }
 0xd41   :  { %2143 = vmatpush3.msra.mxu1 %v1365_v53 }
 0xd42   :  { %2144 = vmatprep.subr.mxu1 %v2201_v3 }
 0xd43   :  { %2145 = vmatpush3.msra.mxu1 %v1362_v55 }
 0xd44   :  { %2146 = vmatprep.subr.mxu1 %v2201_v3 }
 0xd45   :  { %2147 = vmatpush3.msra.mxu1 %v1359_v56 }
 0xd46   :  { %2149 = vmatmul.mubr.msk.f32.vlgmr.msra.gmra.mxu1 %vm227_vm2, %v1900_v57  ;;  %2182 = vmatprep.subr.mxu1 %v2201_v3 }
 0xd47   :  { %2184 = vmatprep.mubr.msk.f32.mxu1 %vm2202_vm0, %v2201_v3 }
 0xd4b   :  { %v1388_v58 = vpop.permute.xlu1 %1387  ;;  %v1545_v0 = vpop.permute.xlu0 %1544 }
 0xd4f   :  { %v1553_v6 = vpop.permute.xlu1 %1552  ;;  %v1561_v8 = vpop.permute.xlu0 %1560 }
 0xd53   :  { %v1572_v12 = vpop.permute.xlu1 %1571 }
 0xe06   :  { %v1459_v59 = vpop.f32.mrf.mxu1 }
 0xe07   :  { %v1460_v60 = vadd.f32 %v1459_v59, %v1388_v58 }
 0xe08   :  { %v2150_v61 = vpop.f32.mrf.mxu1 }
 0xe09   :  { %v1463_v62 = vmax.f32 %v1460_v60, 0.0 }
 0xe0b   :  { %2152 = vmatpush3.msra.mxu0 %v1463_v62 }
 0xe0c   :  { %2154 = vmatmul.mubr.msk.f32.vlgmr.msra.gmra.mxu0 %vm58_vm1, %v1903_v63  ;;  %2156 = vmatprep.subr.mxu0 %v2201_v3 }
 0xe0d   :  { %2158 = vmatprep.mubr.msk.f32.mxu0 %vm2202_vm0, %v2201_v3 }
 0xecc   :  { %v1535_v1 = vpop.f32.mrf.mxu0 }
 0xecd   :  { %v1539_v2 = vadd.f32 %v1535_v1, %v2580_v16 }
 0xece   :  { %v2155_v4 = vpop.f32.mrf.mxu0 }
 0xecf   :  { %v2644_v5 = vadd.f32 %v1545_v0, %v1539_v2 }
 0xed1   :  { %v1555_v7 = vmul.f32 %v1553_v6, %v2644_v5 }
 0xed3   :  { %v1563_v9 = vadd.f32 %v1561_v8, %v1555_v7 }
 0xed5   :  { %v1564_v10 = vmax.f32 %v1563_v9, 0.0 }
 0xed7   :  { %2157 = vmatpush3.msra.mxu0 %v1564_v10 }
 0xed8   :  { %2159 = vmatmul.mubr.msk.f32.vlgmr.msra.gmra.mxu0 %vm58_vm1, %v1908_v11  ;;  %2161 = vmatprep.subr.mxu0 %v2201_v3 }
 0xed9   :  { %2179 = vmatprep.mubr.msk.f32.mxu0 %vm2202_vm0, %v2201_v3 }
 0xf98   :  { %v1643_v13 = vpop.f32.mrf.mxu0 }
 0xf99   :  { %v1644_v14 = vadd.f32 %v1643_v13, %v1572_v12 }
 0xf9a   :  { %v2160_v15 = vpop.f32.mrf.mxu0 }
 0xf9b   :  { %v1647_v16 = vmax.f32 %v1644_v14, 0.0 }
 0xf9d   :  { %1666 = vrot.lane.b32.xlu1 %v1647_v16, %s2203_s0  ;;  %1669 = vrot.lane.b32.xlu0 %v1647_v16, %s2204_s23 }
 0xfa1   :  { %1660 = vrot.lane.b32.xlu1 %v1647_v16, %s2205_s24  ;;  %1663 = vrot.lane.b32.xlu0 %v1647_v16, %s2206_s25 }
 0xfa5   :  { %1654 = vrot.lane.b32.xlu1 %v1647_v16, %s2207_s26  ;;  %1657 = vrot.lane.b32.xlu0 %v1647_v16, %s2208_s27 }
 0xfa9   :  { %1648 = vrot.lane.b32.xlu1 %v1647_v16, %s2209_s28  ;;  %1651 = vrot.lane.b32.xlu0 %v1647_v16, %s2210_s29 }
 0xfad   :  { %1835 = vperm.xlu1 %2199, %v1916_v17   ;;  %1678 = vperm.xlu0 %2198, %v1912_v18  }
0x100f   :  { %v1667_v19 = vpop.permute.xlu1 %1666  ;;  %v1670_v20 = vpop.permute.xlu0 %1669 }
0x1010   :  { %v1671_v21 = vmul.f32 %v2320_v22, %v1670_v20  ;;  %v1668_v24 = vmul.f32 %v2325_v23, %v1667_v19 }
0x1012   :  { %2162 = vmatpush3.msra.mxu0 %v1671_v21 }
0x1013   :  { %v1661_v25 = vpop.permute.xlu1 %1660  ;;  %2163 = vmatprep.subr.mxu0 %v2201_v3  ;;  %v1664_v26 = vpop.permute.xlu0 %1663 }
0x1014   :  { %v1665_v28 = vmul.f32 %v2331_v27, %v1664_v26  ;;  %2164 = vmatpush3.msra.mxu0 %v1668_v24  ;;  %v1662_v30 = vmul.f32 %v2337_v29, %v1661_v25 }
0x1015   :  { %2165 = vmatprep.subr.mxu0 %v2201_v3 }
0x1016   :  { %2166 = vmatpush3.msra.mxu0 %v1665_v28 }
0x1017   :  { %v1655_v31 = vpop.permute.xlu1 %1654  ;;  %2167 = vmatprep.subr.mxu0 %v2201_v3  ;;  %v1658_v32 = vpop.permute.xlu0 %1657 }
0x1018   :  { %2168 = vmatpush3.msra.mxu0 %v1662_v30  ;;  %v1659_v22 = vmul.f32 %v2347_v35, %v1658_v32  ;;  %v1656_v27 = vmul.f32 %v2352_v37, %v1655_v31  ;;  %v1911_v35 = vld [vmem:[%s2704_s6 + $0x28] sm:$0xff] }
0x1019   :  { %2169 = vmatprep.subr.mxu0 %v2201_v3 }
0x101a   :  { %2170 = vmatpush3.msra.mxu0 %v1647_v16 }
0x101b   :  { %2171 = vmatprep.subr.mxu0 %v2201_v3  ;;  %v1652_v23 = vpop.permute.xlu0 %1651  ;;  %v1649_v33 = vpop.permute.xlu1 %1648 }
0x101c   :  { %2172 = vmatpush3.msra.mxu0 %v1659_v22  ;;  %v1653_v29 = vmul.f32 %v2360_v39, %v1652_v23  ;;  %v1650_v34 = vmul.f32 %v2366_v42, %v1649_v33 }
0x101d   :  { %2173 = vmatprep.subr.mxu0 %v2201_v3 }
0x101e   :  { %2174 = vmatpush3.msra.mxu0 %v1656_v27 }
0x101f   :  { %2175 = vmatprep.subr.mxu0 %v2201_v3 }
0x1020   :  { %2176 = vmatpush3.msra.mxu0 %v1653_v29 }
0x1021   :  { %2177 = vmatprep.subr.mxu0 %v2201_v3 }
0x1022   :  { %2178 = vmatpush3.msra.mxu0 %v1650_v34 }
0x1023   :  { %2180 = vmatmul.mubr.msk.f32.vlgmr.msra.gmra.mxu0 %vm227_vm2, %v1911_v35 }
0x1028   :  { %v1679_v37 = vpop.permute.xlu0 %1678  ;;  %v1836_v44 = vpop.permute.xlu1 %1835 }
0x10e3   :  { %v1750_v36 = vpop.f32.mrf.mxu0 }
0x10e4   :  { %v1751_v38 = vadd.f32 %v1750_v36, %v1679_v37 }
0x10e5   :  { %v2181_v40 = vpop.f32.mrf.mxu0 }
0x10e6   :  { %v1754_v39 = vmax.f32 %v1751_v38, 0.0 }
0x10e8   :  { %2183 = vmatpush3.msra.mxu1 %v1754_v39 }
0x10e9   :  { %2185 = vmatmul.mubr.msk.f32.vlgmr.msra.gmra.mxu1 %vm58_vm1, %v1914_v41 }
0x11a9   :  { %v1826_v42 = vpop.f32.mrf.mxu1 }
0x11aa   :  { %v1830_v43 = vadd.f32 %v1826_v42, %v2644_v5 }
0x11ab   :  { %v2186_v3 = vpop.f32.mrf.mxu1 }
0x11ac   :  { %v1838_v45 = vadd.f32 %v1836_v44, %v1830_v43 }
0x11ae   :  { %1839 = vst [vmem:[%s2706_s10] sm:$0xff] %v1838_v45 }

// kernel: fwd_pallas.4
= control target key start
LH: loop header
LB: loop body
LE: loop exit
PB: predicated region body
PF: predicated region fallthrough
CT: control target
= control target key end

     0   :  { %s1337_s13 = smov 0   ;;  %s1673_s0 = inlined_call_operand.vmem [shape: f32[8,512], index: 0, kind: input, shape index: {}]   ;;  %s1674_s1 = inlined_call_operand.vmem [shape: f32[9,1,256], index: 1, kind: input, shape index: {}]   ;;  %s1675_s2 = inlined_call_operand.vmem [shape: f32[2,8,1], index: 2, kind: input, shape index: {}]   ;;  %s1676_s3 = inlined_call_operand.vmem [shape: f32[2,8,1], index: 3, kind: input, shape index: {}]   ;;  %s1677_s4 = inlined_call_operand.vmem [shape: f32[2,8,8], index: 4, kind: input, shape index: {}]   ;;  %s1678_s5 = inlined_call_operand.vmem [shape: f32[2,8,1], index: 5, kind: input, shape index: {}]   ;;  %s1679_s6 = inlined_call_operand.vmem [shape: f32[2,8,72], index: 6, kind: input, shape index: {}]   ;;  %s1680_s7 = inlined_call_operand.vmem [shape: f32[2,8,1], index: 7, kind: input, shape index: {}]   ;;  %s1681_s8 = inlined_call_operand.vmem [shape: f32[2,8,8], index: 8, kind: input, shape index: {}]   ;;  %s1682_s9 = inlined_call_operand.vmem [shape: f32[2,8,1], index: 9, kind: input, shape index: {}]   ;;  %s1683_s10 = inlined_call_operand.vmem [shape: f32[8,512], index: 10, kind: output, shape index: {}]  }
   0x1 LB: > { %s1212_s14 = sadd.s32 4294967295, %s1270_s13   ;;  %p1216_p0 = scmp.ge.s32.totalorder %s1270_s13, 1  ;;  %s1270_s13 = sphi %s1337_s13, %s20_s13  }
   0x2   : > { %p313_p1 = scmp.lt.s32.totalorder %s1270_s13, 3 }
   0x4   : > { %p314_p2 = pnand %p1216_p0, %p313_p1 }
   0x5   : > { %s1217_s21 = sshll.u32 (!%p314_p2), %s1212_s14, 1  ;;  %s1274_s28 = smov (!%p314_p2), 111  }
   0x6   : > { %317 = sbr.rel (%p314_p2) target bundleno = 1650 (0x672), region = 60  ;;  %p352_p3 = scmp.lt.s32.totalorder (!%p314_p2), %s1217_s21, 3 }
   0x7   : > { %s1275_s29 = smov (!%p314_p2), 112   ;;  %s1276_s30 = smov (!%p314_p2), 113  }
   0x8   : > { %s1277_s11 = smov (!%p314_p2), 127   ;;  %s1278_s12 = smov (!%p314_p2), 1  }
   0x9   : > { %s1279_s14 = smov (!%p314_p2), 15   ;;  %s1280_s15 = smov (!%p314_p2), 16  }
   0xa   : > { %s1281_s16 = smov (!%p314_p2), 17  }
   0xb   : > { %v365_v0 = vld [vmem:[%s1675_s2] sm:$0xff]  ;;  %v1272_v1 = vmov 0   ;;  %v1273_v3 = vmov 0.0   ;;  %s1685_s21 = smov (!%p352_p3, %s1217_s21), 3  ;;  %vm390_vm0 = vcmask 64512   ;;  %v1231_v25 = vld [vmem:[%s1675_s2 + $0x8] sm:$0xff]  ;;  %v471_v28 = vlaneseq }
   0xc   : > { %1262 = vset.pattern.permute.xlu0 %v1272_v1  ;;  %1263 = vset.pattern.permute.xlu1 %v1272_v1  ;;  %v373_v2 = vld [vmem:[%s1676_s3] sm:$0xff]  ;;  %s1218_s22 = sshll.u32 %s1685_s21, 3  ;;  %v1232_v26 = vld [vmem:[%s1676_s3 + $0x8] sm:$0xff]  ;;  %v1228_v33 = vld [vmem:[%s1674_s1 + $0x10] sm:$0x3]  ;;  %vm651_vm9 = vcmask 588800  }
   0xd   : > { %368 = vperm.xlu0 %1262, %v365_v0   ;;  %458 = vmatprep.mubr.f32.mxu1 %v1273_v3  ;;  %v384_v4 = vld [vmem:[%s1678_s5] sm:$0xff]  ;;  %s355_s25 = scalar_lea.vmem %s1673_s0, %s1218_s22  ;;  %v1234_v27 = vld [vmem:[%s1678_s5 + $0x8] sm:$0xff]  ;;  %v479_v29 = vshrl.u32 %v471_v28, 7  ;;  %v1426_v30 = vand.u32 127, %v471_v28  ;;  %s361_s26 = scalar_lea.vmem %s1683_s10, %s1218_s22 }
   0xe   : > { %796 = vmatprep.mubr.f32.mxu0 %v1273_v3  ;;  %387 = vperm.xlu1 %1263, %v384_v4   ;;  %v1364_v6 = vld [vmem:[%s355_s25] sm:$0xff]  ;;  %v1366_v7 = vld [vmem:[%s355_s25 + $0x8] sm:$0xff] }
   0xf   : > { %v383_v15 = vld [vmem:[%s1677_s4] sm:$0xff]  ;;  %v1428_v31 = vsub.s32 0, %v479_v29  ;;  %v1430_v32 = vsub.s32 1, %v479_v29  ;;  %vm626_vm1 = vcmp.lt.s32.totalorder %v1426_v30, 111  ;;  %v1227_v37 = vld [vmem:[%s1674_s1 + $0xe] sm:$0x3] }
  0x10   : > { %v645_v23 = vld [vmem:[%s1680_s7] sm:$0xff]  ;;  %vm604_vm2 = vcmp.lt.s32.totalorder %v1426_v30, 112  ;;  %v1226_v46 = vld [vmem:[%s1674_s1 + $0xc] sm:$0x3]  ;;  %vm582_vm3 = vcmp.lt.s32.totalorder %v1426_v30, 113  ;;  %vm560_vm4 = vcmp.lt.s32.totalorder %v1426_v30, 127 }
  0x11   : > { %376 = vperm.xlu0 %1262, %v373_v2   ;;  %v805_v24 = vld [vmem:[%s1682_s9] sm:$0xff]  ;;  %v1437_v35 = vrot.slane %v1228_v33, %v1428_v31  ;;  %v1440_v36 = vrot.slane %v1228_v33, %v1430_v32  ;;  %v1453_v44 = vrot.slane %v1227_v37, %v1428_v31  ;;  %v1456_v45 = vrot.slane %v1227_v37, %v1430_v32  ;;  %v1225_v55 = vld [vmem:[%s1674_s1 + $0xa] sm:$0x3] }
  0x12   : > { %v1469_v53 = vrot.slane %v1226_v46, %v1428_v31  ;;  %v1472_v54 = vrot.slane %v1226_v46, %v1430_v32  ;;  %v1485_v62 = vrot.slane %v1225_v55, %v1428_v31  ;;  %v1488_v63 = vrot.slane %v1225_v55, %v1430_v32  ;;  %v1224_v0 = vld [vmem:[%s1674_s1 + $0x6] sm:$0x3]  ;;  %v476_v33 = vld [vmem:[%s1674_s1] sm:$0x3] }
  0x13   : > { %vm538_vm5 = vcmp.lt.s32.totalorder %v1426_v30, 1  ;;  %vm516_vm6 = vcmp.lt.s32.totalorder %v1426_v30, 15  ;;  %vm494_vm7 = vcmp.lt.s32.totalorder %v1426_v30, 16  ;;  %vm473_vm8 = vcmp.lt.s32.totalorder %v1426_v30, 17 }
  0x88   : > { %v369_v5 = vpop.permute.xlu0 %368 }
  0x89   : > { %v371_v8 = vmul.f32 %v369_v5, %v1364_v6  ;;  %v372_v9 = vmul.f32 %v369_v5, %v1366_v7  ;;  %v388_v16 = vpop.permute.xlu1 %387 }
  0x8c   : > { %v377_v10 = vpop.permute.xlu0 %376 }
  0x8d   : > { %v379_v11 = vadd.f32 %v377_v10, %v371_v8  ;;  %v380_v12 = vadd.f32 %v377_v10, %v372_v9  ;;  %v1501_v10 = vrot.slane %v1224_v0, %v1428_v31 }
  0x8f   : > { %v382_v13 = vmax.f32 %v380_v12, 0.0  ;;  %v381_v14 = vmax.f32 %v379_v11, 0.0  ;;  %v1504_v11 = vrot.slane %v1224_v0, %v1430_v32  ;;  %v1223_v12 = vld [vmem:[%s1674_s1 + $0x4] sm:$0x3] }
  0x91   : > { %424 = vmatprep.subr.mxu1 %v382_v13 }
  0x92   : > { %425 = vmatpush1.msra.mxu1 %v381_v14 }
  0x93   : > { %1221 = vmatmul.mubr.msk.f32.vlgmr.msra.gmra.mxu1 %vm390_vm0, %v383_v15 }
  0x94   : > { %719 = vmatprep.mubr.f32.mxu1 %v1273_v3 }
 0x153   : > { %v460_v17 = vpop.f32.mrf.mxu1 }
 0x154   : > { %v461_v18 = vadd.f32 %v460_v17, %v388_v16 }
 0x155   : > { %v462_v19 = vpop.f32.mrf.mxu1 }
 0x156   : > { %v1375_v20 = vmax.f32 %v461_v18, 0.0  ;;  %v463_v21 = vadd.f32 %v462_v19, %v388_v16  ;;  %v1518_v19 = vrot.slane %v1223_v12, %v1428_v31 }
 0x158   : > { %v1377_v22 = vmax.f32 %v463_v21, 0.0  ;;  %622 = vrot.lane.b32.xlu1 %v1375_v20, %s1274_s28  ;;  %v1521_v21 = vrot.slane %v1223_v12, %v1430_v32 }
 0x15a   : > { %624 = vrot.lane.b32.xlu0 %v1377_v22, %s1274_s28 }
 0x15c   : > { %600 = vrot.lane.b32.xlu1 %v1375_v20, %s1275_s29 }
 0x15e   : > { %602 = vrot.lane.b32.xlu0 %v1377_v22, %s1275_s29 }
 0x160   : > { %578 = vrot.lane.b32.xlu1 %v1375_v20, %s1276_s30 }
 0x162   : > { %580 = vrot.lane.b32.xlu0 %v1377_v22, %s1276_s30 }
 0x164   : > { %556 = vrot.lane.b32.xlu1 %v1375_v20, %s1277_s11 }
 0x166   : > { %558 = vrot.lane.b32.xlu0 %v1377_v22, %s1277_s11 }
 0x168   : > { %534 = vrot.lane.b32.xlu1 %v1375_v20, %s1278_s12 }
 0x16a   : > { %536 = vrot.lane.b32.xlu0 %v1377_v22, %s1278_s12 }
 0x16c   : > { %512 = vrot.lane.b32.xlu1 %v1375_v20, %s1279_s14 }
 0x16e   : > { %514 = vrot.lane.b32.xlu0 %v1377_v22, %s1279_s14 }
 0x170   : > { %490 = vrot.lane.b32.xlu1 %v1375_v20, %s1280_s15 }
 0x172   : > { %492 = vrot.lane.b32.xlu0 %v1377_v22, %s1280_s15 }
 0x174   : > { %467 = vrot.lane.b32.xlu1 %v1375_v20, %s1281_s16 }
 0x176   : > { %469 = vrot.lane.b32.xlu0 %v1377_v22, %s1281_s16 }
 0x178   : > { %648 = vperm.xlu1 %1263, %v645_v23   ;;  %v1222_v23 = vld [vmem:[%s1674_s1 + $0x2] sm:$0x3] }
 0x179   : > { %v1535_v28 = vrot.slane %v1222_v23, %v1428_v31  ;;  %v1538_v29 = vrot.slane %v1222_v23, %v1430_v32 }
 0x17a   : > { %808 = vperm.xlu0 %1262, %v805_v24  }
 0x17c   : > { %817 = vperm.xlu1 %1263, %v1231_v25  }
 0x17e   : > { %826 = vperm.xlu0 %1262, %v1232_v26  }
 0x180   : > { %839 = vperm.xlu1 %1263, %v1234_v27  }
 0x1ca   : > { %v623_v34 = vpop.permute.xlu1 %622 }
 0x1cc   : > { %v625_v38 = vpop.permute.xlu0 %624 }
 0x1cd   : > { %v627_v39 = vsel %vm626_vm1, %v623_v34, %v625_v38  ;;  %v628_v40 = vsel %vm626_vm1, %v625_v38, %v623_v34 }
 0x1ce   : > { %v642_v41 = vmul.f32 %v1437_v35, %v627_v39  ;;  %v643_v42 = vmul.f32 %v1440_v36, %v628_v40  ;;  %v601_v43 = vpop.permute.xlu1 %600 }
 0x1d0   : > { %v603_v47 = vpop.permute.xlu0 %602  ;;  %669 = vmatprep.subr.mxu1 %v643_v42  ;;  %v1554_v42 = vrot.slane %v476_v33, %v1430_v32 }
 0x1d1   : > { %v605_v48 = vsel %vm604_vm2, %v601_v43, %v603_v47  ;;  %v606_v49 = vsel %vm604_vm2, %v603_v47, %v601_v43  ;;  %670 = vmatpush1.msra.mxu1 %v642_v41  ;;  %v1551_v41 = vrot.slane %v476_v33, %v1428_v31  ;;  %v644_v31 = vld [vmem:[%s1679_s6] sm:$0xff] }
 0x1d2   : > { %v620_v50 = vmul.f32 %v1453_v44, %v605_v48  ;;  %v621_v51 = vmul.f32 %v1456_v45, %v606_v49  ;;  %v579_v52 = vpop.permute.xlu1 %578 }
 0x1d4   : > { %v581_v56 = vpop.permute.xlu0 %580  ;;  %671 = vmatprep.subr.mxu1 %v621_v51 }
 0x1d5   : > { %v583_v57 = vsel %vm582_vm3, %v579_v52, %v581_v56  ;;  %v584_v58 = vsel %vm582_vm3, %v581_v56, %v579_v52  ;;  %672 = vmatpush1.msra.mxu1 %v620_v50 }
 0x1d6   : > { %v598_v59 = vmul.f32 %v1469_v53, %v583_v57  ;;  %v599_v60 = vmul.f32 %v1472_v54, %v584_v58  ;;  %v557_v61 = vpop.permute.xlu1 %556 }
 0x1d8   : > { %v559_v1 = vpop.permute.xlu0 %558  ;;  %673 = vmatprep.subr.mxu1 %v599_v60 }
 0x1d9   : > { %v561_v2 = vsel %vm560_vm4, %v557_v61, %v559_v1  ;;  %v562_v4 = vsel %vm560_vm4, %v559_v1, %v557_v61  ;;  %674 = vmatpush1.msra.mxu1 %v598_v59  ;;  %v728_v59 = vld [vmem:[%s1681_s8] sm:$0xff] }
 0x1da   : > { %v576_v5 = vmul.f32 %v1485_v62, %v561_v2  ;;  %v577_v8 = vmul.f32 %v1488_v63, %v562_v4  ;;  %v535_v9 = vpop.permute.xlu1 %534 }
 0x1dc   : > { %v537_v13 = vpop.permute.xlu0 %536  ;;  %675 = vmatprep.subr.mxu1 %v577_v8 }
 0x1dd   : > { %v539_v14 = vsel %vm538_vm5, %v535_v9, %v537_v13  ;;  %v540_v15 = vsel %vm538_vm5, %v537_v13, %v535_v9  ;;  %676 = vmatpush1.msra.mxu1 %v576_v5 }
 0x1de   : > { %v554_v16 = vmul.f32 %v1501_v10, %v540_v15  ;;  %v555_v17 = vmul.f32 %v1504_v11, %v539_v14  ;;  %677 = vmatprep.subr.mxu1 %v1377_v22  ;;  %v513_v18 = vpop.permute.xlu1 %512 }
 0x1df   : > { %678 = vmatpush1.msra.mxu1 %v1375_v20 }
 0x1e0   : > { %v515_v24 = vpop.permute.xlu0 %514  ;;  %679 = vmatprep.subr.mxu1 %v555_v17 }
 0x1e1   : > { %v517_v25 = vsel %vm516_vm6, %v513_v18, %v515_v24  ;;  %v518_v22 = vsel %vm516_vm6, %v515_v24, %v513_v18  ;;  %680 = vmatpush1.msra.mxu1 %v554_v16 }
 0x1e2   : > { %v532_v26 = vmul.f32 %v1518_v19, %v518_v22  ;;  %v533_v27 = vmul.f32 %v1521_v21, %v517_v25  ;;  %v491_v20 = vpop.permute.xlu1 %490 }
 0x1e4   : > { %v493_v34 = vpop.permute.xlu0 %492  ;;  %681 = vmatprep.subr.mxu1 %v533_v27  ;;  %v1241_v27 = vld [vmem:[%s1682_s9 + $0x8] sm:$0xff] }
 0x1e5   : > { %v495_v37 = vsel %vm494_vm7, %v491_v20, %v493_v34  ;;  %v496_v38 = vsel %vm494_vm7, %v493_v34, %v491_v20  ;;  %682 = vmatpush1.msra.mxu1 %v532_v26 }
 0x1e6   : > { %v510_v39 = vmul.f32 %v1535_v28, %v496_v38  ;;  %v511_v40 = vmul.f32 %v1538_v29, %v495_v37  ;;  %v468_v43 = vpop.permute.xlu1 %467 }
 0x1e8   : > { %v470_v46 = vpop.permute.xlu0 %469  ;;  %683 = vmatprep.subr.mxu1 %v511_v40 }
 0x1e9   : > { %v474_v47 = vsel %vm473_vm8, %v468_v43, %v470_v46  ;;  %v475_v48 = vsel %vm473_vm8, %v470_v46, %v468_v43  ;;  %684 = vmatpush1.msra.mxu1 %v510_v39 }
 0x1ea   : > { %v488_v49 = vmul.f32 %v1551_v41, %v475_v48  ;;  %v489_v50 = vmul.f32 %v1554_v42, %v474_v47 }
 0x1ec   : > { %685 = vmatprep.subr.mxu1 %v489_v50 }
 0x1ed   : > { %686 = vmatpush1.msra.mxu1 %v488_v49 }
 0x1ee   : > { %1229 = vmatmul.mubr.msk.f32.vlgmr.msra.gmra.mxu1 %vm651_vm9, %v644_v31 }
 0x1ef   : > { %1136 = vmatprep.mubr.f32.mxu1 %v1273_v3 }
 0x1f3   : > { %v649_v51 = vpop.permute.xlu1 %648 }
 0x1f5   : > { %v809_v61 = vpop.permute.xlu0 %808 }
 0x1f7   : > { %v818_v5 = vpop.permute.xlu1 %817 }
 0x1f9   : > { %v827_v12 = vpop.permute.xlu0 %826 }
 0x2ae   : > { %v721_v32 = vpop.f32.mrf.mxu1 }
 0x2af   : > { %v722_v52 = vadd.f32 %v721_v32, %v649_v51 }
 0x2b0   : > { %v723_v55 = vpop.f32.mrf.mxu1 }
 0x2b1   : > { %v724_v56 = vadd.f32 %v723_v55, %v649_v51  ;;  %v726_v58 = vmax.f32 %v722_v52, 0.0 }
 0x2b3   : > { %v727_v57 = vmax.f32 %v724_v56, 0.0 }
 0x2b5   : > { %762 = vmatprep.subr.mxu0 %v727_v57 }
 0x2b6   : > { %763 = vmatpush1.msra.mxu0 %v726_v58 }
 0x2b7   : > { %1230 = vmatmul.mubr.msk.f32.vlgmr.msra.gmra.mxu0 %vm390_vm0, %v728_v59 }
 0x2b8   : > { %909 = vmatprep.mubr.f32.mxu0 %v1273_v3 }
 0x377   : > { %v798_v60 = vpop.f32.mrf.mxu0 }
 0x378   : > { %v803_v0 = vadd.f32 %v798_v60, %v1364_v6  ;;  %v1233_v6 = vld [vmem:[%s1677_s4 + $0x8] sm:$0xff] }
 0x379   : > { %v800_v1 = vpop.f32.mrf.mxu0 }
 0x37a   : > { %v1573_v2 = vadd.f32 %v809_v61, %v803_v0  ;;  %v804_v4 = vadd.f32 %v800_v1, %v1366_v7  ;;  %v840_v7 = vpop.permute.xlu1 %839 }
 0x37c   : > { %v820_v8 = vmul.f32 %v818_v5, %v1573_v2  ;;  %v1577_v9 = vadd.f32 %v809_v61, %v804_v4 }
 0x37e   : > { %v821_v13 = vmul.f32 %v818_v5, %v1577_v9  ;;  %v829_v14 = vadd.f32 %v827_v12, %v820_v8 }
 0x380   : > { %v830_v15 = vadd.f32 %v827_v12, %v821_v13  ;;  %v831_v17 = vmax.f32 %v829_v14, 0.0 }
 0x382   : > { %v832_v16 = vmax.f32 %v830_v15, 0.0 }
 0x384   : > { %875 = vmatprep.subr.mxu0 %v832_v16 }
 0x385   : > { %876 = vmatpush1.msra.mxu0 %v831_v17 }
 0x386   : > { %1235 = vmatmul.mubr.msk.f32.vlgmr.msra.gmra.mxu0 %vm390_vm0, %v1233_v6 }
 0x387   : > { %1058 = vmatprep.mubr.f32.mxu0 %v1273_v3  ;;  %v1237_v3 = vld [vmem:[%s1680_s7 + $0x8] sm:$0xff] }
 0x446   : > { %v911_v18 = vpop.f32.mrf.mxu0 }
 0x447   : > { %v912_v23 = vadd.f32 %v911_v18, %v840_v7 }
 0x448   : > { %v913_v24 = vpop.f32.mrf.mxu0 }
 0x449   : > { %v916_v25 = vmax.f32 %v912_v23, 0.0  ;;  %v914_v22 = vadd.f32 %v913_v24, %v840_v7 }
 0x44b   : > { %v917_v26 = vmax.f32 %v914_v22, 0.0  ;;  %974 = vrot.lane.b32.xlu0 %v916_v25, %s1274_s28 }
 0x44d   : > { %976 = vrot.lane.b32.xlu1 %v917_v26, %s1274_s28 }
 0x44f   : > { %966 = vrot.lane.b32.xlu0 %v916_v25, %s1275_s29 }
 0x451   : > { %968 = vrot.lane.b32.xlu1 %v917_v26, %s1275_s29 }
 0x453   : > { %958 = vrot.lane.b32.xlu0 %v916_v25, %s1276_s30 }
 0x455   : > { %960 = vrot.lane.b32.xlu1 %v917_v26, %s1276_s30 }
 0x457   : > { %950 = vrot.lane.b32.xlu0 %v916_v25, %s1277_s11 }
 0x459   : > { %952 = vrot.lane.b32.xlu1 %v917_v26, %s1277_s11 }
 0x45b   : > { %942 = vrot.lane.b32.xlu0 %v916_v25, %s1278_s12 }
 0x45d   : > { %944 = vrot.lane.b32.xlu1 %v917_v26, %s1278_s12 }
 0x45f   : > { %934 = vrot.lane.b32.xlu0 %v916_v25, %s1279_s14 }
 0x461   : > { %936 = vrot.lane.b32.xlu1 %v917_v26, %s1279_s14 }
 0x463   : > { %926 = vrot.lane.b32.xlu0 %v916_v25, %s1280_s15 }
 0x465   : > { %928 = vrot.lane.b32.xlu1 %v917_v26, %s1280_s15 }
 0x467   : > { %918 = vrot.lane.b32.xlu0 %v916_v25, %s1281_s16 }
 0x469   : > { %920 = vrot.lane.b32.xlu1 %v917_v26, %s1281_s16 }
 0x46b   : > { %988 = vperm.xlu0 %1262, %v1237_v3  }
 0x46d   : > { %1149 = vperm.xlu1 %1263, %v1241_v27  }
 0x4bd   : > { %v975_v20 = vpop.permute.xlu0 %974 }
 0x4bf   : > { %v977_v33 = vpop.permute.xlu1 %976 }
 0x4c0   : > { %v978_v34 = vsel %vm626_vm1, %v975_v20, %v977_v33  ;;  %v979_v37 = vsel %vm626_vm1, %v977_v33, %v975_v20 }
 0x4c1   : > { %v980_v38 = vmul.f32 %v978_v34, %v1437_v35  ;;  %v981_v39 = vmul.f32 %v979_v37, %v1440_v36  ;;  %v967_v40 = vpop.permute.xlu0 %966 }
 0x4c3   : > { %v969_v43 = vpop.permute.xlu1 %968  ;;  %1008 = vmatprep.subr.mxu0 %v981_v39 }
 0x4c4   : > { %v970_v46 = vsel %vm604_vm2, %v967_v40, %v969_v43  ;;  %v971_v47 = vsel %vm604_vm2, %v969_v43, %v967_v40  ;;  %1009 = vmatpush1.msra.mxu0 %v980_v38 }
 0x4c5   : > { %v972_v48 = vmul.f32 %v970_v46, %v1453_v44  ;;  %v973_v49 = vmul.f32 %v971_v47, %v1456_v45  ;;  %v959_v50 = vpop.permute.xlu0 %958 }
 0x4c7   : > { %v961_v31 = vpop.permute.xlu1 %960  ;;  %1010 = vmatprep.subr.mxu0 %v973_v49 }
 0x4c8   : > { %v962_v35 = vsel %vm582_vm3, %v959_v50, %v961_v31  ;;  %v963_v36 = vsel %vm582_vm3, %v961_v31, %v959_v50  ;;  %1011 = vmatpush1.msra.mxu0 %v972_v48 }
 0x4c9   : > { %v964_v32 = vmul.f32 %v962_v35, %v1469_v53  ;;  %v965_v51 = vmul.f32 %v963_v36, %v1472_v54  ;;  %v951_v52 = vpop.permute.xlu0 %950 }
 0x4cb   : > { %v953_v55 = vpop.permute.xlu1 %952  ;;  %1012 = vmatprep.subr.mxu0 %v965_v51 }
 0x4cc   : > { %v954_v44 = vsel %vm560_vm4, %v951_v52, %v953_v55  ;;  %v955_v45 = vsel %vm560_vm4, %v953_v55, %v951_v52  ;;  %1013 = vmatpush1.msra.mxu0 %v964_v32 }
 0x4cd   : > { %v956_v56 = vmul.f32 %v954_v44, %v1485_v62  ;;  %v957_v57 = vmul.f32 %v955_v45, %v1488_v63  ;;  %v943_v58 = vpop.permute.xlu0 %942 }
 0x4cf   : > { %v945_v59 = vpop.permute.xlu1 %944  ;;  %1014 = vmatprep.subr.mxu0 %v957_v57 }
 0x4d0   : > { %v946_v53 = vsel %vm538_vm5, %v943_v58, %v945_v59  ;;  %v947_v54 = vsel %vm538_vm5, %v945_v59, %v943_v58  ;;  %1015 = vmatpush1.msra.mxu0 %v956_v56 }
 0x4d1   : > { %v948_v60 = vmul.f32 %v947_v54, %v1501_v10  ;;  %v949_v61 = vmul.f32 %v946_v53, %v1504_v11  ;;  %1016 = vmatprep.subr.mxu0 %v917_v26  ;;  %v935_v0 = vpop.permute.xlu0 %934 }
 0x4d2   : > { %1017 = vmatpush1.msra.mxu0 %v916_v25 }
 0x4d3   : > { %v937_v62 = vpop.permute.xlu1 %936  ;;  %1018 = vmatprep.subr.mxu0 %v949_v61 }
 0x4d4   : > { %v938_v63 = vsel %vm516_vm6, %v935_v0, %v937_v62  ;;  %v939_v1 = vsel %vm516_vm6, %v937_v62, %v935_v0  ;;  %1019 = vmatpush1.msra.mxu0 %v948_v60 }
 0x4d5   : > { %v940_v4 = vmul.f32 %v939_v1, %v1518_v19  ;;  %v941_v5 = vmul.f32 %v938_v63, %v1521_v21  ;;  %v927_v8 = vpop.permute.xlu0 %926 }
 0x4d7   : > { %v929_v10 = vpop.permute.xlu1 %928  ;;  %1020 = vmatprep.subr.mxu0 %v941_v5 }
 0x4d8   : > { %v930_v11 = vsel %vm494_vm7, %v927_v8, %v929_v10  ;;  %v931_v12 = vsel %vm494_vm7, %v929_v10, %v927_v8  ;;  %1021 = vmatpush1.msra.mxu0 %v940_v4 }
 0x4d9   : > { %v932_v13 = vmul.f32 %v931_v12, %v1535_v28  ;;  %v933_v14 = vmul.f32 %v930_v11, %v1538_v29  ;;  %v919_v15 = vpop.permute.xlu0 %918  ;;  %v1236_v28 = vld [vmem:[%s1679_s6 + $0x8] sm:$0xff] }
 0x4db   : > { %v921_v16 = vpop.permute.xlu1 %920  ;;  %1022 = vmatprep.subr.mxu0 %v933_v14 }
 0x4dc   : > { %v922_v19 = vsel %vm473_vm8, %v919_v15, %v921_v16  ;;  %v923_v21 = vsel %vm473_vm8, %v921_v16, %v919_v15  ;;  %1023 = vmatpush1.msra.mxu0 %v932_v13 }
 0x4dd   : > { %v924_v17 = vmul.f32 %v923_v21, %v1551_v41  ;;  %v925_v6 = vmul.f32 %v922_v19, %v1554_v42  ;;  %v1239_v41 = vld [vmem:[%s1681_s8 + $0x8] sm:$0xff] }
 0x4df   : > { %1024 = vmatprep.subr.mxu0 %v925_v6 }
 0x4e0   : > { %1025 = vmatpush1.msra.mxu0 %v924_v17 }
 0x4e1   : > { %1238 = vmatmul.mubr.msk.f32.vlgmr.msra.gmra.mxu0 %vm651_vm9, %v1236_v28 }
 0x4e6   : > { %v989_v7 = vpop.permute.xlu0 %988 }
 0x4e8   : > { %v1150_v26 = vpop.permute.xlu1 %1149 }
 0x5a1   : > { %v1060_v29 = vpop.f32.mrf.mxu0 }
 0x5a2   : > { %v1061_v18 = vadd.f32 %v1060_v29, %v989_v7 }
 0x5a3   : > { %v1062_v23 = vpop.f32.mrf.mxu0 }
 0x5a4   : > { %v1063_v30 = vadd.f32 %v1062_v23, %v989_v7  ;;  %v1065_v25 = vmax.f32 %v1061_v18, 0.0 }
 0x5a6   : > { %v1066_v24 = vmax.f32 %v1063_v30, 0.0 }
 0x5a8   : > { %1102 = vmatprep.subr.mxu1 %v1066_v24 }
 0x5a9   : > { %1103 = vmatpush1.msra.mxu1 %v1065_v25 }
 0x5aa   : > { %1240 = vmatmul.mubr.msk.f32.vlgmr.msra.gmra.mxu1 %vm390_vm0, %v1239_v41 }
 0x66a   : > { %v1138_v42 = vpop.f32.mrf.mxu1 }
 0x66b   : > { %v1143_v22 = vadd.f32 %v1138_v42, %v1573_v2 }
 0x66c   : > { %v1140_v3 = vpop.f32.mrf.mxu1 }
 0x66d   : > { %v1152_v27 = vadd.f32 %v1150_v26, %v1143_v22  ;;  %v1144_v20 = vadd.f32 %v1140_v3, %v1577_v9 }
 0x66f   : > { %1154 = vst [vmem:[%s361_s26] sm:$0xff] %v1152_v27  ;;  %v1153_v33 = vadd.f32 %v1150_v26, %v1144_v20 }
 0x671   : > { %1155 = vst [vmem:[%s361_s26 + $0x8] sm:$0xff] %v1153_v33 }
 0x672 PF: > { %s20_s13 = sadd.s32 1, %s1270_s13  }
 0x673   : > { %p17_p4 = scmp.ge.s32.totalorder %s20_s13, 4  }
 0x675   :  { %19 = sbr.rel (!%p17_p4) target bundleno = 1 (0x1), region = 105 }

</bundles_post_ra>
